<compile_context>
chip_gen: v7x
topology: tpu7x:2x2x1
jax: 0.10.0
libtpu: 0.0.40
codegen_flags: <defaults>
</compile_context>

<pallas_src>
import functools
import math

import jax
import jax.numpy as jnp
from jax import lax
from jax.experimental import pallas as pl
from jax.experimental.pallas import tpu as pltpu

LANE = 128  # vreg lane width — pad feature dims to this


def _round_up(v, m):
    return ((v + m - 1) // m) * m


def _lcm(a, b):
    return a * b // math.gcd(a, b)


def _relu(x):
    return jnp.maximum(x, 0.0)


def _masked_log_softmax(logits, nclass):
    # Padded class columns get a huge negative logit so exp() -> 0 exactly.
    col = lax.broadcasted_iota(jnp.int32, logits.shape, 1)
    logits = jnp.where(col < nclass, logits, -1e30)
    m = jnp.max(logits, axis=1, keepdims=True)
    sh = logits - m
    return sh - jnp.log(jnp.sum(jnp.exp(sh), axis=1, keepdims=True))


# --------------------------- hardware-aware knobs ---------------------------

def _vmem_capacity_bytes():
    try:
        return int(pltpu.get_tpu_info().vmem_capacity_bytes)
    except Exception:
        return 64 << 20          # conservative default (v7x-sized VMEM)


def _vmem_ceiling():
    cap = _vmem_capacity_bytes()
    # ~44 MiB on 64-MiB chips (v7x), ~100 MiB on 128-MiB chips (v5e/v6e).
    return max(16 << 20, min(cap - (20 << 20), 100 << 20))


def _default_row_tile():
    # v5e's MXU is 4x128^2 (128 rows saturate it); v6e/v7x have 256-wide MXUs.
    try:
        kind = jax.devices()[0].device_kind.lower()
        if "v5 lite" in kind or "v5lite" in kind or "v5e" in kind:
            return 128
    except Exception:
        pass
    return 256


# ----------------------------- Pallas kernels -------------------------------

def _gin_fused_kernel(nclass, mask_ref, scale_ref, x_ref,
                      w0_ref, b0_ref, w1_ref, b1_ref,
                      w2_ref, b2_ref, w3_ref, b3_ref, o_ref):
    """All four layers fused; everything resident in VMEM (small graphs)."""
    f32, bf = jnp.float32, jnp.bfloat16
    a = mask_ref[...].astype(bf)            # (Np, Np)  exact 0/1 (int8) or bf16 adj
    s_row = scale_ref[...]                  # (Np, 1)   f32 per-row scale (1/deg or 1)
    x = x_ref[...]                          # (Np, Fp)  f32

    # ix=0: aggregate + linear + relu
    h = x + s_row * jnp.dot(a, x.astype(bf), preferred_element_type=f32)
    t = _relu(jnp.dot(h.astype(bf), w0_ref[...], preferred_element_type=f32)
              + b0_ref[...])
    # ix=1: linear + relu
    t = _relu(jnp.dot(t.astype(bf), w1_ref[...], preferred_element_type=f32)
              + b1_ref[...])
    # ix=2: aggregate + linear + relu
    h = t + s_row * jnp.dot(a, t.astype(bf), preferred_element_type=f32)
    t = _relu(jnp.dot(h.astype(bf), w2_ref[...], preferred_element_type=f32)
              + b2_ref[...])
    # ix=3: linear + log_softmax
    logits = (jnp.dot(t.astype(bf), w3_ref[...], preferred_element_type=f32)
              + b3_ref[...])
    o_ref[...] = _masked_log_softmax(logits, nclass)


def _gin_block_kernel(final, nclass,
                      mask_ref, xk_ref, xres_ref, scale_ref,
                      wa_ref, ba_ref, wb_ref, bb_ref, o_ref, acc_ref):
    """One GIN block (aggregate + 2 linears) on a (row_tile, k_tile) grid cell.

    mask_ref : (row_tile, k_tile)  int8 0/1 mask or bf16 adjacency (streamed)
    xk_ref   : (k_tile, f_in)      bf16 feature K-block (streamed)
    xres_ref : (row_tile, f_in)    f32/bf16 residual row tile (fetched once / row)
    scale_ref: (row_tile, 1)       f32 per-row aggregation scale
    acc_ref  : (row_tile, f_in)    f32 aggregation accumulator (VMEM scratch)
    """
    f32, bf = jnp.float32, jnp.bfloat16
    k = pl.program_id(1)

    @pl.when(k == 0)
    def _():
        acc_ref[...] = jnp.zeros_like(acc_ref)

    acc_ref[...] += jnp.dot(mask_ref[...].astype(bf), xk_ref[...],
                            preferred_element_type=f32)

    @pl.when(k == pl.num_programs(1) - 1)
    def _():
        h = xres_ref[...].astype(f32) + scale_ref[...] * acc_ref[...]
        s = _relu(jnp.dot(h.astype(bf), wa_ref[...], preferred_element_type=f32)
                  + ba_ref[...])
        out = (jnp.dot(s.astype(bf), wb_ref[...], preferred_element_type=f32)
               + bb_ref[...])
        if final:
            out = _masked_log_softmax(out, nclass)
        else:
            out = _relu(out)
        o_ref[...] = out.astype(o_ref.dtype)


# ------------------------------- wrappers ------------------------------------

def _vmem_spec():
    return pl.BlockSpec(memory_space=pltpu.MemorySpace.VMEM)


def _gin_fused(maskp, scalep, xp, padded_params, nclass, vmem_limit):
    n_pad = xp.shape[0]
    c_pad = padded_params[3][0].shape[1]
    args = [maskp, scalep, xp]
    for w, b in padded_params:
        args += [w, b]
    return pl.pallas_call(
        functools.partial(_gin_fused_kernel, nclass),
        out_shape=jax.ShapeDtypeStruct((n_pad, c_pad), jnp.float32),
        in_specs=[_vmem_spec()] * len(args),
        out_specs=_vmem_spec(),
        compiler_params=pltpu.CompilerParams(vmem_limit_bytes=int(vmem_limit)),
    )(*args)


def _mask_spec(row_tile, k_tile, k_steps):
    idx = lambda i, k: (i, k)
    if k_steps >= 3:
        try:
            # 3-deep pipelining on the HBM-bound adjacency stream.
            return pl.BlockSpec((row_tile, k_tile), idx,
                                pipeline_mode=pl.Buffered(3))
        except Exception:
            pass
    return pl.BlockSpec((row_tile, k_tile), idx)


def _gin_block(maskp, scalep, x_stream, x_resid, wa, ba, wb, bb, *,
               final, nclass, row_tile, k_tile, out_dtype):
    n_pad = maskp.shape[0]
    f_in = x_stream.shape[1]
    f_out = wb.shape[1]
    n_rows = n_pad // row_tile
    k_steps = n_pad // k_tile

    in_specs = [
        _mask_spec(row_tile, k_tile, k_steps),                 # adj mask tile
        pl.BlockSpec((k_tile, f_in), lambda i, k: (k, 0)),     # x K-block (bf16)
        pl.BlockSpec((row_tile, f_in), lambda i, k: (i, 0)),   # residual row tile
        pl.BlockSpec((row_tile, 1), lambda i, k: (i, 0)),      # per-row scale
        pl.BlockSpec(wa.shape, lambda i, k: (0, 0)),
        pl.BlockSpec(ba.shape, lambda i, k: (0, 0)),
        pl.BlockSpec(wb.shape, lambda i, k: (0, 0)),
        pl.BlockSpec(bb.shape, lambda i, k: (0, 0)),
    ]
    out_spec = pl.BlockSpec((row_tile, f_out), lambda i, k: (i, 0))

    # VMEM budget: streamed buffers x depth, resident blocks x2 (possible
    # double-buffering by Pallas), f32 scratch, plus compiler headroom.
    mask_elt = maskp.dtype.itemsize
    xres_elt = x_resid.dtype.itemsize
    out_elt = jnp.dtype(out_dtype).itemsize
    mask_bufs = 3 if k_steps >= 3 else 2
    need = (row_tile * k_tile * mask_elt * mask_bufs
            + k_tile * f_in * 2 * 2
            + row_tile * f_in * xres_elt * 2
            + row_tile * 4 * 2
            + row_tile * f_out * out_elt * 2
            + 2 * ((wa.size + wb.size) * 2 + (ba.size + bb.size) * 4)
            + row_tile * f_in * 4
            + (6 << 20))
    vmem_limit = int(min(_vmem_ceiling(), max(need, 32 << 20)))

    return pl.pallas_call(
        functools.partial(_gin_block_kernel, final, nclass),
        out_shape=jax.ShapeDtypeStruct((n_pad, f_out), out_dtype),
        grid=(n_rows, k_steps),
        in_specs=in_specs,
        out_specs=out_spec,
        scratch_shapes=[pltpu.VMEM((row_tile, f_in), jnp.float32)],
        compiler_params=pltpu.CompilerParams(
            dimension_semantics=("parallel", "arbitrary"),
            vmem_limit_bytes=vmem_limit,
        ),
    )(maskp, x_stream, x_resid, scalep, wa, ba, wb, bb)


def gin_forward(x, adj, params, *, row_tile=None, k_tile=None, force_tiled=False):
    """params: list of 4 (W [in,out] f32, b [out] f32) for the MyLinear layers.

    Layer schedule (mlp_layers=2, nlayers=2):
      ix=0: aggregate + linear + relu
      ix=1: linear + relu
      ix=2: aggregate + linear + relu
      ix=3: linear + log_softmax (dim=1)
    """
    n, f = x.shape
    nhid = params[0][0].shape[1]
    nclass = params[-1][0].shape[1]
    f_pad = _round_up(f, LANE)
    h_pad = _round_up(nhid, LANE)
    c_pad = _round_up(nclass, LANE)

    # Zero-pad weights/biases to lane-dense widths; weights cast to bf16.
    def pad_w(w, din, dout):
        wp = jnp.zeros((din, dout), jnp.float32).at[:w.shape[0], :w.shape[1]].set(w)
        return wp.astype(jnp.bfloat16)

    def pad_b(b, dout):
        return jnp.zeros((1, dout), jnp.float32).at[0, :b.shape[0]].set(b)

    dims = [(f_pad, h_pad), (h_pad, h_pad), (h_pad, h_pad), (h_pad, c_pad)]
    pw = [(pad_w(w, din, dout), pad_b(b, dout))
          for (w, b), (din, dout) in zip(params, dims)]

    # --- exact adjacency decomposition: adj == diag(scale) @ {0,1}-mask ? ---
    exact = False
    m01 = None
    rs = None
    try:
        rs_full = jnp.max(adj, axis=1, keepdims=True)
        rs = jnp.where(rs_full > 0, rs_full, 1.0).astype(jnp.float32)
        m01 = (adj > 0)
        exact = bool(jnp.all(jnp.where(m01, rs, 0.0) == adj))
    except Exception:   # traced adj etc. -> fall back to bf16 adjacency
        exact = False
    mask_elt = 1 if exact else 2

    cap = _vmem_capacity_bytes()
    ceiling = _vmem_ceiling()
    fused_threshold = (28 << 20) if cap <= (64 << 20) else (56 << 20)

    # Fused-path VMEM estimate (operands + live temporaries + weights).
    n_f = max(_round_up(n, LANE), LANE)
    w_bytes = sum(w.size * 2 + b.size * 4 for w, b in pw)
    fused_bytes = (n_f * n_f * mask_elt + n_f * 4
                   + n_f * f_pad * 4 + n_f * c_pad * 4
                   + 3 * n_f * max(f_pad, h_pad, c_pad) * 4
                   + w_bytes)
    use_fused = (not force_tiled) and fused_bytes < fused_threshold

    if use_fused:
        n_pad = n_f
    else:
        if row_tile is None:
            row_tile = _default_row_tile()
        row_tile = max(32, _round_up(row_tile, 32))      # int8 sublane packing
        if k_tile is None:
            k_tile = 4 * row_tile
        k_tile = max(LANE, _round_up(k_tile, LANE))
        # Keep the streamed adj tiles inside a fraction of the VMEM budget.
        while k_tile > LANE and row_tile * k_tile * mask_elt * 3 > ceiling // 4:
            k_tile //= 2
        n_pad = _round_up(n, _lcm(row_tile, k_tile))
        if n_pad <= k_tile:
            k_tile = n_pad                                # single K step

    # --- padded node-side arrays, built directly in their target dtypes ---
    if exact:
        maskp = (jnp.zeros((n_pad, n_pad), jnp.int8)
                 .at[:n, :n].set(m01.astype(jnp.int8)))
    else:
        maskp = (jnp.zeros((n_pad, n_pad), jnp.bfloat16)
                 .at[:n, :n].set(adj.astype(jnp.bfloat16)))
    scalep = jnp.ones((n_pad, 1), jnp.float32)
    if exact:
        scalep = scalep.at[:n, :].set(rs)
    xp = jnp.zeros((n_pad, f_pad), jnp.float32).at[:n, :f].set(x)

    if use_fused:
        fused_limit = min(ceiling, max(2 * fused_bytes + (16 << 20), 32 << 20))
        out = _gin_fused(maskp, scalep, xp, pw, nclass, fused_limit)
    else:
        (w0, b0), (w1, b1), (w2, b2), (w3, b3) = pw
        x_bf = xp.astype(jnp.bfloat16)
        # Block 1 (ix=0,1): residual in f32, output written directly in bf16.
        h1 = _gin_block(maskp, scalep, x_bf, xp, w0, b0, w1, b1,
                        final=False, nclass=nclass,
                        row_tile=row_tile, k_tile=k_tile,
                        out_dtype=jnp.bfloat16)
        # Block 2 (ix=2,3): h1 (bf16) is both the K-stream and the residual.
        out = _gin_block(maskp, scalep, h1, h1, w2, b2, w3, b3,
                         final=True, nclass=nclass,
                         row_tile=row_tile, k_tile=k_tile,
                         out_dtype=jnp.float32)
    return out[:n, :nclass]


# ----------------------------- parameter init --------------------------------

def init_mylinear(key, in_features, out_features):
    # MyLinear.reset_parameters: stdv = 1/sqrt(weight.T.size(1)) = 1/sqrt(in_features)
    stdv = 1.0 / math.sqrt(in_features)
    kw, kb = jax.random.split(key)
    w = jax.random.uniform(kw, (in_features, out_features), jnp.float32, -stdv, stdv)
    b = jax.random.uniform(kb, (out_features,), jnp.float32, -stdv, stdv)
    return w, b


# -------------------------------- references ----------------------------------

def ref_forward_f32(x, adj, params):
    h = x
    last = len(params) - 1
    for ix, (w, b) in enumerate(params):
        if ix % 2 == 0:
            h = h + adj @ h
        h = h @ w + b
        if ix != last:
            h = jnp.maximum(h, 0.0)
    return jax.nn.log_softmax(h, axis=1)


def ref_forward_matched(x, adj, params, *, h1_bf16):
    """Mirrors kernel math: exact 0/1 mask + f32 row scale when decomposable
    (else bf16 adj), bf16 matmul operands, f32 accumulation, optional bf16
    rounding of the block-1 output (tiled path)."""
    bf, f32 = jnp.bfloat16, jnp.float32
    rs_full = jnp.max(adj, axis=1, keepdims=True)
    rs = jnp.where(rs_full > 0, rs_full, 1.0).astype(f32)
    m01 = (adj > 0)
    exact = bool(jnp.all(jnp.where(m01, rs, 0.0) == adj))
    if exact:
        mask = m01.astype(bf)
        scale = rs
    else:
        mask = adj.astype(bf)
        scale = jnp.ones_like(rs)
    h = x
    last = len(params) - 1
    for ix, (w, b) in enumerate(params):
        if ix % 2 == 0:
            h = h + scale * jnp.dot(mask, h.astype(bf), preferred_element_type=f32)
        h = jnp.dot(h.astype(bf), w.astype(bf), preferred_element_type=f32) + b
        if ix != last:
            h = jnp.maximum(h, 0.0)
        if h1_bf16 and ix == 1:
            h = h.astype(bf).astype(f32)
    return jax.nn.log_softmax(h, axis=1)


# ---------------------------------- main ---------------------------------------

if __name__ == "__main__":
    key = jax.random.PRNGKey(0)

    N, nfeat, nhid, nclass = 400, 16, 32, 8

    k_x, k_adj, k0, k1, k2, k3 = jax.random.split(key, 6)

    x = jax.random.normal(k_x, (N, nfeat), jnp.float32)

    # Symmetric, row-normalized dense adjacency (values exactly {0, 1/deg_i}).
    a = (jax.random.uniform(k_adj, (N, N)) < 0.05).astype(jnp.float32)
    adj = jnp.maximum(a, a.T)
    deg = jnp.clip(jnp.sum(adj, axis=1, keepdims=True), 1.0, None)
    adj = adj / deg

    params = [
        init_mylinear(k0, nfeat, nhid),
        init_mylinear(k1, nhid, nhid),
        init_mylinear(k2, nhid, nhid),
        init_mylinear(k3, nhid, nclass),
    ]

    ref32 = ref_forward_f32(x, adj, params)
    ref_fused = ref_forward_matched(x, adj, params, h1_bf16=False)
    ref_tiled = ref_forward_matched(x, adj, params, h1_bf16=True)

    # Path 1: fully fused single pallas_call (small/mid-size graph fast path).
    out_fused = jax.block_until_ready(gin_forward(x, adj, params))
    assert out_fused.shape == (N, nclass)
    assert jnp.allclose(out_fused, ref_fused, atol=2e-3, rtol=2e-3), \
        "fused kernel mismatch vs matched reference"
    assert jnp.allclose(out_fused, ref32, atol=1e-1, rtol=1e-1), \
        "fused kernel drifted too far from f32 reference"

    # Path 2: K-tiled two-block scalable path (forced, with >=3 K steps so the
    # accumulator + Buffered(3) pipeline are exercised).
    out_tiled = jax.block_until_ready(
        gin_forward(x, adj, params, row_tile=64, k_tile=128, force_tiled=True))
    assert out_tiled.shape == (N, nclass)
    assert jnp.allclose(out_tiled, ref_tiled, atol=2e-3, rtol=2e-3), \
        "tiled kernel mismatch vs matched reference"
    assert jnp.allclose(out_tiled, out_fused, atol=5e-2, rtol=5e-2), \
        "tiled vs fused path mismatch"

    print("KERNEL_OK")
</pallas_src>

<mosaic_0001>
module attributes {stable_mosaic.version = 11 : i64} {
  func.func @_gin_fused_kernel(%arg0: memref<512x512xi8, #tpu.memory_space<vmem>>, %arg1: memref<512x1xf32, #tpu.memory_space<vmem>>, %arg2: memref<512x128xf32, #tpu.memory_space<vmem>>, %arg3: memref<128x128xbf16, #tpu.memory_space<vmem>>, %arg4: memref<1x128xf32, #tpu.memory_space<vmem>>, %arg5: memref<128x128xbf16, #tpu.memory_space<vmem>>, %arg6: memref<1x128xf32, #tpu.memory_space<vmem>>, %arg7: memref<128x128xbf16, #tpu.memory_space<vmem>>, %arg8: memref<1x128xf32, #tpu.memory_space<vmem>>, %arg9: memref<128x128xbf16, #tpu.memory_space<vmem>>, %arg10: memref<1x128xf32, #tpu.memory_space<vmem>>, %arg11: memref<512x128xf32, #tpu.memory_space<vmem>>) attributes {dimension_semantics = [], scalar_prefetch = 0 : i64, scratch_operands = 0 : i64, tpu.core_type = #tpu.core_type<tc>} {
    %c0 = arith.constant 0 : index
    %c0_0 = arith.constant 0 : index
    %0 = vector.load %arg0[%c0, %c0_0] : memref<512x512xi8, #tpu.memory_space<vmem>>, vector<512x512xi8>
    %1 = arith.sitofp %0 : vector<512x512xi8> to vector<512x512xbf16>
    %c0_1 = arith.constant 0 : index
    %c0_2 = arith.constant 0 : index
    %2 = vector.load %arg1[%c0_1, %c0_2] : memref<512x1xf32, #tpu.memory_space<vmem>>, vector<512x1xf32>
    %c0_3 = arith.constant 0 : index
    %c0_4 = arith.constant 0 : index
    %3 = vector.load %arg2[%c0_3, %c0_4] : memref<512x128xf32, #tpu.memory_space<vmem>>, vector<512x128xf32>
    %4 = arith.truncf %3 : vector<512x128xf32> to vector<512x128xbf16>
    %cst = arith.constant dense<0.000000e+00> : vector<512x128xf32>
    %5 = tpu.matmul %1, %4, %cst {dimension_numbers = #tpu.dot_dimension_numbers<[1], [0], [0], [1], [0, 0, 1, 1], [], []>} : vector<512x512xbf16>, vector<512x128xbf16>, vector<512x128xf32> -> vector<512x128xf32>
    %6 = vector.broadcast %2 : vector<512x1xf32> to vector<512x128xf32>
    %7 = arith.mulf %6, %5 : vector<512x128xf32>
    %8 = arith.addf %3, %7 : vector<512x128xf32>
    %9 = arith.truncf %8 : vector<512x128xf32> to vector<512x128xbf16>
    %c0_5 = arith.constant 0 : index
    %c0_6 = arith.constant 0 : index
    %10 = vector.load %arg3[%c0_5, %c0_6] : memref<128x128xbf16, #tpu.memory_space<vmem>>, vector<128x128xbf16>
    %cst_7 = arith.constant dense<0.000000e+00> : vector<512x128xf32>
    %11 = tpu.matmul %9, %10, %cst_7 {dimension_numbers = #tpu.dot_dimension_numbers<[1], [0], [0], [1], [0, 0, 1, 1], [], []>} : vector<512x128xbf16>, vector<128x128xbf16>, vector<512x128xf32> -> vector<512x128xf32>
    %c0_8 = arith.constant 0 : index
    %c0_9 = arith.constant 0 : index
    %12 = vector.load %arg4[%c0_8, %c0_9] : memref<1x128xf32, #tpu.memory_space<vmem>>, vector<1x128xf32>
    %13 = vector.broadcast %12 : vector<1x128xf32> to vector<512x128xf32>
    %14 = arith.addf %11, %13 : vector<512x128xf32>
    %cst_10 = arith.constant 0.000000e+00 : f32
    %15 = vector.broadcast %cst_10 : f32 to vector<512x128xf32>
    %16 = arith.maximumf %14, %15 : vector<512x128xf32>
    %17 = arith.truncf %16 : vector<512x128xf32> to vector<512x128xbf16>
    %c0_11 = arith.constant 0 : index
    %c0_12 = arith.constant 0 : index
    %18 = vector.load %arg5[%c0_11, %c0_12] : memref<128x128xbf16, #tpu.memory_space<vmem>>, vector<128x128xbf16>
    %cst_13 = arith.constant dense<0.000000e+00> : vector<512x128xf32>
    %19 = tpu.matmul %17, %18, %cst_13 {dimension_numbers = #tpu.dot_dimension_numbers<[1], [0], [0], [1], [0, 0, 1, 1], [], []>} : vector<512x128xbf16>, vector<128x128xbf16>, vector<512x128xf32> -> vector<512x128xf32>
    %c0_14 = arith.constant 0 : index
    %c0_15 = arith.constant 0 : index
    %20 = vector.load %arg6[%c0_14, %c0_15] : memref<1x128xf32, #tpu.memory_space<vmem>>, vector<1x128xf32>
    %21 = vector.broadcast %20 : vector<1x128xf32> to vector<512x128xf32>
    %22 = arith.addf %19, %21 : vector<512x128xf32>
    %cst_16 = arith.constant 0.000000e+00 : f32
    %23 = vector.broadcast %cst_16 : f32 to vector<512x128xf32>
    %24 = arith.maximumf %22, %23 : vector<512x128xf32>
    %25 = arith.truncf %24 : vector<512x128xf32> to vector<512x128xbf16>
    %cst_17 = arith.constant dense<0.000000e+00> : vector<512x128xf32>
    %26 = tpu.matmul %1, %25, %cst_17 {dimension_numbers = #tpu.dot_dimension_numbers<[1], [0], [0], [1], [0, 0, 1, 1], [], []>} : vector<512x512xbf16>, vector<512x128xbf16>, vector<512x128xf32> -> vector<512x128xf32>
    %27 = vector.broadcast %2 : vector<512x1xf32> to vector<512x128xf32>
    %28 = arith.mulf %27, %26 : vector<512x128xf32>
    %29 = arith.addf %24, %28 : vector<512x128xf32>
    %30 = arith.truncf %29 : vector<512x128xf32> to vector<512x128xbf16>
    %c0_18 = arith.constant 0 : index
    %c0_19 = arith.constant 0 : index
    %31 = vector.load %arg7[%c0_18, %c0_19] : memref<128x128xbf16, #tpu.memory_space<vmem>>, vector<128x128xbf16>
    %cst_20 = arith.constant dense<0.000000e+00> : vector<512x128xf32>
    %32 = tpu.matmul %30, %31, %cst_20 {dimension_numbers = #tpu.dot_dimension_numbers<[1], [0], [0], [1], [0, 0, 1, 1], [], []>} : vector<512x128xbf16>, vector<128x128xbf16>, vector<512x128xf32> -> vector<512x128xf32>
    %c0_21 = arith.constant 0 : index
    %c0_22 = arith.constant 0 : index
    %33 = vector.load %arg8[%c0_21, %c0_22] : memref<1x128xf32, #tpu.memory_space<vmem>>, vector<1x128xf32>
    %34 = vector.broadcast %33 : vector<1x128xf32> to vector<512x128xf32>
    %35 = arith.addf %32, %34 : vector<512x128xf32>
    %cst_23 = arith.constant 0.000000e+00 : f32
    %36 = vector.broadcast %cst_23 : f32 to vector<512x128xf32>
    %37 = arith.maximumf %35, %36 : vector<512x128xf32>
    %38 = arith.truncf %37 : vector<512x128xf32> to vector<512x128xbf16>
    %c0_24 = arith.constant 0 : index
    %c0_25 = arith.constant 0 : index
    %39 = vector.load %arg9[%c0_24, %c0_25] : memref<128x128xbf16, #tpu.memory_space<vmem>>, vector<128x128xbf16>
    %cst_26 = arith.constant dense<0.000000e+00> : vector<512x128xf32>
    %40 = tpu.matmul %38, %39, %cst_26 {dimension_numbers = #tpu.dot_dimension_numbers<[1], [0], [0], [1], [0, 0, 1, 1], [], []>} : vector<512x128xbf16>, vector<128x128xbf16>, vector<512x128xf32> -> vector<512x128xf32>
    %c0_27 = arith.constant 0 : index
    %c0_28 = arith.constant 0 : index
    %41 = vector.load %arg10[%c0_27, %c0_28] : memref<1x128xf32, #tpu.memory_space<vmem>>, vector<1x128xf32>
    %42 = vector.broadcast %41 : vector<1x128xf32> to vector<512x128xf32>
    %43 = arith.addf %40, %42 : vector<512x128xf32>
    %44 = tpu.iota {dimensions = array<i32: 1>} : vector<512x128xi32>
    %c8_i32 = arith.constant 8 : i32
    %45 = vector.broadcast %c8_i32 : i32 to vector<512x128xi32>
    %46 = arith.cmpi slt, %44, %45 : vector<512x128xi32>
    %cst_29 = arith.constant -1.000000e+30 : f32
    %47 = vector.broadcast %cst_29 : f32 to vector<512x128xf32>
    %48 = arith.select %46, %43, %47 : vector<512x128xi1>, vector<512x128xf32>
    %cst_30 = arith.constant dense<0xFF800000> : vector<512xf32>
    %49 = vector.multi_reduction <maximumf>, %48, %cst_30 [1] : vector<512x128xf32> to vector<512xf32>
    %50 = vector.shape_cast %49 : vector<512xf32> to vector<512x1xf32>
    %51 = vector.broadcast %50 : vector<512x1xf32> to vector<512x128xf32>
    %52 = arith.subf %48, %51 : vector<512x128xf32>
    %53 = math.exp %52 : vector<512x128xf32>
    %cst_31 = arith.constant dense<0.000000e+00> : vector<512xf32>
    %54 = vector.multi_reduction <add>, %53, %cst_31 [1] : vector<512x128xf32> to vector<512xf32>
    %55 = vector.shape_cast %54 : vector<512xf32> to vector<512x1xf32>
    %56 = math.log %55 : vector<512x1xf32>
    %57 = vector.broadcast %56 : vector<512x1xf32> to vector<512x128xf32>
    %58 = arith.subf %52, %57 : vector<512x128xf32>
    %c0_32 = arith.constant 0 : index
    %c0_33 = arith.constant 0 : index
    %59 = vector.load %arg11[%c0_32, %c0_33] : memref<512x128xf32, #tpu.memory_space<vmem>>, vector<512x128xf32>
    tpu.vector_store %arg11[%c0_32, %c0_33], %58 {strides = array<i32>} : memref<512x128xf32, #tpu.memory_space<vmem>>, vector<512x128xf32>,
    return
  }
}

</mosaic_0001>

<bundles_post_ra>
// kernel: tpu_custom_call.1
= control target key start
LH: loop header
LB: loop body
LE: loop exit
PB: predicated region body
PF: predicated region fallthrough
CT: control target
= control target key end

     0   :  { %16 = vsyncpa [#allocation3], 0  ;;  %s9069_s0 = inlined_call_operand.vmem [shape: s8[512,512], index: 0, kind: input, shape index: {}]   ;;  %s9070_s1 = inlined_call_operand.vmem [shape: f32[512,1], index: 1, kind: input, shape index: {}]   ;;  %s9071_s2 = inlined_call_operand.hbm [shape: f32[512,128], index: 2, kind: input, shape index: {}]   ;;  %s9072_s3 = inlined_call_operand.hbm [shape: bf16[128,128], index: 3, kind: input, shape index: {}]   ;;  %s9073_s4 = inlined_call_operand.vmem [shape: f32[1,128], index: 4, kind: input, shape index: {}]   ;;  %s9074_s5 = inlined_call_operand.hbm [shape: bf16[128,128], index: 5, kind: input, shape index: {}]   ;;  %s9075_s6 = inlined_call_operand.vmem [shape: f32[1,128], index: 6, kind: input, shape index: {}]   ;;  %s9076_s7 = inlined_call_operand.hbm [shape: bf16[128,128], index: 7, kind: input, shape index: {}]   ;;  %s9077_s8 = inlined_call_operand.vmem [shape: f32[1,128], index: 8, kind: input, shape index: {}]   ;;  %s9078_s9 = inlined_call_operand.hbm [shape: bf16[128,128], index: 9, kind: input, shape index: {}]   ;;  %s9079_s10 = inlined_call_operand.vmem [shape: f32[1,128], index: 10, kind: input, shape index: {}]   ;;  %s9080_s11 = inlined_call_operand.hbm [shape: f32[512,128], index: 11, kind: output, shape index: {}]  }
   0x1   :  { %17 = vsyncpa [#allocation6], 0 }
   0x2   :  { %18 = vsyncpa [#allocation9], 0 }
   0x3   :  { %19 = vsyncpa [#allocation4], 0  ;;  %s6067_s17 = smov [#allocation5]   ;;  %s5927_s21 = scalar_lea.hbm %s9072_s3, 1024 }
   0x4   :  { %s41_s18 = sshll.u32 %s6067_s17, 4  ;;  %p5928_p0 = scmp.ne.s32.totalorder %s9072_s3, %s5927_s21  ;;  %s42_s18 = int_to_ptr.vmem [resolvable:$true] %s41_s18 }
   0x5   :  { %p5931_p1 = scmp.lt.u32.totalorder %s5927_s21, %s9072_s3 }
   0x7   :  { %p5933_p2 = pnand %p5931_p1, %p5928_p0 }
   0x9   :  { %5936 = shalt.err (!%p5933_p2)
}
   0xa   :  { %s5937_s26 = scalar_lea.vmem %s42_s18, 1024  ;;  %p5942_p4 = scmp.lt.s32.totalorder %s42_s18, %s42_s18 }
   0xb   :  { %p5938_p3 = scmp.ne.s32.totalorder %s42_s18, %s5937_s26  ;;  %p5943_p5 = scmp.lt.s32.totalorder %s5937_s26, %s5937_s26 }
   0xd   :  { %p5944_p6 = por %p5943_p5, %p5942_p4 }
   0xf   :  { %p5945_p7 = pnand %p5944_p6, %p5938_p3 }
  0x11   :  { %5948 = shalt.err (!%p5945_p7)
}
  0x12   :  { %s6068_s27 = smov 64   ;;  %s6069_s28 = smov 4  }
  0x13   :  { %47 = dma.hbm_to_vmem [thread:$0]  %s9072_s3, 1024, %s42_s18, [#allocation6], %s6068_s27, %s6068_s27, %s6069_s28  }
  0x14   :  { %s6070_s12 = smov [#allocation8]   ;;  %s6071_s14 = smov [#allocation2]  }
  0x15   :  { %s69_s13 = sshll.u32 %s6070_s12, 4  ;;  %s29_s15 = sshll.u32 %s6071_s14, 4  ;;  %s70_s13 = int_to_ptr.vmem [resolvable:$true] %s69_s13  ;;  %s30_s15 = int_to_ptr.vmem [resolvable:$true] %s29_s15 }
  0x16   :  { %s5949_s19 = scalar_lea.hbm %s9076_s7, 1024 }
  0x17   :  { %p5950_p8 = scmp.ne.s32.totalorder %s9076_s7, %s5949_s19  ;;  %p5953_p9 = scmp.lt.u32.totalorder %s5949_s19, %s9076_s7 }
  0x19   :  { %p5955_p10 = pnand %p5953_p9, %p5950_p8 }
  0x1b   :  { %5958 = shalt.err (!%p5955_p10)
}
  0x1c   :  { %s5959_s3 = scalar_lea.vmem %s70_s13, 1024  ;;  %p5964_p12 = scmp.lt.s32.totalorder %s70_s13, %s70_s13 }
  0x1d   :  { %p5960_p11 = scmp.ne.s32.totalorder %s70_s13, %s5959_s3  ;;  %p5965_p13 = scmp.lt.s32.totalorder %s5959_s3, %s5959_s3 }
  0x1f   :  { %p5966_p0 = por %p5965_p13, %p5964_p12 }
  0x21   :  { %p5967_p1 = pnand %p5966_p0, %p5960_p11 }
  0x23   :  { %5970 = shalt.err (!%p5967_p1)
}
  0x24   :  { %75 = dma.hbm_to_vmem [thread:$0]  %s9076_s7, 1024, %s70_s13, [#allocation9], %s6068_s27, %s6068_s27, %s6069_s28  }
  0x25   :  { %s5971_s29 = scalar_lea.hbm %s9071_s2, 8192 }
  0x26   :  { %p5972_p2 = scmp.ne.s32.totalorder %s9071_s2, %s5971_s29  ;;  %p5975_p3 = scmp.lt.u32.totalorder %s5971_s29, %s9071_s2 }
  0x28   :  { %p5977_p4 = pnand %p5975_p3, %p5972_p2 }
  0x2a   :  { %5980 = shalt.err (!%p5977_p4)
}
  0x2b   :  { %s5981_s17 = scalar_lea.vmem %s30_s15, 8192  ;;  %p5986_p6 = scmp.lt.s32.totalorder %s30_s15, %s30_s15 }
  0x2c   :  { %p5982_p5 = scmp.ne.s32.totalorder %s30_s15, %s5981_s17  ;;  %p5987_p7 = scmp.lt.s32.totalorder %s5981_s17, %s5981_s17 }
  0x2e   :  { %p5988_p8 = por %p5987_p7, %p5986_p6 }
  0x30   :  { %p5989_p9 = pnand %p5988_p8, %p5982_p5 }
  0x32   :  { %5992 = shalt.err (!%p5989_p9)
}
  0x33   :  { %s6072_s7 = smov 128   ;;  %s6073_s13 = smov 8  }
  0x34   :  { %35 = dma.hbm_to_vmem [thread:$0]  %s9071_s2, 8192, %s30_s15, [#allocation3], %s6072_s7, %s6072_s7, %s6073_s13  }
  0x35   :  { %s6074_s21 = smov [#allocation7]   ;;  %s6075_s23 = smov [#allocation10]  }
  0x36   :  { %s55_s22 = sshll.u32 %s6074_s21, 4  ;;  %s83_s3 = sshll.u32 %s6075_s23, 4  ;;  %s56_s22 = int_to_ptr.vmem [resolvable:$true] %s55_s22  ;;  %s84_s3 = int_to_ptr.vmem [resolvable:$true] %s83_s3 }
  0x37   :  { %s5993_s25 = scalar_lea.hbm %s9074_s5, 1024 }
  0x38   :  { %p5994_p10 = scmp.ne.s32.totalorder %s9074_s5, %s5993_s25  ;;  %p5997_p11 = scmp.lt.u32.totalorder %s5993_s25, %s9074_s5 }
  0x3a   :  { %p5999_p12 = pnand %p5997_p11, %p5994_p10 }
  0x3c   :  { %6002 = shalt.err (!%p5999_p12)
}
  0x3d   :  { %s6003_s2 = scalar_lea.vmem %s56_s22, 1024  ;;  %p6008_p0 = scmp.lt.s32.totalorder %s56_s22, %s56_s22 }
  0x3e   :  { %p6004_p13 = scmp.ne.s32.totalorder %s56_s22, %s6003_s2  ;;  %p6009_p1 = scmp.lt.s32.totalorder %s6003_s2, %s6003_s2 }
  0x40   :  { %p6010_p2 = por %p6009_p1, %p6008_p0 }
  0x42   :  { %p6011_p3 = pnand %p6010_p2, %p6004_p13 }
  0x44   :  { %6014 = shalt.err (!%p6011_p3)
}
  0x45   :  { %61 = dma.hbm_to_vmem [thread:$0]  %s9074_s5, 1024, %s56_s22, [#allocation6], %s6068_s27, %s6068_s27, %s6069_s28  }
  0x46   :  { %s6015_s19 = scalar_lea.hbm %s9078_s9, 1024 }
  0x47   :  { %p6016_p4 = scmp.ne.s32.totalorder %s9078_s9, %s6015_s19  ;;  %p6019_p5 = scmp.lt.u32.totalorder %s6015_s19, %s9078_s9 }
  0x49   :  { %p6021_p6 = pnand %p6019_p5, %p6016_p4 }
  0x4b   :  { %6024 = shalt.err (!%p6021_p6)
}
  0x4c   :  { %s6025_s24 = scalar_lea.vmem %s84_s3, 1024  ;;  %p6030_p8 = scmp.lt.s32.totalorder %s84_s3, %s84_s3 }
  0x4d   :  { %p6026_p7 = scmp.ne.s32.totalorder %s84_s3, %s6025_s24  ;;  %p6031_p9 = scmp.lt.s32.totalorder %s6025_s24, %s6025_s24 }
  0x4f   :  { %p6032_p10 = por %p6031_p9, %p6030_p8 }
  0x51   :  { %p6033_p11 = pnand %p6032_p10, %p6026_p7 }
  0x53   :  { %6036 = shalt.err (!%p6033_p11)
}
  0x54   :  { %89 = dma.hbm_to_vmem [thread:$0]  %s9078_s9, 1024, %s84_s3, [#allocation9], %s6068_s27, %s6068_s27, %s6069_s28  }
  0x55   :  { %6059 = dma.done.wait [#allocation3], 8192  }
  0x56   :  { %6060 = vsyncadd [#allocation3], 4294959104 }
  0x57   :  { %6061 = dma.done.wait [#allocation6], 2048  }
  0x58   :  { %6062 = vsyncadd [#allocation6], 4294965248 }
  0x59   :  { %6063 = dma.done.wait [#allocation9], 2048  }
  0x5a   :  { %6064 = vsyncadd [#allocation9], 4294965248  ;;  %v9196_v0 = vmov 0   ;;  %v364_v1 = vld [vmem:[#allocation2] sm:$0xff]  ;;  %v365_v2 = vld [vmem:[#allocation2 + $0x8] sm:$0xff] }
  0x5b   :  { %460 = vmatprep.subr.bf16.mxu0 %v9196_v0  ;;  %5573 = vset.pattern.permute.xlu0 %v9196_v0  ;;  %v366_v3 = vld [vmem:[#allocation2 + $0x10] sm:$0xff]  ;;  %v428_v4 = vpack.c.bf16 %v365_v2, %v364_v1  ;;  %v367_v5 = vld [vmem:[#allocation2 + $0x18] sm:$0xff]  ;;  %v368_v7 = vld [vmem:[#allocation2 + $0x20] sm:$0xff] }
  0x5c   :  { %5574 = vset.pattern.permute.xlu1 %v9196_v0  ;;  %v429_v6 = vpack.c.bf16 %v367_v5, %v366_v3  ;;  %v369_v8 = vld [vmem:[#allocation2 + $0x28] sm:$0xff]  ;;  %v370_v10 = vld [vmem:[#allocation2 + $0x30] sm:$0xff]  ;;  %v371_v11 = vld [vmem:[#allocation2 + $0x38] sm:$0xff] }
  0x5d   :  { %461 = vmatpush1.bf16.msra.mxu0 %v428_v4  ;;  %v430_v9 = vpack.c.bf16 %v369_v8, %v368_v7  ;;  %v6221_v12 = vld [vmem:[%s9069_s0 + $0x8] sm:$0xff]  ;;  %v431_v13 = vpack.c.bf16 %v371_v11, %v370_v10  ;;  %v372_v15 = vld [vmem:[#allocation2 + $0x40] sm:$0xff]  ;;  %v374_v18 = vld [vmem:[#allocation2 + $0x50] sm:$0xff] }
  0x5e   :  { %462 = vmatprep.subr.bf16.mxu0 %v9196_v0  ;;  %v9193_v14 = vunpack.c.l.s8.bf16 %v6221_v12  ;;  %v373_v16 = vld [vmem:[#allocation2 + $0x48] sm:$0xff]  ;;  %v375_v19 = vld [vmem:[#allocation2 + $0x58] sm:$0xff]  ;;  %v376_v20 = vld [vmem:[#allocation2 + $0x60] sm:$0xff]  ;;  %v9187_v55 = vunpack.c.h.s8.bf16 %v6221_v12 }
  0x5f   :  { %v432_v17 = vpack.c.bf16 %v373_v16, %v372_v15  ;;  %v377_v21 = vld [vmem:[#allocation2 + $0x68] sm:$0xff]  ;;  %v433_v22 = vpack.c.bf16 %v375_v19, %v374_v18  ;;  %v378_v23 = vld [vmem:[#allocation2 + $0x70] sm:$0xff]  ;;  %v379_v24 = vld [vmem:[#allocation2 + $0x78] sm:$0xff] }
  0x60   :  { %492 = vmatprep.mubr.bf16.mxu0 %v9193_v14  ;;  %v434_v25 = vpack.c.bf16 %v377_v21, %v376_v20  ;;  %v380_v26 = vld [vmem:[#allocation2 + $0x80] sm:$0xff]  ;;  %v435_v27 = vpack.c.bf16 %v379_v24, %v378_v23  ;;  %v381_v28 = vld [vmem:[#allocation2 + $0x88] sm:$0xff]  ;;  %v382_v29 = vld [vmem:[#allocation2 + $0x90] sm:$0xff] }
  0x61   :  { %463 = vmatpush1.bf16.msra.mxu0 %v429_v6  ;;  %v383_v30 = vld [vmem:[#allocation2 + $0x98] sm:$0xff]  ;;  %v436_v31 = vpack.c.bf16 %v381_v28, %v380_v26  ;;  %v384_v32 = vld [vmem:[#allocation2 + $0xa0] sm:$0xff]  ;;  %v385_v33 = vld [vmem:[#allocation2 + $0xa8] sm:$0xff] }
  0x62   :  { %464 = vmatprep.subr.bf16.mxu0 %v9196_v0  ;;  %v437_v34 = vpack.c.bf16 %v383_v30, %v382_v29  ;;  %v438_v35 = vpack.c.bf16 %v385_v33, %v384_v32  ;;  %v386_v36 = vld [vmem:[#allocation2 + $0xb0] sm:$0xff]  ;;  %v387_v37 = vld [vmem:[#allocation2 + $0xb8] sm:$0xff]  ;;  %v388_v39 = vld [vmem:[#allocation2 + $0xc0] sm:$0xff] }
  0x63   :  { %v439_v38 = vpack.c.bf16 %v387_v37, %v386_v36  ;;  %v389_v40 = vld [vmem:[#allocation2 + $0xc8] sm:$0xff]  ;;  %v390_v42 = vld [vmem:[#allocation2 + $0xd0] sm:$0xff]  ;;  %v391_v43 = vld [vmem:[#allocation2 + $0xd8] sm:$0xff] }
  0x64   :  { %v440_v41 = vpack.c.bf16 %v389_v40, %v388_v39  ;;  %v441_v44 = vpack.c.bf16 %v391_v43, %v390_v42  ;;  %v392_v45 = vld [vmem:[#allocation2 + $0xe0] sm:$0xff]  ;;  %v393_v46 = vld [vmem:[#allocation2 + $0xe8] sm:$0xff]  ;;  %v394_v48 = vld [vmem:[#allocation2 + $0xf0] sm:$0xff] }
  0x65   :  { %465 = vmatpush1.bf16.msra.mxu0 %v430_v9  ;;  %v442_v47 = vpack.c.bf16 %v393_v46, %v392_v45  ;;  %v395_v49 = vld [vmem:[#allocation2 + $0xf8] sm:$0xff]  ;;  %v6241_v51 = vld [vmem:[%s9069_s0] sm:$0xff]  ;;  %v397_v53 = vld [vmem:[#allocation2 + $0x108] sm:$0xff] }
  0x66   :  { %466 = vmatprep.subr.bf16.mxu0 %v9196_v0  ;;  %v443_v50 = vpack.c.bf16 %v395_v49, %v394_v48  ;;  %v396_v52 = vld [vmem:[#allocation2 + $0x100] sm:$0xff]  ;;  %v9190_v54 = vunpack.c.l.s8.bf16 %v6241_v51  ;;  %v398_v57 = vld [vmem:[#allocation2 + $0x110] sm:$0xff]  ;;  %v399_v58 = vld [vmem:[#allocation2 + $0x118] sm:$0xff]  ;;  %v9184_v63 = vunpack.c.h.s8.bf16 %v6241_v51 }
  0x67   :  { %v444_v56 = vpack.c.bf16 %v397_v53, %v396_v52  ;;  %v445_v59 = vpack.c.bf16 %v399_v58, %v398_v57  ;;  %v6254_v60 = vld [vmem:[%s9069_s0 + $0x28] sm:$0xff]  ;;  %v400_v61 = vld [vmem:[#allocation2 + $0x120] sm:$0xff]  ;;  %v402_v3 = vld [vmem:[#allocation2 + $0x130] sm:$0xff] }
  0x68   :  { %v401_v62 = vld [vmem:[#allocation2 + $0x128] sm:$0xff]  ;;  %v9181_v1 = vunpack.c.l.s8.bf16 %v6254_v60  ;;  %v403_v4 = vld [vmem:[#allocation2 + $0x138] sm:$0xff]  ;;  %v6267_v5 = vld [vmem:[%s9069_s0 + $0x20] sm:$0xff]  ;;  %v9175_v10 = vunpack.c.h.s8.bf16 %v6254_v60 }
  0x69   :  { %467 = vmatpush1.bf16.msra.mxu0 %v431_v13  ;;  %v446_v2 = vpack.c.bf16 %v401_v62, %v400_v61  ;;  %v447_v6 = vpack.c.bf16 %v403_v4, %v402_v3  ;;  %v404_v7 = vld [vmem:[#allocation2 + $0x140] sm:$0xff]  ;;  %v405_v8 = vld [vmem:[#allocation2 + $0x148] sm:$0xff]  ;;  %v9178_v9 = vunpack.c.l.s8.bf16 %v6267_v5  ;;  %v406_v13 = vld [vmem:[#allocation2 + $0x150] sm:$0xff]  ;;  %v9172_v20 = vunpack.c.h.s8.bf16 %v6267_v5 }
  0x6a   :  { %468 = vmatprep.subr.bf16.mxu0 %v9196_v0  ;;  %v448_v11 = vpack.c.bf16 %v405_v8, %v404_v7  ;;  %v407_v15 = vld [vmem:[#allocation2 + $0x158] sm:$0xff]  ;;  %v408_v18 = vld [vmem:[#allocation2 + $0x160] sm:$0xff]  ;;  %v409_v19 = vld [vmem:[#allocation2 + $0x168] sm:$0xff] }
  0x6b   :  { %v449_v16 = vpack.c.bf16 %v407_v15, %v406_v13  ;;  %v410_v23 = vld [vmem:[#allocation2 + $0x170] sm:$0xff]  ;;  %v411_v24 = vld [vmem:[#allocation2 + $0x178] sm:$0xff]  ;;  %v412_v29 = vld [vmem:[#allocation2 + $0x180] sm:$0xff] }
  0x6c   :  { %v451_v26 = vpack.c.bf16 %v411_v24, %v410_v23  ;;  %v413_v30 = vld [vmem:[#allocation2 + $0x188] sm:$0xff]  ;;  %v415_v39 = vld [vmem:[#allocation2 + $0x198] sm:$0xff] }
  0x6d   :  { %469 = vmatpush1.bf16.msra.mxu0 %v432_v17  ;;  %v6280_v17 = vld [vmem:[%s9069_s0 + $0x48] sm:$0xff]  ;;  %v419_v61 = vld [vmem:[#allocation2 + $0x1b8] sm:$0xff] }
  0x6e   :  { %470 = vmatprep.subr.bf16.mxu0 %v9196_v0  ;;  %v9169_v21 = vunpack.c.l.s8.bf16 %v6280_v17  ;;  %v9157_v28 = vunpack.c.h.s8.bf16 %v6280_v17  ;;  %v6306_v32 = vld [vmem:[%s9069_s0 + $0x68] sm:$0xff] }
  0x6f   :  { %v9147_v37 = vunpack.c.h.s8.bf16 %v6306_v32  ;;  %v417_v48 = vld [vmem:[#allocation2 + $0x1a8] sm:$0xff] }
  0x70   :  { %v421_v13 = vld [vmem:[#allocation2 + $0x1c8] sm:$0xff] }
  0x71   :  { %471 = vmatpush1.bf16.msra.mxu0 %v433_v22  ;;  %v450_v22 = vpack.c.bf16 %v409_v19, %v408_v18 }
  0x72   :  { %472 = vmatprep.subr.bf16.mxu0 %v9196_v0 }
  0x75   :  { %473 = vmatpush1.bf16.msra.mxu0 %v434_v25  ;;  %v6293_v25 = vld [vmem:[%s9069_s0 + $0x40] sm:$0xff] }
  0x76   :  { %474 = vmatprep.subr.bf16.mxu0 %v9196_v0  ;;  %v9154_v33 = vunpack.c.h.s8.bf16 %v6293_v25 }
  0x79   :  { %475 = vmatpush1.bf16.msra.mxu0 %v435_v27  ;;  %v9166_v27 = vunpack.c.l.s8.bf16 %v6293_v25 }
  0x7a   :  { %476 = vmatprep.subr.bf16.mxu0 %v9196_v0 }
  0x7d   :  { %477 = vmatpush1.bf16.msra.mxu0 %v436_v31  ;;  %v452_v31 = vpack.c.bf16 %v413_v30, %v412_v29  ;;  %v423_v29 = vld [vmem:[#allocation2 + $0x1d8] sm:$0xff]  ;;  %v300_v30 = vld [vmem:[%s9070_s1] sm:$0xff] }
  0x7e   :  { %478 = vmatprep.subr.bf16.mxu0 %v9196_v0  ;;  %1040 = vperm.xlu0 %5573, %v300_v30   ;;  %v305_v30 = vld [vmem:[%s9070_s1 + $0x28] sm:$0xff] }
  0x81   :  { %479 = vmatpush1.bf16.msra.mxu0 %v437_v34  ;;  %v9151_v34 = vunpack.c.l.s8.bf16 %v6306_v32 }
  0x82   :  { %480 = vmatprep.subr.bf16.mxu0 %v9196_v0 }
  0x85   :  { %481 = vmatpush1.bf16.msra.mxu0 %v438_v35  ;;  %v6318_v35 = vld [vmem:[%s9069_s0 + $0x60] sm:$0xff] }
  0x86   :  { %482 = vmatprep.subr.bf16.mxu0 %v9196_v0  ;;  %v9150_v36 = vunpack.c.l.s8.bf16 %v6318_v35  ;;  %v9146_v42 = vunpack.c.h.s8.bf16 %v6318_v35 }
  0x89   :  { %483 = vmatpush1.bf16.msra.mxu0 %v439_v38  ;;  %v414_v38 = vld [vmem:[#allocation2 + $0x190] sm:$0xff] }
  0x8a   :  { %484 = vmatprep.subr.bf16.mxu0 %v9196_v0  ;;  %v453_v40 = vpack.c.bf16 %v415_v39, %v414_v38  ;;  %v302_v38 = vld [vmem:[%s9070_s1 + $0x10] sm:$0xff]  ;;  %v6427_v39 = vld [vmem:[%s9069_s0 + $0x108] sm:$0xff] }
  0x8b   :  { %1050 = vperm.xlu1 %5574, %v302_v38   ;;  %v9086_v38 = vunpack.c.h.s8.bf16 %v6427_v39 }
  0x8d   :  { %485 = vmatpush1.bf16.msra.mxu0 %v440_v41  ;;  %v6329_v41 = vld [vmem:[%s9069_s0 + $0x88] sm:$0xff] }
  0x8e   :  { %486 = vmatprep.subr.bf16.mxu0 %v9196_v0  ;;  %v9143_v43 = vunpack.c.l.s8.bf16 %v6329_v41  ;;  %v9139_v46 = vunpack.c.h.s8.bf16 %v6329_v41 }
  0x91   :  { %487 = vmatpush1.bf16.msra.mxu0 %v441_v44  ;;  %v6341_v44 = vld [vmem:[%s9069_s0 + $0x80] sm:$0xff] }
  0x92   :  { %488 = vmatprep.subr.bf16.mxu0 %v9196_v0  ;;  %v9142_v45 = vunpack.c.l.s8.bf16 %v6341_v44  ;;  %v9136_v52 = vunpack.c.h.s8.bf16 %v6341_v44 }
  0x95   :  { %489 = vmatpush1.bf16.msra.mxu0 %v442_v47  ;;  %v416_v47 = vld [vmem:[#allocation2 + $0x1a0] sm:$0xff] }
  0x96   :  { %490 = vmatprep.subr.bf16.mxu0 %v9196_v0  ;;  %v454_v49 = vpack.c.bf16 %v417_v48, %v416_v47  ;;  %v9092_v47 = vunpack.c.l.s8.bf16 %v6427_v39  ;;  %v424_v48 = vld [vmem:[#allocation2 + $0x1e0] sm:$0xff] }
  0x99   :  { %491 = vmatpush1.bf16.msra.mxu0 %v443_v50  ;;  %v6352_v50 = vld [vmem:[%s9069_s0 + $0xa8] sm:$0xff] }
  0x9a   :  { %749 = vmatprep.subr.bf16.mxu0 %v9196_v0  ;;  %v9133_v53 = vunpack.c.l.s8.bf16 %v6352_v50  ;;  %v9127_v58 = vunpack.c.h.s8.bf16 %v6352_v50 }
  0x9c   :  { %493 = vmatmul.mubr.bf16.vlgmr.msra.gmra.mrb[0].mxu0 %v9190_v54 }
  0x9d   :  { %500 = vmatprep.mubr.bf16.mxu0 %v9187_v55  ;;  %750 = vmatpush1.bf16.msra.mxu0 %v444_v56  ;;  %v6364_v56 = vld [vmem:[%s9069_s0 + $0xa0] sm:$0xff] }
  0x9e   :  { %751 = vmatprep.subr.bf16.mxu0 %v9196_v0  ;;  %v9130_v57 = vunpack.c.l.s8.bf16 %v6364_v56  ;;  %v9124_v3 = vunpack.c.h.s8.bf16 %v6364_v56 }
  0xa1   :  { %752 = vmatpush1.bf16.msra.mxu0 %v445_v59  ;;  %v418_v59 = vld [vmem:[#allocation2 + $0x1b0] sm:$0xff] }
  0xa2   :  { %753 = vmatprep.subr.bf16.mxu0 %v9196_v0  ;;  %v455_v62 = vpack.c.bf16 %v419_v61, %v418_v59  ;;  %v301_v61 = vld [vmem:[%s9070_s1 + $0x8] sm:$0xff] }
  0xa3   :  { %1045 = vperm.xlu0 %5573, %v301_v61   ;;  %v308_v61 = vld [vmem:[%s9070_s1 + $0x40] sm:$0xff] }
  0xa4   :  { %501 = vmatmul.mubr.bf16.gmra.mrb[4].mxu0 %v9184_v63 }
  0xa5   :  { %508 = vmatprep.mubr.bf16.mxu0 %v9181_v1  ;;  %754 = vmatpush1.bf16.msra.mxu0 %v446_v2  ;;  %v6375_v2 = vld [vmem:[%s9069_s0 + $0xc8] sm:$0xff] }
  0xa6   :  { %755 = vmatprep.subr.bf16.mxu0 %v9196_v0  ;;  %v9116_v4 = vunpack.c.l.s8.bf16 %v6375_v2  ;;  %v9110_v8 = vunpack.c.h.s8.bf16 %v6375_v2 }
  0xa9   :  { %756 = vmatpush1.bf16.msra.mxu0 %v447_v6  ;;  %v6387_v6 = vld [vmem:[%s9069_s0 + $0xc0] sm:$0xff] }
  0xaa   :  { %757 = vmatprep.subr.bf16.mxu0 %v9196_v0  ;;  %v9113_v7 = vunpack.c.l.s8.bf16 %v6387_v6  ;;  %v9107_v18 = vunpack.c.h.s8.bf16 %v6387_v6 }
  0xac   :  { %509 = vmatmul.mubr.bf16.gmra.mrb[8].mxu0 %v9178_v9 }
  0xad   :  { %516 = vmatprep.mubr.bf16.mxu0 %v9175_v10  ;;  %758 = vmatpush1.bf16.msra.mxu0 %v448_v11  ;;  %v420_v11 = vld [vmem:[#allocation2 + $0x1c0] sm:$0xff] }
  0xae   :  { %759 = vmatprep.subr.bf16.mxu0 %v9196_v0  ;;  %v456_v15 = vpack.c.bf16 %v421_v13, %v420_v11  ;;  %v426_v11 = vld [vmem:[#allocation2 + $0x1f0] sm:$0xff]  ;;  %v6445_v13 = vld [vmem:[%s9069_s0 + $0x100] sm:$0xff] }
  0xb1   :  { %760 = vmatpush1.bf16.msra.mxu0 %v449_v16  ;;  %v6398_v16 = vld [vmem:[%s9069_s0 + $0xe8] sm:$0xff] }
  0xb2   :  { %761 = vmatprep.subr.bf16.mxu0 %v9196_v0  ;;  %v9104_v19 = vunpack.c.l.s8.bf16 %v6398_v16  ;;  %v9098_v24 = vunpack.c.h.s8.bf16 %v6398_v16 }
  0xb4   :  { %517 = vmatmul.mubr.bf16.gmra.mrb[12].mxu0 %v9172_v20 }
  0xb5   :  { %524 = vmatprep.mubr.bf16.mxu0 %v9169_v21  ;;  %762 = vmatpush1.bf16.msra.mxu0 %v450_v22  ;;  %v6410_v22 = vld [vmem:[%s9069_s0 + $0xe0] sm:$0xff] }
  0xb6   :  { %763 = vmatprep.subr.bf16.mxu0 %v9196_v0  ;;  %v9101_v23 = vunpack.c.l.s8.bf16 %v6410_v22 }
  0xb9   :  { %764 = vmatpush1.bf16.msra.mxu0 %v451_v26  ;;  %v422_v26 = vld [vmem:[#allocation2 + $0x1d0] sm:$0xff] }
  0xba   :  { %765 = vmatprep.subr.bf16.mxu0 %v9196_v0 }
  0xbc   :  { %525 = vmatmul.mubr.bf16.gmra.mrb[16].mxu0 %v9166_v27 }
  0xbd   :  { %532 = vmatprep.mubr.bf16.mxu0 %v9157_v28  ;;  %766 = vmatpush1.bf16.msra.mxu0 %v452_v31  ;;  %v457_v31 = vpack.c.bf16 %v423_v29, %v422_v26  ;;  %v304_v29 = vld [vmem:[%s9070_s1 + $0x20] sm:$0xff]  ;;  %v5582_v28 = vld [vmem:[#allocation5 + $0x38] sm:$0xff]  }
  0xbe   :  { %767 = vmatprep.subr.bf16.mxu0 %v9196_v0  ;;  %1060 = vperm.xlu0 %5573, %v304_v29   ;;  %v311_v29 = vld [vmem:[%s9070_s1 + $0x58] sm:$0xff] }
  0xc1   :  { %768 = vmatpush1.bf16.msra.mxu0 %v453_v40  ;;  %v9095_v40 = vunpack.c.h.s8.bf16 %v6410_v22 }
  0xc2   :  { %769 = vmatprep.subr.bf16.mxu0 %v9196_v0 }
  0xc4   :  { %533 = vmatmul.mubr.bf16.gmra.mrb[20].mxu0 %v9154_v33  ;;  %v5580_v33 = vld [vmem:[#allocation5 + $0x28] sm:$0xff]  }
  0xc5   :  { %540 = vmatprep.mubr.bf16.mxu0 %v9151_v34  ;;  %770 = vmatpush1.bf16.msra.mxu0 %v454_v49  ;;  %v425_v49 = vld [vmem:[#allocation2 + $0x1e8] sm:$0xff]  ;;  %v5578_v34 = vld [vmem:[#allocation5 + $0x18] sm:$0xff]  }
  0xc6   :  { %771 = vmatprep.subr.bf16.mxu0 %v9196_v0  ;;  %v458_v59 = vpack.c.bf16 %v425_v49, %v424_v48  ;;  %v306_v48 = vld [vmem:[%s9070_s1 + $0x30] sm:$0xff]  ;;  %v307_v49 = vld [vmem:[%s9070_s1 + $0x38] sm:$0xff] }
  0xc7   :  { %1070 = vperm.xlu0 %5573, %v306_v48   ;;  %v312_v48 = vld [vmem:[%s9070_s1 + $0x60] sm:$0xff] }
  0xc9   :  { %772 = vmatpush1.bf16.msra.mxu0 %v455_v62  ;;  %v303_v62 = vld [vmem:[%s9070_s1 + $0x18] sm:$0xff] }
  0xca   :  { %773 = vmatprep.subr.bf16.mxu0 %v9196_v0  ;;  %1055 = vperm.xlu1 %5574, %v303_v62   ;;  %v309_v62 = vld [vmem:[%s9070_s1 + $0x48] sm:$0xff] }
  0xcb   :  { %1080 = vperm.xlu0 %5573, %v308_v61  }
  0xcc   :  { %541 = vmatmul.mubr.bf16.gmra.mrb[24].mxu0 %v9150_v36 }
  0xcd   :  { %548 = vmatprep.mubr.bf16.mxu0 %v9147_v37  ;;  %774 = vmatpush1.bf16.msra.mxu0 %v456_v15  ;;  %v427_v15 = vld [vmem:[#allocation2 + $0x1f8] sm:$0xff]  ;;  %v5576_v37 = vld [vmem:[#allocation5 + $0x8] sm:$0xff]  }
  0xce   :  { %775 = vmatprep.subr.bf16.mxu0 %v9196_v0  ;;  %v459_v26 = vpack.c.bf16 %v427_v15, %v426_v11  ;;  %1065 = vperm.xlu1 %5574, %v305_v30   ;;  %v9083_v11 = vunpack.c.h.s8.bf16 %v6445_v13  ;;  %v6492_v30 = vld [vmem:[%s9069_s0 + $0x120] sm:$0xff] }
  0xcf   :  { %v9082_v61 = vunpack.c.l.s8.bf16 %v6492_v30 }
  0xd1   :  { %776 = vmatpush1.bf16.msra.mxu0 %v457_v31  ;;  %v9089_v31 = vunpack.c.l.s8.bf16 %v6445_v13 }
  0xd2   :  { %777 = vmatprep.subr.bf16.mxu0 %v9196_v0  ;;  %1075 = vperm.xlu1 %5574, %v307_v49   ;;  %v313_v49 = vld [vmem:[%s9070_s1 + $0x68] sm:$0xff] }
  0xd4   :  { %549 = vmatmul.mubr.bf16.gmra.mrb[28].mxu0 %v9146_v42 }
  0xd5   :  { %556 = vmatprep.mubr.bf16.mxu0 %v9143_v43  ;;  %778 = vmatpush1.bf16.msra.mxu0 %v458_v59  ;;  %v6469_v59 = vld [vmem:[%s9069_s0 + $0x128] sm:$0xff]  ;;  %v5575_v43 = vld [vmem:[#allocation5] sm:$0xff]  }
  0xd6   :  { %779 = vmatprep.subr.bf16.mxu0 %v9196_v0  ;;  %v9081_v15 = vunpack.c.l.s8.bf16 %v6469_v59  ;;  %1085 = vperm.xlu1 %5574, %v309_v62   ;;  %v9084_v62 = vunpack.c.h.s8.bf16 %v6469_v59 }
  0xd7   :  { %4970 = vmatprep.subr.bf16.mxu1 %v5575_v43 }
  0xd8   :  { %4971 = vmatpush3.bf16.msra.mxu1 %v5575_v43 }
  0xd9   :  { %780 = vmatpush1.bf16.msra.mxu0 %v459_v26  ;;  %v310_v26 = vld [vmem:[%s9070_s1 + $0x50] sm:$0xff]  ;;  %4972 = vmatprep.subr.bf16.mxu1 %v5576_v37 }
  0xda   :  { %1090 = vperm.xlu0 %5573, %v310_v26   ;;  %1095 = vperm.xlu1 %5574, %v311_v29   ;;  %v314_v26 = vld [vmem:[%s9070_s1 + $0x70] sm:$0xff]  ;;  %v315_v29 = vld [vmem:[%s9070_s1 + $0x78] sm:$0xff] }
  0xdc   :  { %557 = vmatmul.mubr.bf16.gmra.mrb[32].mxu0 %v9142_v45  ;;  %4973 = vmatpush3.bf16.msra.mxu1 %v5576_v37  ;;  %v5579_v37 = vld [vmem:[#allocation5 + $0x20] sm:$0xff]  }
  0xdd   :  { %564 = vmatprep.mubr.bf16.mxu0 %v9139_v46 }
  0xde   :  { %1100 = vperm.xlu0 %5573, %v312_v48   ;;  %1105 = vperm.xlu1 %5574, %v313_v49   ;;  %v316_v48 = vld [vmem:[%s9070_s1 + $0x80] sm:$0xff]  ;;  %v317_v49 = vld [vmem:[%s9070_s1 + $0x88] sm:$0xff] }
  0xe2   :  { %1110 = vperm.xlu0 %5573, %v314_v26   ;;  %1115 = vperm.xlu1 %5574, %v315_v29   ;;  %v318_v26 = vld [vmem:[%s9070_s1 + $0x90] sm:$0xff]  ;;  %v319_v29 = vld [vmem:[%s9070_s1 + $0x98] sm:$0xff] }
  0xe4   :  { %565 = vmatmul.mubr.bf16.gmra.mrb[36].mxu0 %v9136_v52 }
  0xe5   :  { %572 = vmatprep.mubr.bf16.mxu0 %v9133_v53 }
  0xe6   :  { %1120 = vperm.xlu0 %5573, %v316_v48   ;;  %1125 = vperm.xlu1 %5574, %v317_v49   ;;  %v320_v48 = vld [vmem:[%s9070_s1 + $0xa0] sm:$0xff]  ;;  %v321_v49 = vld [vmem:[%s9070_s1 + $0xa8] sm:$0xff] }
  0xea   :  { %1130 = vperm.xlu0 %5573, %v318_v26   ;;  %1135 = vperm.xlu1 %5574, %v319_v29   ;;  %v322_v26 = vld [vmem:[%s9070_s1 + $0xb0] sm:$0xff]  ;;  %v323_v29 = vld [vmem:[%s9070_s1 + $0xb8] sm:$0xff] }
  0xec   :  { %573 = vmatmul.mubr.bf16.gmra.mrb[40].mxu0 %v9130_v57 }
  0xed   :  { %580 = vmatprep.mubr.bf16.mxu0 %v9127_v58 }
  0xee   :  { %1140 = vperm.xlu0 %5573, %v320_v48   ;;  %1145 = vperm.xlu1 %5574, %v321_v49   ;;  %v324_v48 = vld [vmem:[%s9070_s1 + $0xc0] sm:$0xff]  ;;  %v325_v49 = vld [vmem:[%s9070_s1 + $0xc8] sm:$0xff] }
  0xf2   :  { %1150 = vperm.xlu0 %5573, %v322_v26   ;;  %1155 = vperm.xlu1 %5574, %v323_v29   ;;  %v326_v26 = vld [vmem:[%s9070_s1 + $0xd0] sm:$0xff]  ;;  %v327_v29 = vld [vmem:[%s9070_s1 + $0xd8] sm:$0xff] }
  0xf4   :  { %581 = vmatmul.mubr.bf16.gmra.mrb[44].mxu0 %v9124_v3 }
  0xf5   :  { %588 = vmatprep.mubr.bf16.mxu0 %v9116_v4 }
  0xf6   :  { %1160 = vperm.xlu0 %5573, %v324_v48   ;;  %1165 = vperm.xlu1 %5574, %v325_v49   ;;  %v328_v48 = vld [vmem:[%s9070_s1 + $0xe0] sm:$0xff]  ;;  %v329_v49 = vld [vmem:[%s9070_s1 + $0xe8] sm:$0xff] }
  0xfa   :  { %1170 = vperm.xlu0 %5573, %v326_v26   ;;  %1175 = vperm.xlu1 %5574, %v327_v29   ;;  %v330_v26 = vld [vmem:[%s9070_s1 + $0xf0] sm:$0xff]  ;;  %v331_v29 = vld [vmem:[%s9070_s1 + $0xf8] sm:$0xff] }
  0xfc   :  { %589 = vmatmul.mubr.bf16.gmra.mrb[48].mxu0 %v9113_v7 }
  0xfd   :  { %596 = vmatprep.mubr.bf16.mxu0 %v9110_v8 }
  0xfe   :  { %1180 = vperm.xlu0 %5573, %v328_v48   ;;  %1185 = vperm.xlu1 %5574, %v329_v49   ;;  %v332_v48 = vld [vmem:[%s9070_s1 + $0x100] sm:$0xff]  ;;  %v333_v49 = vld [vmem:[%s9070_s1 + $0x108] sm:$0xff] }
 0x102   :  { %1190 = vperm.xlu0 %5573, %v330_v26   ;;  %1195 = vperm.xlu1 %5574, %v331_v29   ;;  %v334_v26 = vld [vmem:[%s9070_s1 + $0x110] sm:$0xff]  ;;  %v335_v29 = vld [vmem:[%s9070_s1 + $0x118] sm:$0xff] }
 0x104   :  { %597 = vmatmul.mubr.bf16.gmra.mrb[52].mxu0 %v9107_v18 }
 0x105   :  { %604 = vmatprep.mubr.bf16.mxu0 %v9104_v19 }
 0x106   :  { %1200 = vperm.xlu0 %5573, %v332_v48   ;;  %1205 = vperm.xlu1 %5574, %v333_v49   ;;  %v336_v48 = vld [vmem:[%s9070_s1 + $0x120] sm:$0xff]  ;;  %v337_v49 = vld [vmem:[%s9070_s1 + $0x128] sm:$0xff] }
 0x10a   :  { %1210 = vperm.xlu0 %5573, %v334_v26   ;;  %1215 = vperm.xlu1 %5574, %v335_v29   ;;  %v338_v26 = vld [vmem:[%s9070_s1 + $0x130] sm:$0xff]  ;;  %v339_v29 = vld [vmem:[%s9070_s1 + $0x138] sm:$0xff] }
 0x10c   :  { %605 = vmatmul.mubr.bf16.gmra.mrb[56].mxu0 %v9101_v23 }
 0x10d   :  { %612 = vmatprep.mubr.bf16.mxu0 %v9098_v24 }
 0x10e   :  { %1220 = vperm.xlu0 %5573, %v336_v48   ;;  %1225 = vperm.xlu1 %5574, %v337_v49   ;;  %v340_v48 = vld [vmem:[%s9070_s1 + $0x140] sm:$0xff]  ;;  %v341_v49 = vld [vmem:[%s9070_s1 + $0x148] sm:$0xff] }
 0x112   :  { %1230 = vperm.xlu0 %5573, %v338_v26   ;;  %1235 = vperm.xlu1 %5574, %v339_v29   ;;  %v342_v26 = vld [vmem:[%s9070_s1 + $0x150] sm:$0xff]  ;;  %v343_v29 = vld [vmem:[%s9070_s1 + $0x158] sm:$0xff] }
 0x114   :  { %613 = vmatmul.mubr.bf16.gmra.mrb[60].mxu0 %v9095_v40 }
 0x115   :  { %620 = vmatprep.mubr.bf16.mxu0 %v9092_v47 }
 0x116   :  { %1240 = vperm.xlu0 %5573, %v340_v48   ;;  %1245 = vperm.xlu1 %5574, %v341_v49   ;;  %v344_v48 = vld [vmem:[%s9070_s1 + $0x160] sm:$0xff]  ;;  %v345_v49 = vld [vmem:[%s9070_s1 + $0x168] sm:$0xff] }
 0x11a   :  { %1250 = vperm.xlu0 %5573, %v342_v26   ;;  %1255 = vperm.xlu1 %5574, %v343_v29   ;;  %v346_v26 = vld [vmem:[%s9070_s1 + $0x170] sm:$0xff]  ;;  %v347_v29 = vld [vmem:[%s9070_s1 + $0x178] sm:$0xff] }
 0x11c   :  { %621 = vmatmul.mubr.bf16.gmra.mrb[64].mxu0 %v9089_v31 }
 0x11d   :  { %628 = vmatprep.mubr.bf16.mxu0 %v9086_v38 }
 0x11e   :  { %1260 = vperm.xlu0 %5573, %v344_v48   ;;  %1265 = vperm.xlu1 %5574, %v345_v49   ;;  %v348_v48 = vld [vmem:[%s9070_s1 + $0x180] sm:$0xff]  ;;  %v349_v49 = vld [vmem:[%s9070_s1 + $0x188] sm:$0xff] }
 0x122   :  { %1270 = vperm.xlu0 %5573, %v346_v26   ;;  %1275 = vperm.xlu1 %5574, %v347_v29   ;;  %v350_v26 = vld [vmem:[%s9070_s1 + $0x190] sm:$0xff]  ;;  %v351_v29 = vld [vmem:[%s9070_s1 + $0x198] sm:$0xff] }
 0x124   :  { %629 = vmatmul.mubr.bf16.gmra.mrb[68].mxu0 %v9083_v11 }
 0x125   :  { %636 = vmatprep.mubr.bf16.mxu0 %v9081_v15  ;;  %v6515_v15 = vld [vmem:[%s9069_s0 + $0x148] sm:$0xff] }
 0x126   :  { %v9087_v11 = vunpack.c.l.s8.bf16 %v6515_v15  ;;  %v9090_v38 = vunpack.c.h.s8.bf16 %v6515_v15  ;;  %1280 = vperm.xlu0 %5573, %v348_v48   ;;  %1285 = vperm.xlu1 %5574, %v349_v49   ;;  %v352_v48 = vld [vmem:[%s9070_s1 + $0x1a0] sm:$0xff]  ;;  %v353_v49 = vld [vmem:[%s9070_s1 + $0x1a8] sm:$0xff] }
 0x12a   :  { %1290 = vperm.xlu0 %5573, %v350_v26   ;;  %1295 = vperm.xlu1 %5574, %v351_v29   ;;  %v354_v26 = vld [vmem:[%s9070_s1 + $0x1b0] sm:$0xff]  ;;  %v355_v29 = vld [vmem:[%s9070_s1 + $0x1b8] sm:$0xff] }
 0x12c   :  { %637 = vmatmul.mubr.bf16.gmra.mrb[72].mxu0 %v9082_v61  ;;  %v9085_v61 = vunpack.c.h.s8.bf16 %v6492_v30 }
 0x12d   :  { %644 = vmatprep.mubr.bf16.mxu0 %v9084_v62  ;;  %v6538_v62 = vld [vmem:[%s9069_s0 + $0x140] sm:$0xff] }
 0x12e   :  { %1300 = vperm.xlu0 %5573, %v352_v48   ;;  %1305 = vperm.xlu1 %5574, %v353_v49   ;;  %v356_v48 = vld [vmem:[%s9070_s1 + $0x1c0] sm:$0xff]  ;;  %v357_v49 = vld [vmem:[%s9070_s1 + $0x1c8] sm:$0xff] }
 0x132   :  { %1310 = vperm.xlu0 %5573, %v354_v26   ;;  %1315 = vperm.xlu1 %5574, %v355_v29   ;;  %v358_v26 = vld [vmem:[%s9070_s1 + $0x1d0] sm:$0xff]  ;;  %v359_v29 = vld [vmem:[%s9070_s1 + $0x1d8] sm:$0xff] }
 0x134   :  { %645 = vmatmul.mubr.bf16.gmra.mrb[76].mxu0 %v9085_v61  ;;  %v9088_v61 = vunpack.c.l.s8.bf16 %v6538_v62 }
 0x135   :  { %652 = vmatprep.mubr.bf16.mxu0 %v9087_v11  ;;  %v6561_v11 = vld [vmem:[%s9069_s0 + $0x168] sm:$0xff] }
 0x136   :  { %v9093_v31 = vunpack.c.l.s8.bf16 %v6561_v11  ;;  %v9096_v47 = vunpack.c.h.s8.bf16 %v6561_v11  ;;  %1320 = vperm.xlu0 %5573, %v356_v48   ;;  %1325 = vperm.xlu1 %5574, %v357_v49   ;;  %v360_v48 = vld [vmem:[%s9070_s1 + $0x1e0] sm:$0xff]  ;;  %v361_v49 = vld [vmem:[%s9070_s1 + $0x1e8] sm:$0xff] }
 0x13a   :  { %1330 = vperm.xlu0 %5573, %v358_v26   ;;  %1335 = vperm.xlu1 %5574, %v359_v29   ;;  %v362_v26 = vld [vmem:[%s9070_s1 + $0x1f0] sm:$0xff]  ;;  %v363_v29 = vld [vmem:[%s9070_s1 + $0x1f8] sm:$0xff] }
 0x13c   :  { %653 = vmatmul.mubr.bf16.gmra.mrb[80].mxu0 %v9088_v61  ;;  %v9091_v61 = vunpack.c.h.s8.bf16 %v6538_v62 }
 0x13d   :  { %660 = vmatprep.mubr.bf16.mxu0 %v9090_v38  ;;  %v6584_v38 = vld [vmem:[%s9069_s0 + $0x160] sm:$0xff] }
 0x13e   :  { %1340 = vperm.xlu0 %5573, %v360_v48   ;;  %1345 = vperm.xlu1 %5574, %v361_v49  }
 0x142   :  { %1350 = vperm.xlu0 %5573, %v362_v26   ;;  %1355 = vperm.xlu1 %5574, %v363_v29   ;;  %v6813_v29 = vld [vmem:[%s9069_s0 + $0x38] sm:$0xff] }
 0x143   :  { %v9129_v3 = vunpack.c.h.s8.bf16 %v6813_v29 }
 0x144   :  { %661 = vmatmul.mubr.bf16.gmra.mrb[84].mxu0 %v9091_v61  ;;  %v9094_v61 = vunpack.c.l.s8.bf16 %v6584_v38 }
 0x145   :  { %668 = vmatprep.mubr.bf16.mxu0 %v9093_v31  ;;  %v6607_v31 = vld [vmem:[%s9069_s0 + $0x188] sm:$0xff] }
 0x146   :  { %v9099_v40 = vunpack.c.l.s8.bf16 %v6607_v31  ;;  %v9102_v24 = vunpack.c.h.s8.bf16 %v6607_v31 }
 0x14c   :  { %669 = vmatmul.mubr.bf16.gmra.mrb[88].mxu0 %v9094_v61  ;;  %v9097_v61 = vunpack.c.h.s8.bf16 %v6584_v38 }
 0x14d   :  { %676 = vmatprep.mubr.bf16.mxu0 %v9096_v47  ;;  %v6630_v47 = vld [vmem:[%s9069_s0 + $0x180] sm:$0xff] }
 0x154   :  { %677 = vmatmul.mubr.bf16.gmra.mrb[92].mxu0 %v9097_v61  ;;  %v9100_v61 = vunpack.c.l.s8.bf16 %v6630_v47 }
 0x155   :  { %684 = vmatprep.mubr.bf16.mxu0 %v9099_v40  ;;  %v6653_v40 = vld [vmem:[%s9069_s0 + $0x1a8] sm:$0xff] }
 0x156   :  { %v9105_v23 = vunpack.c.l.s8.bf16 %v6653_v40  ;;  %v9108_v19 = vunpack.c.h.s8.bf16 %v6653_v40 }
 0x15c   :  { %685 = vmatmul.mubr.bf16.gmra.mrb[96].mxu0 %v9100_v61  ;;  %v9103_v61 = vunpack.c.h.s8.bf16 %v6630_v47 }
 0x15d   :  { %692 = vmatprep.mubr.bf16.mxu0 %v9102_v24  ;;  %v6676_v24 = vld [vmem:[%s9069_s0 + $0x1a0] sm:$0xff] }
 0x164   :  { %693 = vmatmul.mubr.bf16.gmra.mrb[100].mxu0 %v9103_v61  ;;  %v9106_v61 = vunpack.c.l.s8.bf16 %v6676_v24 }
 0x165   :  { %700 = vmatprep.mubr.bf16.mxu0 %v9105_v23  ;;  %v6699_v23 = vld [vmem:[%s9069_s0 + $0x1c8] sm:$0xff] }
 0x166   :  { %v9111_v18 = vunpack.c.l.s8.bf16 %v6699_v23  ;;  %v9114_v8 = vunpack.c.h.s8.bf16 %v6699_v23 }
 0x16c   :  { %701 = vmatmul.mubr.bf16.gmra.mrb[104].mxu0 %v9106_v61  ;;  %v9109_v61 = vunpack.c.h.s8.bf16 %v6676_v24 }
 0x16d   :  { %708 = vmatprep.mubr.bf16.mxu0 %v9108_v19  ;;  %v6722_v19 = vld [vmem:[%s9069_s0 + $0x1c0] sm:$0xff] }
 0x174   :  { %709 = vmatmul.mubr.bf16.gmra.mrb[108].mxu0 %v9109_v61  ;;  %v9112_v61 = vunpack.c.l.s8.bf16 %v6722_v19 }
 0x175   :  { %716 = vmatprep.mubr.bf16.mxu0 %v9111_v18  ;;  %v6745_v18 = vld [vmem:[%s9069_s0 + $0x1e8] sm:$0xff] }
 0x176   :  { %v9117_v7 = vunpack.c.l.s8.bf16 %v6745_v18  ;;  %v9118_v4 = vunpack.c.h.s8.bf16 %v6745_v18 }
 0x17c   :  { %717 = vmatmul.mubr.bf16.gmra.mrb[112].mxu0 %v9112_v61  ;;  %v9115_v61 = vunpack.c.h.s8.bf16 %v6722_v19 }
 0x17d   :  { %724 = vmatprep.mubr.bf16.mxu0 %v9114_v8  ;;  %v6768_v8 = vld [vmem:[%s9069_s0 + $0x1e0] sm:$0xff] }
 0x17e   :  { %v9121_v48 = vunpack.c.h.s8.bf16 %v6768_v8 }
 0x184   :  { %725 = vmatmul.mubr.bf16.gmra.mrb[116].mxu0 %v9115_v61  ;;  %v9119_v61 = vunpack.c.l.s8.bf16 %v6768_v8 }
 0x185   :  { %732 = vmatprep.mubr.bf16.mxu0 %v9117_v7  ;;  %v6791_v7 = vld [vmem:[%s9069_s0 + $0x18] sm:$0xff] }
 0x186   :  { %v9120_v49 = vunpack.c.l.s8.bf16 %v6791_v7  ;;  %v9123_v26 = vunpack.c.h.s8.bf16 %v6791_v7 }
 0x18c   :  { %733 = vmatmul.mubr.bf16.gmra.mrb[120].mxu0 %v9119_v61 }
 0x18d   :  { %740 = vmatprep.mubr.bf16.mxu0 %v9118_v4  ;;  %v6802_v4 = vld [vmem:[%s9069_s0 + $0x10] sm:$0xff] }
 0x18e   :  { %v9122_v61 = vunpack.c.l.s8.bf16 %v6802_v4 }
 0x194   :  { %741 = vmatmul.mubr.bf16.gmra.mrb[124].mxu0 %v9121_v48  ;;  %v9126_v48 = vunpack.c.l.s8.bf16 %v6813_v29 }
 0x195   :  { %781 = vmatprep.mubr.bf16.mxu0 %v9120_v49  ;;  %v9125_v49 = vunpack.c.h.s8.bf16 %v6802_v4 }
 0x19c   :  { %782 = vmatmul.mubr.bf16.vlgmr.msra.gmra.mrb[0].mxu0 %v9122_v61  ;;  %v6824_v61 = vld [vmem:[%s9069_s0 + $0x30] sm:$0xff] }
 0x19d   :  { %789 = vmatprep.mubr.bf16.mxu0 %v9123_v26  ;;  %v9128_v26 = vunpack.c.l.s8.bf16 %v6824_v61 }
 0x1a4   :  { %790 = vmatmul.mubr.bf16.gmra.mrb[4].mxu0 %v9125_v49  ;;  %v6835_v49 = vld [vmem:[%s9069_s0 + $0x58] sm:$0xff] }
 0x1a5   :  { %797 = vmatprep.mubr.bf16.mxu0 %v9126_v48  ;;  %v9131_v48 = vunpack.c.h.s8.bf16 %v6824_v61  ;;  %v9132_v58 = vunpack.c.l.s8.bf16 %v6835_v49  ;;  %v9135_v57 = vunpack.c.h.s8.bf16 %v6835_v49 }
 0x1ac   :  { %798 = vmatmul.mubr.bf16.gmra.mrb[8].mxu0 %v9128_v26  ;;  %v6846_v26 = vld [vmem:[%s9069_s0 + $0x50] sm:$0xff] }
 0x1ad   :  { %805 = vmatprep.mubr.bf16.mxu0 %v9129_v3  ;;  %9435 = vst [vmem:[#allocation16_spill] sm:$0xff] %v6846_v26  ;;  %v9134_v3 = vunpack.c.l.s8.bf16 %v6846_v26 }
 0x1b4   :  { %806 = vmatmul.mubr.bf16.gmra.mrb[12].mxu0 %v9131_v48  ;;  %v6857_v48 = vld [vmem:[%s9069_s0 + $0x78] sm:$0xff] }
 0x1b5   :  { %813 = vmatprep.mubr.bf16.mxu0 %v9132_v58  ;;  %9436 = vst [vmem:[#allocation17_spill] sm:$0xff] %v6857_v48  ;;  %v9137_v58 = vunpack.c.h.s8.bf16 %v6846_v26  ;;  %v9138_v53 = vunpack.c.l.s8.bf16 %v6857_v48  ;;  %v9141_v52 = vunpack.c.h.s8.bf16 %v6857_v48 }
 0x1bc   :  { %814 = vmatmul.mubr.bf16.gmra.mrb[16].mxu0 %v9134_v3  ;;  %v6868_v3 = vld [vmem:[%s9069_s0 + $0x70] sm:$0xff] }
 0x1bd   :  { %821 = vmatprep.mubr.bf16.mxu0 %v9135_v57  ;;  %9437 = vst [vmem:[#allocation18_spill] sm:$0xff] %v6868_v3  ;;  %v9140_v57 = vunpack.c.l.s8.bf16 %v6868_v3 }
 0x1c4   :  { %822 = vmatmul.mubr.bf16.gmra.mrb[20].mxu0 %v9137_v58  ;;  %v6879_v58 = vld [vmem:[%s9069_s0 + $0x98] sm:$0xff] }
 0x1c5   :  { %829 = vmatprep.mubr.bf16.mxu0 %v9138_v53  ;;  %9438 = vst [vmem:[#allocation19_spill] sm:$0xff] %v6879_v58  ;;  %v9145_v53 = vunpack.c.h.s8.bf16 %v6868_v3  ;;  %v9144_v46 = vunpack.c.l.s8.bf16 %v6879_v58  ;;  %v9149_v45 = vunpack.c.h.s8.bf16 %v6879_v58 }
 0x1cc   :  { %830 = vmatmul.mubr.bf16.gmra.mrb[24].mxu0 %v9140_v57  ;;  %v6890_v57 = vld [vmem:[%s9069_s0 + $0x90] sm:$0xff] }
 0x1cd   :  { %837 = vmatprep.mubr.bf16.mxu0 %v9141_v52  ;;  %9439 = vst [vmem:[#allocation20_spill] sm:$0xff] %v6890_v57  ;;  %v9148_v52 = vunpack.c.l.s8.bf16 %v6890_v57 }
 0x1d4   :  { %838 = vmatmul.mubr.bf16.gmra.mrb[28].mxu0 %v9145_v53  ;;  %v9153_v53 = vunpack.c.h.s8.bf16 %v6890_v57  ;;  %v5921_v57 = vld [vmem:[#allocation2 + $0x1d0] sm:$0xff] }
 0x1d5   :  { %845 = vmatprep.mubr.bf16.mxu0 %v9144_v46  ;;  %v6901_v46 = vld [vmem:[%s9069_s0 + $0xb8] sm:$0xff] }
 0x1d6   :  { %9440 = vst [vmem:[#allocation21_spill] sm:$0xff] %v6901_v46  ;;  %v9152_v42 = vunpack.c.l.s8.bf16 %v6901_v46  ;;  %v9155_v36 = vunpack.c.h.s8.bf16 %v6901_v46 }
 0x1dc   :  { %846 = vmatmul.mubr.bf16.gmra.mrb[32].mxu0 %v9148_v52  ;;  %v5577_v52 = vld [vmem:[#allocation5 + $0x10] sm:$0xff]  }
 0x1dd   :  { %853 = vmatprep.mubr.bf16.mxu0 %v9149_v45  ;;  %v6912_v45 = vld [vmem:[%s9069_s0 + $0xb0] sm:$0xff]  ;;  %4974 = vmatprep.subr.bf16.mxu1 %v5577_v52 }
 0x1de   :  { %9441 = vst [vmem:[#allocation22_spill] sm:$0xff] %v6912_v45  ;;  %v9156_v43 = vunpack.c.l.s8.bf16 %v6912_v45  ;;  %4975 = vmatpush3.bf16.msra.mxu1 %v5577_v52 }
 0x1df   :  { %4976 = vmatprep.subr.bf16.mxu1 %v5578_v34 }
 0x1e2   :  { %4977 = vmatpush3.bf16.msra.mxu1 %v5578_v34  ;;  %v6934_v34 = vld [vmem:[%s9069_s0 + $0xd0] sm:$0xff] }
 0x1e3   :  { %4978 = vmatprep.subr.bf16.mxu1 %v5579_v37  ;;  %9443 = vst [vmem:[#allocation24_spill] sm:$0xff] %v6934_v34 }
 0x1e4   :  { %854 = vmatmul.mubr.bf16.gmra.mrb[36].mxu0 %v9153_v53  ;;  %v9159_v53 = vunpack.c.h.s8.bf16 %v6912_v45 }
 0x1e5   :  { %861 = vmatprep.mubr.bf16.mxu0 %v9152_v42  ;;  %v6923_v42 = vld [vmem:[%s9069_s0 + $0xd8] sm:$0xff] }
 0x1e6   :  { %9442 = vst [vmem:[#allocation23_spill] sm:$0xff] %v6923_v42  ;;  %v9158_v52 = vunpack.c.l.s8.bf16 %v6923_v42  ;;  %4979 = vmatpush3.bf16.msra.mxu1 %v5579_v37  ;;  %v9160_v37 = vunpack.c.h.s8.bf16 %v6923_v42 }
 0x1e7   :  { %4980 = vmatprep.subr.bf16.mxu1 %v5580_v33 }
 0x1ea   :  { %4981 = vmatpush3.bf16.msra.mxu1 %v5580_v33  ;;  %v6945_v33 = vld [vmem:[%s9069_s0 + $0xf8] sm:$0xff] }
 0x1eb   :  { %9444 = vst [vmem:[#allocation25_spill] sm:$0xff] %v6945_v33 }
 0x1ec   :  { %862 = vmatmul.mubr.bf16.gmra.mrb[40].mxu0 %v9156_v43  ;;  %v9163_v43 = vunpack.c.l.s8.bf16 %v6934_v34 }
 0x1ed   :  { %869 = vmatprep.mubr.bf16.mxu0 %v9155_v36  ;;  %v5581_v36 = vld [vmem:[#allocation5 + $0x30] sm:$0xff]  }
 0x1ee   :  { %4982 = vmatprep.subr.bf16.mxu1 %v5581_v36 }
 0x1ef   :  { %4983 = vmatpush3.bf16.msra.mxu1 %v5581_v36  ;;  %v6956_v36 = vld [vmem:[%s9069_s0 + $0xf0] sm:$0xff] }
 0x1f0   :  { %4984 = vmatprep.subr.bf16.mxu1 %v5582_v28  ;;  %9445 = vst [vmem:[#allocation26_spill] sm:$0xff] %v6956_v36 }
 0x1f3   :  { %4985 = vmatpush3.bf16.msra.mxu1 %v5582_v28  ;;  %v9164_v28 = vunpack.c.l.s8.bf16 %v6956_v36 }
 0x1f4   :  { %870 = vmatmul.mubr.bf16.gmra.mrb[44].mxu0 %v9159_v53  ;;  %v9162_v53 = vunpack.c.l.s8.bf16 %v6945_v33 }
 0x1f5   :  { %877 = vmatprep.mubr.bf16.mxu0 %v9158_v52  ;;  %v9161_v52 = vunpack.c.h.s8.bf16 %v6934_v34 }
 0x1fc   :  { %878 = vmatmul.mubr.bf16.gmra.mrb[48].mxu0 %v9163_v43 }
 0x1fd   :  { %885 = vmatprep.mubr.bf16.mxu0 %v9160_v37  ;;  %v9165_v37 = vunpack.c.h.s8.bf16 %v6945_v33  ;;  %v5866_v33 = vld [vmem:[#allocation2 + $0x18] sm:$0xff] }
 0x204   :  { %886 = vmatmul.mubr.bf16.gmra.mrb[52].mxu0 %v9161_v52  ;;  %v6967_v52 = vld [vmem:[%s9069_s0 + $0x118] sm:$0xff] }
 0x205   :  { %893 = vmatprep.mubr.bf16.mxu0 %v9162_v53  ;;  %9446 = vst [vmem:[#allocation27_spill] sm:$0xff] %v6967_v52  ;;  %v9167_v53 = vunpack.c.h.s8.bf16 %v6956_v36  ;;  %v9168_v43 = vunpack.c.l.s8.bf16 %v6967_v52  ;;  %v9171_v27 = vunpack.c.h.s8.bf16 %v6967_v52  ;;  %v5864_v52 = vld [vmem:[#allocation2 + $0x8] sm:$0xff] }
 0x20c   :  { %894 = vmatmul.mubr.bf16.gmra.mrb[56].mxu0 %v9164_v28  ;;  %v6978_v28 = vld [vmem:[%s9069_s0 + $0x110] sm:$0xff] }
 0x20d   :  { %901 = vmatprep.mubr.bf16.mxu0 %v9165_v37  ;;  %9447 = vst [vmem:[#allocation28_spill] sm:$0xff] %v6978_v28  ;;  %v9170_v37 = vunpack.c.l.s8.bf16 %v6978_v28 }
 0x214   :  { %902 = vmatmul.mubr.bf16.gmra.mrb[60].mxu0 %v9167_v53  ;;  %v6989_v53 = vld [vmem:[%s9069_s0 + $0x138] sm:$0xff] }
 0x215   :  { %909 = vmatprep.mubr.bf16.mxu0 %v9168_v43  ;;  %9448 = vst [vmem:[#allocation29_spill] sm:$0xff] %v6989_v53  ;;  %v9173_v43 = vunpack.c.h.s8.bf16 %v6978_v28  ;;  %v9174_v21 = vunpack.c.l.s8.bf16 %v6989_v53  ;;  %v9177_v20 = vunpack.c.h.s8.bf16 %v6989_v53  ;;  %v5863_v53 = vld [vmem:[#allocation2] sm:$0xff] }
 0x21c   :  { %910 = vmatmul.mubr.bf16.gmra.mrb[64].mxu0 %v9170_v37  ;;  %v7000_v37 = vld [vmem:[%s9069_s0 + $0x130] sm:$0xff] }
 0x21d   :  { %917 = vmatprep.mubr.bf16.mxu0 %v9171_v27  ;;  %9449 = vst [vmem:[#allocation30_spill] sm:$0xff] %v7000_v37  ;;  %v9176_v27 = vunpack.c.l.s8.bf16 %v7000_v37 }
 0x224   :  { %918 = vmatmul.mubr.bf16.gmra.mrb[68].mxu0 %v9173_v43  ;;  %v7011_v43 = vld [vmem:[%s9069_s0 + $0x158] sm:$0xff] }
 0x225   :  { %925 = vmatprep.mubr.bf16.mxu0 %v9174_v21  ;;  %9450 = vst [vmem:[#allocation31_spill] sm:$0xff] %v7011_v43  ;;  %v9179_v21 = vunpack.c.h.s8.bf16 %v7000_v37  ;;  %v9180_v10 = vunpack.c.l.s8.bf16 %v7011_v43  ;;  %v9183_v9 = vunpack.c.h.s8.bf16 %v7011_v43 }
 0x22c   :  { %926 = vmatmul.mubr.bf16.gmra.mrb[72].mxu0 %v9176_v27  ;;  %v7022_v27 = vld [vmem:[%s9069_s0 + $0x150] sm:$0xff] }
 0x22d   :  { %933 = vmatprep.mubr.bf16.mxu0 %v9177_v20  ;;  %9451 = vst [vmem:[#allocation32_spill] sm:$0xff] %v7022_v27  ;;  %v9182_v20 = vunpack.c.l.s8.bf16 %v7022_v27 }
 0x234   :  { %934 = vmatmul.mubr.bf16.gmra.mrb[76].mxu0 %v9179_v21  ;;  %v7033_v21 = vld [vmem:[%s9069_s0 + $0x178] sm:$0xff] }
 0x235   :  { %941 = vmatprep.mubr.bf16.mxu0 %v9180_v10  ;;  %9452 = vst [vmem:[#allocation33_spill] sm:$0xff] %v7033_v21  ;;  %v9185_v10 = vunpack.c.h.s8.bf16 %v7022_v27  ;;  %v9186_v1 = vunpack.c.l.s8.bf16 %v7033_v21  ;;  %v9189_v63 = vunpack.c.h.s8.bf16 %v7033_v21 }
 0x23c   :  { %942 = vmatmul.mubr.bf16.gmra.mrb[80].mxu0 %v9182_v20  ;;  %v7044_v20 = vld [vmem:[%s9069_s0 + $0x170] sm:$0xff] }
 0x23d   :  { %949 = vmatprep.mubr.bf16.mxu0 %v9183_v9  ;;  %9453 = vst [vmem:[#allocation34_spill] sm:$0xff] %v7044_v20  ;;  %v9188_v9 = vunpack.c.l.s8.bf16 %v7044_v20 }
 0x244   :  { %950 = vmatmul.mubr.bf16.gmra.mrb[84].mxu0 %v9185_v10  ;;  %v7055_v10 = vld [vmem:[%s9069_s0 + $0x198] sm:$0xff] }
 0x245   :  { %957 = vmatprep.mubr.bf16.mxu0 %v9186_v1  ;;  %9454 = vst [vmem:[#allocation35_spill] sm:$0xff] %v7055_v10  ;;  %v9191_v1 = vunpack.c.h.s8.bf16 %v7044_v20  ;;  %v9192_v55 = vunpack.c.l.s8.bf16 %v7055_v10  ;;  %v9195_v54 = vunpack.c.h.s8.bf16 %v7055_v10  ;;  %v7092_v10 = vpop.permute.xlu0 %1040 }
 0x246   :  { %9458 = vst [vmem:[#allocation39_spill] sm:$0xff] %v7092_v10 }
 0x249   :  { %v7105_v27 = vpop.permute.xlu0 %1045 }
 0x24a   :  { %9460 = vst [vmem:[#allocation41_spill] sm:$0xff] %v7105_v27 }
 0x24c   :  { %958 = vmatmul.mubr.bf16.gmra.mrb[88].mxu0 %v9188_v9  ;;  %v7066_v9 = vld [vmem:[%s9069_s0 + $0x190] sm:$0xff] }
 0x24d   :  { %965 = vmatprep.mubr.bf16.mxu0 %v9189_v63  ;;  %9455 = vst [vmem:[#allocation36_spill] sm:$0xff] %v7066_v9  ;;  %v9194_v63 = vunpack.c.l.s8.bf16 %v7066_v9 }
 0x254   :  { %966 = vmatmul.mubr.bf16.gmra.mrb[92].mxu0 %v9191_v1  ;;  %v7077_v1 = vld [vmem:[%s9069_s0 + $0x1b8] sm:$0xff] }
 0x255   :  { %973 = vmatprep.mubr.bf16.mxu0 %v9192_v55  ;;  %9456 = vst [vmem:[#allocation37_spill] sm:$0xff] %v7077_v1  ;;  %v9201_v55 = vunpack.c.h.s8.bf16 %v7066_v9  ;;  %v9200_v14 = vunpack.c.l.s8.bf16 %v7077_v1  ;;  %v9217_v0 = vunpack.c.h.s8.bf16 %v7077_v1 }
 0x25c   :  { %974 = vmatmul.mubr.bf16.gmra.mrb[96].mxu0 %v9194_v63  ;;  %v7088_v63 = vld [vmem:[%s9069_s0 + $0x1b0] sm:$0xff] }
 0x25d   :  { %981 = vmatprep.mubr.bf16.mxu0 %v9195_v54  ;;  %9457 = vst [vmem:[#allocation38_spill] sm:$0xff] %v7088_v63  ;;  %v9214_v54 = vunpack.c.l.s8.bf16 %v7088_v63  ;;  %v9226_v21 = vunpack.c.h.s8.bf16 %v7088_v63 }
 0x264   :  { %982 = vmatmul.mubr.bf16.gmra.mrb[100].mxu0 %v9201_v55 }
 0x265   :  { %989 = vmatprep.mubr.bf16.mxu0 %v9200_v14  ;;  %v7101_v14 = vld [vmem:[%s9069_s0 + $0x1d8] sm:$0xff] }
 0x266   :  { %9459 = vst [vmem:[#allocation40_spill] sm:$0xff] %v7101_v14  ;;  %v9229_v37 = vunpack.c.l.s8.bf16 %v7101_v14 }
 0x26c   :  { %990 = vmatmul.mubr.bf16.gmra.mrb[104].mxu0 %v9214_v54 }
 0x26d   :  { %997 = vmatprep.mubr.bf16.mxu0 %v9217_v0  ;;  %v7109_v0 = vpop.permute.xlu1 %1050 }
 0x26e   :  { %9461 = vst [vmem:[#allocation42_spill] sm:$0xff] %v7109_v0 }
 0x26f   :  { %v783_v55 = vpop.f32.mrb[0].mxu0 }
 0x270   :  { %v1358_v9 = vmul.f32 %v7092_v10, %v783_v55  ;;  %v785_v20 = vpop.f32.mrb[1].mxu0 }
 0x271   :  { %v786_v43 = vpop.f32.mrb[2].mxu0  ;;  %v7118_v20 = vld [vmem:[%s9069_s0 + $0x1d0] sm:$0xff]  ;;  %v7122_v63 = vpop.permute.xlu1 %1055 }
 0x272   :  { %v1359_v54 = vmul.f32 %v7105_v27, %v786_v43  ;;  %v788_v1 = vpop.f32.mrb[3].mxu0  ;;  %v1422_v28 = vadd.f32 %v5863_v53, %v1358_v9  ;;  %9462 = vst [vmem:[#allocation43_spill] sm:$0xff] %v7118_v20  ;;  %9463 = vst [vmem:[#allocation44_spill] sm:$0xff] %v7122_v63 }
 0x274   :  { %998 = vmatmul.mubr.bf16.gmra.mrb[108].mxu0 %v9226_v21  ;;  %v1423_v55 = vadd.f32 %v5864_v52, %v1359_v54  ;;  %v9237_v21 = vunpack.c.l.s8.bf16 %v7118_v20  ;;  %v9236_v54 = vunpack.c.h.s8.bf16 %v7101_v14 }
 0x275   :  { %1005 = vmatprep.mubr.bf16.mxu0 %v9229_v37  ;;  %v5865_v37 = vld [vmem:[#allocation2 + $0x10] sm:$0xff] }
 0x276   :  { %v1486_v10 = vpack.c.bf16 %v1423_v55, %v1422_v28  ;;  %v7135_v28 = vpop.permute.xlu0 %1060 }
 0x277   :  { %v791_v43 = vpop.f32.mrb[4].mxu0  ;;  %9465 = vst [vmem:[#allocation46_spill] sm:$0xff] %v7135_v28 }
 0x278   :  { %v1360_v1 = vmul.f32 %v7109_v0, %v791_v43  ;;  %v793_v27 = vpop.f32.mrb[5].mxu0  ;;  %4986 = vmatprep.mubr.bf16.mxu1 %v1486_v10 }
 0x279   :  { %v794_v9 = vpop.f32.mrb[6].mxu0  ;;  %v7133_v27 = vld [vmem:[%s9069_s0 + $0x1f8] sm:$0xff] }
 0x27a   :  { %v1361_v53 = vmul.f32 %v7122_v63, %v794_v9  ;;  %v796_v52 = vpop.f32.mrb[7].mxu0  ;;  %v1424_v36 = vadd.f32 %v5865_v37, %v1360_v1  ;;  %9464 = vst [vmem:[#allocation45_spill] sm:$0xff] %v7133_v27  ;;  %v7139_v1 = vpop.permute.xlu1 %1065 }
 0x27b   :  { %9466 = vst [vmem:[#allocation47_spill] sm:$0xff] %v7139_v1  ;;  %v5867_v52 = vld [vmem:[#allocation2 + $0x20] sm:$0xff] }
 0x27c   :  { %v1425_v34 = vadd.f32 %v5866_v33, %v1361_v53  ;;  %1006 = vmatmul.mubr.bf16.gmra.mrb[112].mxu0 %v9237_v21  ;;  %v9240_v33 = vunpack.c.h.s8.bf16 %v7118_v20  ;;  %v9239_v53 = vunpack.c.l.s8.bf16 %v7133_v27  ;;  %v5868_v21 = vld [vmem:[#allocation2 + $0x28] sm:$0xff] }
 0x27d   :  { %1013 = vmatprep.mubr.bf16.mxu0 %v9236_v54 }
 0x27e   :  { %v1487_v10 = vpack.c.bf16 %v1425_v34, %v1424_v36 }
 0x27f   :  { %v799_v55 = vpop.f32.mrb[8].mxu0 }
 0x280   :  { %v1362_v43 = vmul.f32 %v7135_v28, %v799_v55  ;;  %v801_v37 = vpop.f32.mrb[9].mxu0  ;;  %4987 = vmatmul.mubr.bf16.vlgmr.msra.gmra.mrb[0].mxu1 %v1487_v10  ;;  %v7150_v10 = vld [vmem:[%s9069_s0 + $0x1f0] sm:$0xff] }
 0x281   :  { %v802_v9 = vpop.f32.mrb[10].mxu0  ;;  %9467 = vst [vmem:[#allocation48_spill] sm:$0xff] %v7150_v10  ;;  %v7152_v37 = vpop.permute.xlu0 %1070  ;;  %v5869_v28 = vld [vmem:[#allocation2 + $0x30] sm:$0xff] }
 0x282   :  { %v1363_v34 = vmul.f32 %v7139_v1, %v802_v9  ;;  %v804_v36 = vpop.f32.mrb[11].mxu0  ;;  %v1426_v54 = vadd.f32 %v5867_v52, %v1362_v43  ;;  %9468 = vst [vmem:[#allocation49_spill] sm:$0xff] %v7152_v37 }
 0x284   :  { %v1427_v63 = vadd.f32 %v5868_v21, %v1363_v34  ;;  %1014 = vmatmul.mubr.bf16.gmra.mrb[116].mxu0 %v9240_v33  ;;  %v9247_v21 = vunpack.c.l.s8.bf16 %v7150_v10  ;;  %v7156_v34 = vpop.permute.xlu1 %1075 }
 0x285   :  { %1021 = vmatprep.mubr.bf16.mxu0 %v9239_v53  ;;  %9469 = vst [vmem:[#allocation50_spill] sm:$0xff] %v7156_v34  ;;  %v9249_v53 = vunpack.c.h.s8.bf16 %v7133_v27 }
 0x286   :  { %v1488_v55 = vpack.c.bf16 %v1427_v63, %v1426_v54  ;;  %v5870_v63 = vld [vmem:[#allocation2 + $0x38] sm:$0xff] }
 0x287   :  { %v807_v9 = vpop.f32.mrb[12].mxu0 }
 0x288   :  { %v1364_v36 = vmul.f32 %v7152_v37, %v807_v9  ;;  %v809_v43 = vpop.f32.mrb[13].mxu0  ;;  %4990 = vmatprep.mubr.bf16.mxu1 %v1488_v55  ;;  %v7164_v9 = vpop.permute.xlu0 %1080 }
 0x289   :  { %v810_v52 = vpop.f32.mrb[14].mxu0  ;;  %9470 = vst [vmem:[#allocation51_spill] sm:$0xff] %v7164_v9 }
 0x28a   :  { %v1365_v33 = vmul.f32 %v7156_v34, %v810_v52  ;;  %v812_v1 = vpop.f32.mrb[15].mxu0  ;;  %v1428_v20 = vadd.f32 %v5869_v28, %v1364_v36  ;;  %v7168_v52 = vpop.permute.xlu1 %1085  ;;  %v5872_v34 = vld [vmem:[#allocation2 + $0x48] sm:$0xff] }
 0x28b   :  { %v9254_v1 = vunpack.c.h.s8.bf16 %v7150_v10  ;;  %9471 = vst [vmem:[#allocation52_spill] sm:$0xff] %v7168_v52 }
 0x28c   :  { %v1429_v54 = vadd.f32 %v5870_v63, %v1365_v33  ;;  %1022 = vmatmul.mubr.bf16.gmra.mrb[120].mxu0 %v9247_v21  ;;  %v5871_v63 = vld [vmem:[#allocation2 + $0x40] sm:$0xff] }
 0x28d   :  { %1029 = vmatprep.mubr.bf16.mxu0 %v9249_v53 }
 0x28e   :  { %v1489_v55 = vpack.c.bf16 %v1429_v54, %v1428_v20  ;;  %v7173_v54 = vpop.permute.xlu0 %1090 }
 0x28f   :  { %v815_v43 = vpop.f32.mrb[16].mxu0  ;;  %9472 = vst [vmem:[#allocation53_spill] sm:$0xff] %v7173_v54 }
 0x290   :  { %v1366_v37 = vmul.f32 %v7164_v9, %v815_v43  ;;  %v817_v0 = vpop.f32.mrb[17].mxu0  ;;  %4991 = vmatmul.mubr.bf16.gmra.mrb[4].mxu1 %v1489_v55  ;;  %v7176_v9 = vpop.permute.xlu1 %1095 }
 0x291   :  { %v818_v28 = vpop.f32.mrb[18].mxu0  ;;  %9473 = vst [vmem:[#allocation54_spill] sm:$0xff] %v7176_v9 }
 0x292   :  { %v1367_v33 = vmul.f32 %v7168_v52, %v818_v28  ;;  %v820_v36 = vpop.f32.mrb[19].mxu0  ;;  %v1430_v21 = vadd.f32 %v5871_v63, %v1366_v37  ;;  %v5873_v37 = vld [vmem:[#allocation2 + $0x50] sm:$0xff] }
 0x294   :  { %v1431_v53 = vadd.f32 %v5872_v34, %v1367_v33  ;;  %1030 = vmatmul.mubr.bf16.gmra.mrb[124].mxu0 %v9254_v1  ;;  %v5874_v34 = vld [vmem:[#allocation2 + $0x58] sm:$0xff]  ;;  %v7179_v1 = vpop.permute.xlu0 %1100 }
 0x295   :  { %9474 = vst [vmem:[#allocation55_spill] sm:$0xff] %v7179_v1 }
 0x296   :  { %v1490_v20 = vpack.c.bf16 %v1431_v53, %v1430_v21 }
 0x297   :  { %v823_v0 = vpop.f32.mrb[20].mxu0 }
 0x298   :  { %v1368_v55 = vmul.f32 %v7173_v54, %v823_v0  ;;  %v825_v43 = vpop.f32.mrb[21].mxu0  ;;  %4994 = vmatprep.mubr.bf16.mxu1 %v1490_v20  ;;  %v7182_v0 = vpop.permute.xlu1 %1105 }
 0x299   :  { %v826_v27 = vpop.f32.mrb[22].mxu0  ;;  %9475 = vst [vmem:[#allocation56_spill] sm:$0xff] %v7182_v0 }
 0x29a   :  { %v1369_v28 = vmul.f32 %v7176_v9, %v826_v27  ;;  %v828_v36 = vpop.f32.mrb[23].mxu0  ;;  %v1432_v63 = vadd.f32 %v5873_v37, %v1368_v55  ;;  %v5875_v27 = vld [vmem:[#allocation2 + $0x60] sm:$0xff]  ;;  %v5876_v9 = vld [vmem:[#allocation2 + $0x68] sm:$0xff] }
 0x29c   :  { %v1433_v33 = vadd.f32 %v5874_v34, %v1369_v28  ;;  %v7185_v28 = vpop.permute.xlu0 %1110 }
 0x29d   :  { %9476 = vst [vmem:[#allocation57_spill] sm:$0xff] %v7185_v28 }
 0x29e   :  { %v1491_v52 = vpack.c.bf16 %v1433_v33, %v1432_v63 }
 0x29f   :  { %v831_v53 = vpop.f32.mrb[24].mxu0 }
 0x2a0   :  { %v1370_v21 = vmul.f32 %v7179_v1, %v831_v53  ;;  %v833_v10 = vpop.f32.mrb[25].mxu0  ;;  %4995 = vmatmul.mubr.bf16.gmra.mrb[8].mxu1 %v1491_v52 }
 0x2a1   :  { %v834_v20 = vpop.f32.mrb[26].mxu0  ;;  %v7188_v10 = vpop.permute.xlu1 %1115 }
 0x2a2   :  { %v1371_v43 = vmul.f32 %v7182_v0, %v834_v20  ;;  %v836_v54 = vpop.f32.mrb[27].mxu0  ;;  %v1434_v36 = vadd.f32 %v5875_v27, %v1370_v21  ;;  %9477 = vst [vmem:[#allocation58_spill] sm:$0xff] %v7188_v10  ;;  %v5877_v20 = vld [vmem:[#allocation2 + $0x70] sm:$0xff]  ;;  %v5878_v0 = vld [vmem:[#allocation2 + $0x78] sm:$0xff] }
 0x2a4   :  { %v1435_v55 = vadd.f32 %v5876_v9, %v1371_v43  ;;  %v7191_v9 = vpop.permute.xlu0 %1120 }
 0x2a5   :  { %9478 = vst [vmem:[#allocation59_spill] sm:$0xff] %v7191_v9 }
 0x2a6   :  { %v1492_v37 = vpack.c.bf16 %v1435_v55, %v1434_v36 }
 0x2a7   :  { %v839_v63 = vpop.f32.mrb[28].mxu0 }
 0x2a8   :  { %v1372_v34 = vmul.f32 %v7185_v28, %v839_v63  ;;  %v841_v33 = vpop.f32.mrb[29].mxu0  ;;  %4998 = vmatprep.mubr.bf16.mxu1 %v1492_v37  ;;  %v7194_v63 = vpop.permute.xlu1 %1125 }
 0x2a9   :  { %v842_v52 = vpop.f32.mrb[30].mxu0  ;;  %9479 = vst [vmem:[#allocation60_spill] sm:$0xff] %v7194_v63 }
 0x2aa   :  { %v1373_v53 = vmul.f32 %v7188_v10, %v842_v52  ;;  %v844_v1 = vpop.f32.mrb[31].mxu0  ;;  %v1436_v54 = vadd.f32 %v5877_v20, %v1372_v34  ;;  %v5879_v52 = vld [vmem:[#allocation2 + $0x80] sm:$0xff]  ;;  %v5880_v10 = vld [vmem:[#allocation2 + $0x88] sm:$0xff] }
 0x2ac   :  { %v1437_v21 = vadd.f32 %v5878_v0, %v1373_v53  ;;  %v7197_v0 = vpop.permute.xlu0 %1130 }
 0x2ad   :  { %9480 = vst [vmem:[#allocation61_spill] sm:$0xff] %v7197_v0 }
 0x2ae   :  { %v1493_v27 = vpack.c.bf16 %v1437_v21, %v1436_v54 }
 0x2af   :  { %v847_v43 = vpop.f32.mrb[32].mxu0 }
 0x2b0   :  { %v1374_v36 = vmul.f32 %v7191_v9, %v847_v43  ;;  %v849_v55 = vpop.f32.mrb[33].mxu0  ;;  %4999 = vmatmul.mubr.bf16.gmra.mrb[12].mxu1 %v1493_v27  ;;  %v7200_v43 = vpop.permute.xlu1 %1135 }
 0x2b1   :  { %v850_v37 = vpop.f32.mrb[34].mxu0  ;;  %9481 = vst [vmem:[#allocation62_spill] sm:$0xff] %v7200_v43 }
 0x2b2   :  { %v1375_v33 = vmul.f32 %v7194_v63, %v850_v37  ;;  %v852_v28 = vpop.f32.mrb[35].mxu0  ;;  %v1438_v1 = vadd.f32 %v5879_v52, %v1374_v36  ;;  %v5583_v37 = vld [vmem:[#allocation7] sm:$0xff]   ;;  %v5882_v36 = vld [vmem:[#allocation2 + $0x98] sm:$0xff] }
 0x2b3   :  { %v5881_v28 = vld [vmem:[#allocation2 + $0x90] sm:$0xff]  ;;  %5050 = vmatprep.subr.bf16.mxu1 %v5583_v37 }
 0x2b4   :  { %v1439_v34 = vadd.f32 %v5880_v10, %v1375_v33  ;;  %5051 = vmatpush3.bf16.msra.mxu1 %v5583_v37  ;;  %v7203_v33 = vpop.permute.xlu0 %1140 }
 0x2b5   :  { %9482 = vst [vmem:[#allocation63_spill] sm:$0xff] %v7203_v33 }
 0x2b6   :  { %v1494_v20 = vpack.c.bf16 %v1439_v34, %v1438_v1 }
 0x2b7   :  { %v855_v53 = vpop.f32.mrb[36].mxu0 }
 0x2b8   :  { %v1376_v54 = vmul.f32 %v7197_v0, %v855_v53  ;;  %v857_v21 = vpop.f32.mrb[37].mxu0  ;;  %5002 = vmatprep.mubr.bf16.mxu1 %v1494_v20  ;;  %v7206_v53 = vpop.permute.xlu1 %1145 }
 0x2b9   :  { %v858_v27 = vpop.f32.mrb[38].mxu0  ;;  %9483 = vst [vmem:[#allocation64_spill] sm:$0xff] %v7206_v53  ;;  %v7209_v37 = vpop.permute.xlu0 %1150 }
 0x2ba   :  { %v1377_v55 = vmul.f32 %v7200_v43, %v858_v27  ;;  %v860_v9 = vpop.f32.mrb[39].mxu0  ;;  %v1440_v63 = vadd.f32 %v5881_v28, %v1376_v54  ;;  %v5883_v43 = vld [vmem:[#allocation2 + $0xa0] sm:$0xff]  ;;  %v5884_v28 = vld [vmem:[#allocation2 + $0xa8] sm:$0xff]  ;;  %9484 = vst [vmem:[#allocation65_spill] sm:$0xff] %v7209_v37 }
 0x2bc   :  { %v1441_v52 = vadd.f32 %v5882_v36, %v1377_v55 }
 0x2be   :  { %v1495_v10 = vpack.c.bf16 %v1441_v52, %v1440_v63 }
 0x2bf   :  { %v863_v1 = vpop.f32.mrb[40].mxu0 }
 0x2c0   :  { %v1378_v34 = vmul.f32 %v7203_v33, %v863_v1  ;;  %v865_v20 = vpop.f32.mrb[41].mxu0  ;;  %5003 = vmatmul.mubr.bf16.gmra.mrb[16].mxu1 %v1495_v10  ;;  %v7212_v1 = vpop.permute.xlu1 %1155 }
 0x2c1   :  { %v866_v21 = vpop.f32.mrb[42].mxu0  ;;  %9485 = vst [vmem:[#allocation66_spill] sm:$0xff] %v7212_v1 }
 0x2c2   :  { %v1379_v9 = vmul.f32 %v7206_v53, %v866_v21  ;;  %v868_v27 = vpop.f32.mrb[43].mxu0  ;;  %v1442_v54 = vadd.f32 %v5883_v43, %v1378_v34  ;;  %v5584_v21 = vld [vmem:[#allocation7 + $0x8] sm:$0xff]   ;;  %v5886_v43 = vld [vmem:[#allocation2 + $0xb8] sm:$0xff] }
 0x2c3   :  { %v5885_v27 = vld [vmem:[#allocation2 + $0xb0] sm:$0xff]  ;;  %5052 = vmatprep.subr.bf16.mxu1 %v5584_v21 }
 0x2c4   :  { %v1443_v55 = vadd.f32 %v5884_v28, %v1379_v9  ;;  %5053 = vmatpush3.bf16.msra.mxu1 %v5584_v21 }
 0x2c6   :  { %v1496_v36 = vpack.c.bf16 %v1443_v55, %v1442_v54  ;;  %v7215_v54 = vpop.permute.xlu0 %1160 }
 0x2c7   :  { %v871_v63 = vpop.f32.mrb[44].mxu0  ;;  %9486 = vst [vmem:[#allocation67_spill] sm:$0xff] %v7215_v54 }
 0x2c8   :  { %v1380_v52 = vmul.f32 %v7209_v37, %v871_v63  ;;  %v873_v0 = vpop.f32.mrb[45].mxu0  ;;  %5006 = vmatprep.mubr.bf16.mxu1 %v1496_v36  ;;  %v7218_v36 = vpop.permute.xlu1 %1165 }
 0x2c9   :  { %v874_v10 = vpop.f32.mrb[46].mxu0  ;;  %9487 = vst [vmem:[#allocation68_spill] sm:$0xff] %v7218_v36 }
 0x2ca   :  { %v1381_v20 = vmul.f32 %v7212_v1, %v874_v10  ;;  %v876_v33 = vpop.f32.mrb[47].mxu0  ;;  %v1444_v53 = vadd.f32 %v5885_v27, %v1380_v52  ;;  %v5887_v1 = vld [vmem:[#allocation2 + $0xc0] sm:$0xff]  ;;  %v5888_v27 = vld [vmem:[#allocation2 + $0xc8] sm:$0xff]  ;;  %v7221_v21 = vpop.permute.xlu0 %1170 }
 0x2cb   :  { %9488 = vst [vmem:[#allocation69_spill] sm:$0xff] %v7221_v21 }
 0x2cc   :  { %v1445_v34 = vadd.f32 %v5886_v43, %v1381_v20 }
 0x2ce   :  { %v1497_v9 = vpack.c.bf16 %v1445_v34, %v1444_v53 }
 0x2cf   :  { %v879_v28 = vpop.f32.mrb[48].mxu0 }
 0x2d0   :  { %v1382_v0 = vmul.f32 %v7215_v54, %v879_v28  ;;  %v881_v55 = vpop.f32.mrb[49].mxu0  ;;  %5007 = vmatmul.mubr.bf16.gmra.mrb[20].mxu1 %v1497_v9  ;;  %v7224_v28 = vpop.permute.xlu1 %1175 }
 0x2d1   :  { %v882_v63 = vpop.f32.mrb[50].mxu0  ;;  %9489 = vst [vmem:[#allocation70_spill] sm:$0xff] %v7224_v28 }
 0x2d2   :  { %v1383_v33 = vmul.f32 %v7218_v36, %v882_v63  ;;  %v884_v10 = vpop.f32.mrb[51].mxu0  ;;  %v1446_v52 = vadd.f32 %v5887_v1, %v1382_v0  ;;  %v5585_v63 = vld [vmem:[#allocation7 + $0x10] sm:$0xff]   ;;  %v5890_v1 = vld [vmem:[#allocation2 + $0xd8] sm:$0xff] }
 0x2d3   :  { %v5889_v10 = vld [vmem:[#allocation2 + $0xd0] sm:$0xff]  ;;  %5054 = vmatprep.subr.bf16.mxu1 %v5585_v63 }
 0x2d4   :  { %v1447_v20 = vadd.f32 %v5888_v27, %v1383_v33  ;;  %5055 = vmatpush3.bf16.msra.mxu1 %v5585_v63  ;;  %v5587_v63 = vld [vmem:[#allocation7 + $0x20] sm:$0xff]  }
 0x2d6   :  { %v1498_v43 = vpack.c.bf16 %v1447_v20, %v1446_v52  ;;  %v7227_v52 = vpop.permute.xlu0 %1180 }
 0x2d7   :  { %v887_v53 = vpop.f32.mrb[52].mxu0  ;;  %9490 = vst [vmem:[#allocation71_spill] sm:$0xff] %v7227_v52 }
 0x2d8   :  { %v1384_v34 = vmul.f32 %v7221_v21, %v887_v53  ;;  %v889_v37 = vpop.f32.mrb[53].mxu0  ;;  %5010 = vmatprep.mubr.bf16.mxu1 %v1498_v43  ;;  %v7230_v43 = vpop.permute.xlu1 %1185 }
 0x2d9   :  { %v890_v9 = vpop.f32.mrb[54].mxu0  ;;  %9491 = vst [vmem:[#allocation72_spill] sm:$0xff] %v7230_v43 }
 0x2da   :  { %v1385_v55 = vmul.f32 %v7224_v28, %v890_v9  ;;  %v892_v54 = vpop.f32.mrb[55].mxu0  ;;  %v1448_v36 = vadd.f32 %v5889_v10, %v1384_v34  ;;  %v5586_v28 = vld [vmem:[#allocation7 + $0x18] sm:$0xff]   ;;  %v5891_v34 = vld [vmem:[#allocation2 + $0xe0] sm:$0xff] }
 0x2db   :  { %5056 = vmatprep.subr.bf16.mxu1 %v5586_v28 }
 0x2dc   :  { %v1449_v0 = vadd.f32 %v5890_v1, %v1385_v55  ;;  %v5892_v55 = vld [vmem:[#allocation2 + $0xe8] sm:$0xff]  ;;  %5057 = vmatpush3.bf16.msra.mxu1 %v5586_v28 }
 0x2dd   :  { %5058 = vmatprep.subr.bf16.mxu1 %v5587_v63 }
 0x2de   :  { %v1499_v33 = vpack.c.bf16 %v1449_v0, %v1448_v36  ;;  %v7233_v0 = vpop.permute.xlu0 %1190 }
 0x2df   :  { %v895_v27 = vpop.f32.mrb[56].mxu0  ;;  %9492 = vst [vmem:[#allocation73_spill] sm:$0xff] %v7233_v0 }
 0x2e0   :  { %v1386_v37 = vmul.f32 %v7227_v52, %v895_v27  ;;  %v897_v20 = vpop.f32.mrb[57].mxu0  ;;  %5011 = vmatmul.mubr.bf16.gmra.mrb[24].mxu1 %v1499_v33  ;;  %v7236_v52 = vpop.permute.xlu1 %1195 }
 0x2e1   :  { %v898_v53 = vpop.f32.mrb[58].mxu0  ;;  %9493 = vst [vmem:[#allocation74_spill] sm:$0xff] %v7236_v52  ;;  %5059 = vmatpush3.bf16.msra.mxu1 %v5587_v63 }
 0x2e2   :  { %v1387_v54 = vmul.f32 %v7230_v43, %v898_v53  ;;  %v900_v9 = vpop.f32.mrb[59].mxu0  ;;  %v1450_v10 = vadd.f32 %v5891_v34, %v1386_v37  ;;  %v5893_v34 = vld [vmem:[#allocation2 + $0xf0] sm:$0xff] }
 0x2e3   :  { %v5589_v43 = vld [vmem:[#allocation7 + $0x30] sm:$0xff]  }
 0x2e4   :  { %v1451_v1 = vadd.f32 %v5892_v55, %v1387_v54  ;;  %v5588_v54 = vld [vmem:[#allocation7 + $0x28] sm:$0xff]   ;;  %v7242_v63 = vpop.permute.xlu1 %1205 }
 0x2e5   :  { %5060 = vmatprep.subr.bf16.mxu1 %v5588_v54  ;;  %9495 = vst [vmem:[#allocation76_spill] sm:$0xff] %v7242_v63 }
 0x2e6   :  { %v1500_v36 = vpack.c.bf16 %v1451_v1, %v1450_v10  ;;  %v5894_v10 = vld [vmem:[#allocation2 + $0xf8] sm:$0xff]  ;;  %5061 = vmatpush3.bf16.msra.mxu1 %v5588_v54 }
 0x2e7   :  { %v903_v27 = vpop.f32.mrb[60].mxu0  ;;  %5062 = vmatprep.subr.bf16.mxu1 %v5589_v43 }
 0x2e8   :  { %v1388_v33 = vmul.f32 %v7233_v0, %v903_v27  ;;  %v905_v20 = vpop.f32.mrb[61].mxu0  ;;  %5014 = vmatprep.mubr.bf16.mxu1 %v1500_v36  ;;  %v7239_v27 = vpop.permute.xlu0 %1200 }
 0x2e9   :  { %v906_v53 = vpop.f32.mrb[62].mxu0  ;;  %9494 = vst [vmem:[#allocation75_spill] sm:$0xff] %v7239_v27 }
 0x2ea   :  { %v1389_v37 = vmul.f32 %v7236_v52, %v906_v53  ;;  %v908_v9 = vpop.f32.mrb[63].mxu0  ;;  %v1452_v28 = vadd.f32 %v5893_v34, %v1388_v33  ;;  %5063 = vmatpush3.bf16.msra.mxu1 %v5589_v43  ;;  %v5895_v34 = vld [vmem:[#allocation2 + $0x100] sm:$0xff]  ;;  %v9496_v52 = vmov 0   ;;  %v7249_v43 = vpop.permute.xlu1 %1215 }
 0x2eb   :  { %9498 = vst [vmem:[#allocation78_spill] sm:$0xff] %v7249_v43 }
 0x2ec   :  { %v1453_v55 = vadd.f32 %v5894_v10, %v1389_v37  ;;  %v5590_v37 = vld [vmem:[#allocation7 + $0x38] sm:$0xff]  }
 0x2ed   :  { %5064 = vmatprep.subr.bf16.mxu1 %v5590_v37 }
 0x2ee   :  { %v1501_v1 = vpack.c.bf16 %v1453_v55, %v1452_v28  ;;  %v5896_v28 = vld [vmem:[#allocation2 + $0x108] sm:$0xff]  ;;  %5065 = vmatpush3.bf16.msra.mxu1 %v5590_v37 }
 0x2ef   :  { %v911_v36 = vpop.f32.mrb[64].mxu0  ;;  %2430 = vmatprep.subr.bf16.mxu1 %v9496_v52 }
 0x2f0   :  { %v1390_v20 = vmul.f32 %v7239_v27, %v911_v36  ;;  %v913_v0 = vpop.f32.mrb[65].mxu0  ;;  %5015 = vmatmul.mubr.bf16.gmra.mrb[28].mxu1 %v1501_v1 }
 0x2f1   :  { %v914_v53 = vpop.f32.mrb[66].mxu0  ;;  %v7246_v0 = vpop.permute.xlu0 %1210 }
 0x2f2   :  { %v1391_v33 = vmul.f32 %v7242_v63, %v914_v53  ;;  %v916_v9 = vpop.f32.mrb[67].mxu0  ;;  %v1454_v54 = vadd.f32 %v5895_v34, %v1390_v20  ;;  %9497 = vst [vmem:[#allocation77_spill] sm:$0xff] %v7246_v0  ;;  %v5897_v34 = vld [vmem:[#allocation2 + $0x110] sm:$0xff] }
 0x2f4   :  { %v1455_v10 = vadd.f32 %v5896_v28, %v1391_v33  ;;  %v5898_v28 = vld [vmem:[#allocation2 + $0x118] sm:$0xff] }
 0x2f6   :  { %v1502_v55 = vpack.c.bf16 %v1455_v10, %v1454_v54  ;;  %v7252_v10 = vpop.permute.xlu0 %1220 }
 0x2f7   :  { %v919_v1 = vpop.f32.mrb[68].mxu0  ;;  %9499 = vst [vmem:[#allocation79_spill] sm:$0xff] %v7252_v10 }
 0x2f8   :  { %v1392_v36 = vmul.f32 %v7246_v0, %v919_v1  ;;  %v921_v27 = vpop.f32.mrb[69].mxu0  ;;  %5018 = vmatprep.mubr.bf16.mxu1 %v1502_v55 }
 0x2f9   :  { %v922_v53 = vpop.f32.mrb[70].mxu0  ;;  %v7255_v27 = vpop.permute.xlu1 %1225 }
 0x2fa   :  { %v1393_v9 = vmul.f32 %v7249_v43, %v922_v53  ;;  %v924_v20 = vpop.f32.mrb[71].mxu0  ;;  %v1456_v33 = vadd.f32 %v5897_v34, %v1392_v36  ;;  %9500 = vst [vmem:[#allocation80_spill] sm:$0xff] %v7255_v27  ;;  %v5899_v53 = vld [vmem:[#allocation2 + $0x120] sm:$0xff]  ;;  %v5900_v43 = vld [vmem:[#allocation2 + $0x128] sm:$0xff] }
 0x2fc   :  { %v1457_v37 = vadd.f32 %v5898_v28, %v1393_v9  ;;  %v7258_v9 = vpop.permute.xlu0 %1230 }
 0x2fd   :  { %9501 = vst [vmem:[#allocation81_spill] sm:$0xff] %v7258_v9 }
 0x2fe   :  { %v1503_v54 = vpack.c.bf16 %v1457_v37, %v1456_v33 }
 0x2ff   :  { %v927_v63 = vpop.f32.mrb[72].mxu0 }
 0x300   :  { %v1394_v21 = vmul.f32 %v7252_v10, %v927_v63  ;;  %v929_v14 = vpop.f32.mrb[73].mxu0  ;;  %5019 = vmatmul.mubr.bf16.gmra.mrb[32].mxu1 %v1503_v54 }
 0x301   :  { %v930_v55 = vpop.f32.mrb[74].mxu0  ;;  %v7261_v14 = vpop.permute.xlu1 %1235 }
 0x302   :  { %v1395_v1 = vmul.f32 %v7255_v27, %v930_v55  ;;  %v932_v0 = vpop.f32.mrb[75].mxu0  ;;  %v1458_v20 = vadd.f32 %v5899_v53, %v1394_v21  ;;  %9502 = vst [vmem:[#allocation82_spill] sm:$0xff] %v7261_v14  ;;  %v5901_v55 = vld [vmem:[#allocation2 + $0x130] sm:$0xff]  ;;  %v5902_v27 = vld [vmem:[#allocation2 + $0x138] sm:$0xff] }
 0x304   :  { %v1459_v36 = vadd.f32 %v5900_v43, %v1395_v1  ;;  %v7264_v43 = vpop.permute.xlu0 %1240 }
 0x305   :  { %9503 = vst [vmem:[#allocation83_spill] sm:$0xff] %v7264_v43 }
 0x306   :  { %v1504_v34 = vpack.c.bf16 %v1459_v36, %v1458_v20 }
 0x307   :  { %v935_v33 = vpop.f32.mrb[76].mxu0 }
 0x308   :  { %v1396_v28 = vmul.f32 %v7258_v9, %v935_v33  ;;  %v937_v37 = vpop.f32.mrb[77].mxu0  ;;  %5022 = vmatprep.mubr.bf16.mxu1 %v1504_v34  ;;  %v7267_v33 = vpop.permute.xlu1 %1245 }
 0x309   :  { %v938_v63 = vpop.f32.mrb[78].mxu0  ;;  %9504 = vst [vmem:[#allocation84_spill] sm:$0xff] %v7267_v33 }
 0x30a   :  { %v1397_v54 = vmul.f32 %v7261_v14, %v938_v63  ;;  %v940_v10 = vpop.f32.mrb[79].mxu0  ;;  %v1460_v0 = vadd.f32 %v5901_v55, %v1396_v28  ;;  %v5903_v63 = vld [vmem:[#allocation2 + $0x140] sm:$0xff]  ;;  %v5904_v14 = vld [vmem:[#allocation2 + $0x148] sm:$0xff] }
 0x30c   :  { %v1461_v21 = vadd.f32 %v5902_v27, %v1397_v54  ;;  %v7270_v27 = vpop.permute.xlu0 %1250 }
 0x30d   :  { %9505 = vst [vmem:[#allocation85_spill] sm:$0xff] %v7270_v27 }
 0x30e   :  { %v1505_v53 = vpack.c.bf16 %v1461_v21, %v1460_v0 }
 0x30f   :  { %v943_v1 = vpop.f32.mrb[80].mxu0 }
 0x310   :  { %v1398_v20 = vmul.f32 %v7264_v43, %v943_v1  ;;  %v945_v36 = vpop.f32.mrb[81].mxu0  ;;  %5023 = vmatmul.mubr.bf16.gmra.mrb[36].mxu1 %v1505_v53  ;;  %v7273_v1 = vpop.permute.xlu1 %1255 }
 0x311   :  { %v946_v34 = vpop.f32.mrb[82].mxu0  ;;  %9506 = vst [vmem:[#allocation86_spill] sm:$0xff] %v7273_v1 }
 0x312   :  { %v1399_v37 = vmul.f32 %v7267_v33, %v946_v34  ;;  %v948_v9 = vpop.f32.mrb[83].mxu0  ;;  %v1462_v10 = vadd.f32 %v5903_v63, %v1398_v20  ;;  %v5905_v34 = vld [vmem:[#allocation2 + $0x150] sm:$0xff]  ;;  %v5906_v33 = vld [vmem:[#allocation2 + $0x158] sm:$0xff] }
 0x314   :  { %v1463_v28 = vadd.f32 %v5904_v14, %v1399_v37  ;;  %v7276_v14 = vpop.permute.xlu0 %1260 }
 0x315   :  { %9507 = vst [vmem:[#allocation87_spill] sm:$0xff] %v7276_v14 }
 0x316   :  { %v1506_v55 = vpack.c.bf16 %v1463_v28, %v1462_v10 }
 0x317   :  { %v951_v54 = vpop.f32.mrb[84].mxu0 }
 0x318   :  { %v1400_v0 = vmul.f32 %v7270_v27, %v951_v54  ;;  %v953_v21 = vpop.f32.mrb[85].mxu0  ;;  %5026 = vmatprep.mubr.bf16.mxu1 %v1506_v55  ;;  %v7279_v54 = vpop.permute.xlu1 %1265 }
 0x319   :  { %v954_v53 = vpop.f32.mrb[86].mxu0  ;;  %9508 = vst [vmem:[#allocation88_spill] sm:$0xff] %v7279_v54 }
 0x31a   :  { %v1401_v36 = vmul.f32 %v7273_v1, %v954_v53  ;;  %v956_v43 = vpop.f32.mrb[87].mxu0  ;;  %v1464_v9 = vadd.f32 %v5905_v34, %v1400_v0  ;;  %v5907_v53 = vld [vmem:[#allocation2 + $0x160] sm:$0xff]  ;;  %v5908_v1 = vld [vmem:[#allocation2 + $0x168] sm:$0xff] }
 0x31c   :  { %v1465_v20 = vadd.f32 %v5906_v33, %v1401_v36  ;;  %v7282_v33 = vpop.permute.xlu0 %1270 }
 0x31d   :  { %9509 = vst [vmem:[#allocation89_spill] sm:$0xff] %v7282_v33 }
 0x31e   :  { %v1507_v63 = vpack.c.bf16 %v1465_v20, %v1464_v9 }
 0x31f   :  { %v959_v37 = vpop.f32.mrb[88].mxu0 }
 0x320   :  { %v1402_v10 = vmul.f32 %v7276_v14, %v959_v37  ;;  %v961_v28 = vpop.f32.mrb[89].mxu0  ;;  %5027 = vmatmul.mubr.bf16.gmra.mrb[40].mxu1 %v1507_v63  ;;  %v7285_v37 = vpop.permute.xlu1 %1275 }
 0x321   :  { %v962_v55 = vpop.f32.mrb[90].mxu0  ;;  %9510 = vst [vmem:[#allocation90_spill] sm:$0xff] %v7285_v37 }
 0x322   :  { %v1403_v21 = vmul.f32 %v7279_v54, %v962_v55  ;;  %v964_v27 = vpop.f32.mrb[91].mxu0  ;;  %v1466_v43 = vadd.f32 %v5907_v53, %v1402_v10  ;;  %v5909_v55 = vld [vmem:[#allocation2 + $0x170] sm:$0xff]  ;;  %v5910_v54 = vld [vmem:[#allocation2 + $0x178] sm:$0xff] }
 0x324   :  { %v1467_v0 = vadd.f32 %v5908_v1, %v1403_v21  ;;  %v7288_v1 = vpop.permute.xlu0 %1280 }
 0x325   :  { %9511 = vst [vmem:[#allocation91_spill] sm:$0xff] %v7288_v1 }
 0x326   :  { %v1508_v34 = vpack.c.bf16 %v1467_v0, %v1466_v43 }
 0x327   :  { %v967_v36 = vpop.f32.mrb[92].mxu0 }
 0x328   :  { %v1404_v9 = vmul.f32 %v7282_v33, %v967_v36  ;;  %v969_v20 = vpop.f32.mrb[93].mxu0  ;;  %5030 = vmatprep.mubr.bf16.mxu1 %v1508_v34  ;;  %v7291_v36 = vpop.permute.xlu1 %1285 }
 0x329   :  { %v970_v63 = vpop.f32.mrb[94].mxu0  ;;  %9512 = vst [vmem:[#allocation92_spill] sm:$0xff] %v7291_v36 }
 0x32a   :  { %v1405_v28 = vmul.f32 %v7285_v37, %v970_v63  ;;  %v972_v14 = vpop.f32.mrb[95].mxu0  ;;  %v1468_v27 = vadd.f32 %v5909_v55, %v1404_v9  ;;  %v5911_v63 = vld [vmem:[#allocation2 + $0x180] sm:$0xff]  ;;  %v5912_v37 = vld [vmem:[#allocation2 + $0x188] sm:$0xff] }
 0x32c   :  { %v1469_v10 = vadd.f32 %v5910_v54, %v1405_v28  ;;  %v7294_v54 = vpop.permute.xlu0 %1290 }
 0x32d   :  { %9513 = vst [vmem:[#allocation93_spill] sm:$0xff] %v7294_v54 }
 0x32e   :  { %v1509_v53 = vpack.c.bf16 %v1469_v10, %v1468_v27 }
 0x32f   :  { %v975_v21 = vpop.f32.mrb[96].mxu0 }
 0x330   :  { %v1406_v43 = vmul.f32 %v7288_v1, %v975_v21  ;;  %v977_v0 = vpop.f32.mrb[97].mxu0  ;;  %5031 = vmatmul.mubr.bf16.gmra.mrb[44].mxu1 %v1509_v53  ;;  %v7297_v21 = vpop.permute.xlu1 %1295 }
 0x331   :  { %v978_v34 = vpop.f32.mrb[98].mxu0  ;;  %9514 = vst [vmem:[#allocation94_spill] sm:$0xff] %v7297_v21 }
 0x332   :  { %v1407_v20 = vmul.f32 %v7291_v36, %v978_v34  ;;  %v980_v33 = vpop.f32.mrb[99].mxu0  ;;  %v1470_v14 = vadd.f32 %v5911_v63, %v1406_v43  ;;  %v5913_v34 = vld [vmem:[#allocation2 + $0x190] sm:$0xff]  ;;  %v5914_v36 = vld [vmem:[#allocation2 + $0x198] sm:$0xff] }
 0x334   :  { %v1471_v9 = vadd.f32 %v5912_v37, %v1407_v20  ;;  %v7300_v37 = vpop.permute.xlu0 %1300 }
 0x335   :  { %9515 = vst [vmem:[#allocation95_spill] sm:$0xff] %v7300_v37 }
 0x336   :  { %v1510_v55 = vpack.c.bf16 %v1471_v9, %v1470_v14 }
 0x337   :  { %v983_v28 = vpop.f32.mrb[100].mxu0 }
 0x338   :  { %v1408_v27 = vmul.f32 %v7294_v54, %v983_v28  ;;  %v985_v10 = vpop.f32.mrb[101].mxu0  ;;  %5034 = vmatprep.mubr.bf16.mxu1 %v1510_v55  ;;  %v7303_v28 = vpop.permute.xlu1 %1305 }
 0x339   :  { %v986_v53 = vpop.f32.mrb[102].mxu0  ;;  %9516 = vst [vmem:[#allocation96_spill] sm:$0xff] %v7303_v28 }
 0x33a   :  { %v1409_v0 = vmul.f32 %v7297_v21, %v986_v53  ;;  %v988_v1 = vpop.f32.mrb[103].mxu0  ;;  %v1472_v33 = vadd.f32 %v5913_v34, %v1408_v27  ;;  %v5915_v53 = vld [vmem:[#allocation2 + $0x1a0] sm:$0xff]  ;;  %v5916_v21 = vld [vmem:[#allocation2 + $0x1a8] sm:$0xff] }
 0x33c   :  { %v1473_v43 = vadd.f32 %v5914_v36, %v1409_v0  ;;  %v7306_v36 = vpop.permute.xlu0 %1310 }
 0x33d   :  { %9517 = vst [vmem:[#allocation97_spill] sm:$0xff] %v7306_v36 }
 0x33e   :  { %v1511_v63 = vpack.c.bf16 %v1473_v43, %v1472_v33 }
 0x33f   :  { %v991_v20 = vpop.f32.mrb[104].mxu0 }
 0x340   :  { %v1410_v14 = vmul.f32 %v7300_v37, %v991_v20  ;;  %v993_v9 = vpop.f32.mrb[105].mxu0  ;;  %5035 = vmatmul.mubr.bf16.gmra.mrb[48].mxu1 %v1511_v63  ;;  %v7309_v20 = vpop.permute.xlu1 %1315 }
 0x341   :  { %v994_v55 = vpop.f32.mrb[106].mxu0  ;;  %9518 = vst [vmem:[#allocation98_spill] sm:$0xff] %v7309_v20 }
 0x342   :  { %v1411_v10 = vmul.f32 %v7303_v28, %v994_v55  ;;  %v996_v54 = vpop.f32.mrb[107].mxu0  ;;  %v1474_v1 = vadd.f32 %v5915_v53, %v1410_v14  ;;  %v5917_v55 = vld [vmem:[#allocation2 + $0x1b0] sm:$0xff]  ;;  %v5918_v28 = vld [vmem:[#allocation2 + $0x1b8] sm:$0xff] }
 0x344   :  { %v1475_v27 = vadd.f32 %v5916_v21, %v1411_v10  ;;  %v7312_v21 = vpop.permute.xlu0 %1320 }
 0x345   :  { %9519 = vst [vmem:[#allocation99_spill] sm:$0xff] %v7312_v21 }
 0x346   :  { %v1512_v34 = vpack.c.bf16 %v1475_v27, %v1474_v1 }
 0x347   :  { %v999_v0 = vpop.f32.mrb[108].mxu0 }
 0x348   :  { %v1412_v33 = vmul.f32 %v7306_v36, %v999_v0  ;;  %v1001_v43 = vpop.f32.mrb[109].mxu0  ;;  %5038 = vmatprep.mubr.bf16.mxu1 %v1512_v34  ;;  %v7315_v0 = vpop.permute.xlu1 %1325 }
 0x349   :  { %v1002_v63 = vpop.f32.mrb[110].mxu0  ;;  %9520 = vst [vmem:[#allocation100_spill] sm:$0xff] %v7315_v0  ;;  %v7320_v43 = vld [vmem:[%s9073_s4] ss:$0 sm:$0xff]  ;;  %v7326_v42 = vpop.permute.xlu0 %1330 }
 0x34a   :  { %v1413_v9 = vmul.f32 %v7309_v20, %v1002_v63  ;;  %v1004_v37 = vpop.f32.mrb[111].mxu0  ;;  %v1476_v54 = vadd.f32 %v5917_v55, %v1412_v33  ;;  %v5919_v63 = vld [vmem:[#allocation2 + $0x1c0] sm:$0xff]  ;;  %v5920_v55 = vld [vmem:[#allocation2 + $0x1c8] sm:$0xff]  ;;  %9521 = vst [vmem:[#allocation101_spill] sm:$0xff] %v7326_v42 }
 0x34c   :  { %v1477_v14 = vadd.f32 %v5918_v28, %v1413_v9 }
 0x34e   :  { %v1513_v53 = vpack.c.bf16 %v1477_v14, %v1476_v54 }
 0x34f   :  { %v1007_v10 = vpop.f32.mrb[112].mxu0 }
 0x350   :  { %v1414_v1 = vmul.f32 %v7312_v21, %v1007_v10  ;;  %v1009_v27 = vpop.f32.mrb[113].mxu0  ;;  %5039 = vmatmul.mubr.bf16.gmra.mrb[52].mxu1 %v1513_v53 }
 0x351   :  { %v1010_v34 = vpop.f32.mrb[114].mxu0 }
 0x352   :  { %v1415_v37 = vmul.f32 %v7315_v0, %v1010_v34  ;;  %v1012_v33 = vpop.f32.mrb[115].mxu0  ;;  %v1478_v9 = vadd.f32 %v5919_v63, %v1414_v1 }
 0x353   :  { %v4988_v28 = vpop.f32.mrb[0].mxu1 }
 0x354   :  { %v1479_v54 = vadd.f32 %v5920_v55, %v1415_v37  ;;  %v1632_v14 = vadd.f32 %v4988_v28, %v7320_v43  ;;  %v1623_v10 = vpop.f32.mrb[1].mxu1  ;;  %v7330_v28 = vpop.permute.xlu1 %1335 }
 0x355   :  { %v1624_v53 = vadd.f32 %v7320_v43, %v1623_v10  ;;  %v4989_v27 = vpop.f32.mrb[2].mxu1  ;;  %9522 = vst [vmem:[#allocation102_spill] sm:$0xff] %v7330_v28 }
 0x356   :  { %v1635_v21 = vadd.f32 %v4989_v27, %v7320_v43  ;;  %v1626_v20 = vpop.f32.mrb[3].mxu1  ;;  %v1514_v36 = vpack.c.bf16 %v1479_v54, %v1478_v9  ;;  %v1880_v0 = vmax.f32 %v1632_v14, 0.0 }
 0x357   :  { %v1627_v34 = vadd.f32 %v7320_v43, %v1626_v20  ;;  %v1015_v33 = vpop.f32.mrb[116].mxu0  ;;  %v1878_v63 = vmax.f32 %v1624_v53, 0.0  ;;  %v5922_v20 = vld [vmem:[#allocation2 + $0x1d8] sm:$0xff] }
 0x358   :  { %v1881_v45 = vmax.f32 %v1635_v21, 0.0  ;;  %v1416_v1 = vmul.f32 %v7326_v42, %v1015_v33  ;;  %v1017_v37 = vpop.f32.mrb[117].mxu0  ;;  %5042 = vmatprep.mubr.bf16.mxu1 %v1514_v36  ;;  %v7333_v21 = vpop.permute.xlu0 %1340  ;;  %v5925_v42 = vld [vmem:[#allocation2 + $0x1f0] sm:$0xff] }
 0x359   :  { %v1879_v55 = vmax.f32 %v1627_v34, 0.0  ;;  %v1018_v10 = vpop.f32.mrb[118].mxu0  ;;  %9523 = vst [vmem:[#allocation103_spill] sm:$0xff] %v7333_v21  ;;  %v7336_v53 = vpop.permute.xlu1 %1345 }
 0x35a   :  { %v1943_v46 = vpack.c.bf16 %v1881_v45, %v1880_v0  ;;  %v1417_v27 = vmul.f32 %v7330_v28, %v1018_v10  ;;  %v1020_v9 = vpop.f32.mrb[119].mxu0  ;;  %v1480_v58 = vadd.f32 %v5921_v57, %v1416_v1  ;;  %9524 = vst [vmem:[#allocation104_spill] sm:$0xff] %v7336_v53  ;;  %v5924_v57 = vld [vmem:[#allocation2 + $0x1e8] sm:$0xff] }
 0x35b   :  { %v1942_v54 = vpack.c.bf16 %v1879_v55, %v1878_v63  ;;  %v5923_v63 = vld [vmem:[#allocation2 + $0x1e0] sm:$0xff] }
 0x35c   :  { %v1481_v3 = vadd.f32 %v5922_v20, %v1417_v27 }
 0x35e   :  { %v1515_v14 = vpack.c.bf16 %v1481_v3, %v1480_v58 }
 0x35f   :  { %v1023_v33 = vpop.f32.mrb[120].mxu0 }
 0x360   :  { %v1418_v36 = vmul.f32 %v7333_v21, %v1023_v33  ;;  %v1025_v37 = vpop.f32.mrb[121].mxu0  ;;  %5043 = vmatmul.mubr.bf16.gmra.mrb[56].mxu1 %v1515_v14 }
 0x361   :  { %v1026_v34 = vpop.f32.mrb[122].mxu0  ;;  %v7342_v37 = vpop.permute.xlu0 %1350 }
 0x362   :  { %v1419_v45 = vmul.f32 %v7336_v53, %v1026_v34  ;;  %v1028_v0 = vpop.f32.mrb[123].mxu0  ;;  %v1482_v55 = vadd.f32 %v5923_v63, %v1418_v36  ;;  %9525 = vst [vmem:[#allocation105_spill] sm:$0xff] %v7342_v37 }
 0x363   :  { %v4992_v10 = vpop.f32.mrb[4].mxu1 }
 0x364   :  { %v1483_v1 = vadd.f32 %v5924_v57, %v1419_v45  ;;  %v1648_v58 = vadd.f32 %v4992_v10, %v7320_v43  ;;  %v1639_v3 = vpop.f32.mrb[5].mxu1  ;;  %v7346_v10 = vpop.permute.xlu1 %1355 }
 0x365   :  { %v1640_v27 = vadd.f32 %v7320_v43, %v1639_v3  ;;  %v4993_v9 = vpop.f32.mrb[6].mxu1  ;;  %9526 = vst [vmem:[#allocation106_spill] sm:$0xff] %v7346_v10 }
 0x366   :  { %v1651_v20 = vadd.f32 %v4993_v9, %v7320_v43  ;;  %v1642_v14 = vpop.f32.mrb[7].mxu1  ;;  %v1516_v33 = vpack.c.bf16 %v1483_v1, %v1482_v55  ;;  %v1884_v53 = vmax.f32 %v1648_v58, 0.0 }
 0x367   :  { %v1643_v34 = vadd.f32 %v7320_v43, %v1642_v14  ;;  %v1031_v0 = vpop.f32.mrb[124].mxu0  ;;  %v1882_v63 = vmax.f32 %v1640_v27, 0.0  ;;  %v5926_v14 = vld [vmem:[#allocation2 + $0x1f8] sm:$0xff] }
 0x368   :  { %v1885_v21 = vmax.f32 %v1651_v20, 0.0  ;;  %v1420_v36 = vmul.f32 %v7342_v37, %v1031_v0  ;;  %v1033_v45 = vpop.f32.mrb[125].mxu0  ;;  %5046 = vmatprep.mubr.bf16.mxu1 %v1516_v33 }
 0x369   :  { %v1883_v57 = vmax.f32 %v1643_v34, 0.0  ;;  %v1034_v3 = vpop.f32.mrb[126].mxu0 }
 0x36a   :  { %v1421_v9 = vmul.f32 %v7346_v10, %v1034_v3  ;;  %v1036_v28 = vpop.f32.mrb[127].mxu0  ;;  %v1945_v55 = vpack.c.bf16 %v1885_v21, %v1884_v53  ;;  %v1484_v48 = vadd.f32 %v5925_v42, %v1420_v36 }
 0x36b   :  { %v1944_v1 = vpack.c.bf16 %v1883_v57, %v1882_v63 }
 0x36c   :  { %v1485_v26 = vadd.f32 %v5926_v14, %v1421_v9 }
 0x36e   :  { %v1517_v58 = vpack.c.bf16 %v1485_v26, %v1484_v48 }
 0x370   :  { %5047 = vmatmul.mubr.bf16.gmra.mrb[60].mxu1 %v1517_v58 }
 0x371   :  { %5066 = vmatprep.mubr.bf16.mxu1 %v1942_v54 }
 0x373   :  { %v4996_v20 = vpop.f32.mrb[8].mxu1 }
 0x374   :  { %v1664_v33 = vadd.f32 %v4996_v20, %v7320_v43  ;;  %v1655_v0 = vpop.f32.mrb[9].mxu1 }
 0x375   :  { %v1656_v27 = vadd.f32 %v7320_v43, %v1655_v0  ;;  %v4997_v34 = vpop.f32.mrb[10].mxu1 }
 0x376   :  { %v1667_v45 = vadd.f32 %v4997_v34, %v7320_v43  ;;  %v1658_v3 = vpop.f32.mrb[11].mxu1  ;;  %v1888_v21 = vmax.f32 %v1664_v33, 0.0 }
 0x377   :  { %v1659_v28 = vadd.f32 %v7320_v43, %v1658_v3  ;;  %v1886_v42 = vmax.f32 %v1656_v27, 0.0 }
 0x378   :  { %v1889_v53 = vmax.f32 %v1667_v45, 0.0  ;;  %5067 = vmatmul.mubr.bf16.vlgmr.msra.gmra.mrb[64].mxu1 %v1943_v46 }
 0x379   :  { %v1887_v36 = vmax.f32 %v1659_v28, 0.0  ;;  %5070 = vmatprep.mubr.bf16.mxu1 %v1944_v1 }
 0x37a   :  { %v1947_v48 = vpack.c.bf16 %v1889_v53, %v1888_v21 }
 0x37b   :  { %v1946_v26 = vpack.c.bf16 %v1887_v36, %v1886_v42 }
 0x380   :  { %5071 = vmatmul.mubr.bf16.gmra.mrb[68].mxu1 %v1945_v55 }
 0x381   :  { %5074 = vmatprep.mubr.bf16.mxu1 %v1946_v26 }
 0x383   :  { %v5000_v54 = vpop.f32.mrb[12].mxu1 }
 0x384   :  { %v1680_v63 = vadd.f32 %v5000_v54, %v7320_v43  ;;  %v1671_v57 = vpop.f32.mrb[13].mxu1 }
 0x385   :  { %v1672_v9 = vadd.f32 %v7320_v43, %v1671_v57  ;;  %v5001_v14 = vpop.f32.mrb[14].mxu1 }
 0x386   :  { %v1683_v58 = vadd.f32 %v5001_v14, %v7320_v43  ;;  %v1674_v20 = vpop.f32.mrb[15].mxu1  ;;  %v1892_v46 = vmax.f32 %v1680_v63, 0.0 }
 0x387   :  { %v1675_v33 = vadd.f32 %v7320_v43, %v1674_v20  ;;  %v1890_v1 = vmax.f32 %v1672_v9, 0.0 }
 0x388   :  { %v1893_v0 = vmax.f32 %v1683_v58, 0.0  ;;  %5075 = vmatmul.mubr.bf16.gmra.mrb[72].mxu1 %v1947_v48 }
 0x389   :  { %v1891_v27 = vmax.f32 %v1675_v33, 0.0 }
 0x38a   :  { %v1949_v34 = vpack.c.bf16 %v1893_v0, %v1892_v46 }
 0x38b   :  { %v1948_v55 = vpack.c.bf16 %v1891_v27, %v1890_v1 }
 0x38d   :  { %5078 = vmatprep.mubr.bf16.mxu1 %v1948_v55 }
 0x390   :  { %5079 = vmatmul.mubr.bf16.gmra.mrb[76].mxu1 %v1949_v34 }
 0x393   :  { %v5004_v45 = vpop.f32.mrb[16].mxu1 }
 0x394   :  { %v1696_v3 = vadd.f32 %v5004_v45, %v7320_v43  ;;  %v1687_v28 = vpop.f32.mrb[17].mxu1 }
 0x395   :  { %v1688_v21 = vadd.f32 %v7320_v43, %v1687_v28  ;;  %v5005_v53 = vpop.f32.mrb[18].mxu1 }
 0x396   :  { %v1699_v42 = vadd.f32 %v5005_v53, %v7320_v43  ;;  %v1690_v36 = vpop.f32.mrb[19].mxu1  ;;  %v1896_v54 = vmax.f32 %v1696_v3, 0.0 }
 0x397   :  { %v1691_v26 = vadd.f32 %v7320_v43, %v1690_v36  ;;  %v1894_v63 = vmax.f32 %v1688_v21, 0.0 }
 0x398   :  { %v1897_v48 = vmax.f32 %v1699_v42, 0.0 }
 0x399   :  { %v1895_v57 = vmax.f32 %v1691_v26, 0.0 }
 0x39a   :  { %v1951_v9 = vpack.c.bf16 %v1897_v48, %v1896_v54 }
 0x39b   :  { %v1950_v14 = vpack.c.bf16 %v1895_v57, %v1894_v63 }
 0x39d   :  { %5082 = vmatprep.mubr.bf16.mxu1 %v1950_v14 }
 0x39e   :  { %5083 = vmatmul.mubr.bf16.gmra.mrb[80].mxu1 %v1951_v9 }
 0x3a3   :  { %v5008_v58 = vpop.f32.mrb[20].mxu1 }
 0x3a4   :  { %v1712_v20 = vadd.f32 %v5008_v58, %v7320_v43  ;;  %v1703_v33 = vpop.f32.mrb[21].mxu1 }
 0x3a5   :  { %v1704_v46 = vadd.f32 %v7320_v43, %v1703_v33  ;;  %v5009_v0 = vpop.f32.mrb[22].mxu1 }
 0x3a6   :  { %v1715_v1 = vadd.f32 %v5009_v0, %v7320_v43  ;;  %v1706_v27 = vpop.f32.mrb[23].mxu1  ;;  %v1900_v55 = vmax.f32 %v1712_v20, 0.0 }
 0x3a7   :  { %v1707_v34 = vadd.f32 %v7320_v43, %v1706_v27  ;;  %v1898_v3 = vmax.f32 %v1704_v46, 0.0 }
 0x3a8   :  { %v1901_v45 = vmax.f32 %v1715_v1, 0.0 }
 0x3a9   :  { %v1899_v28 = vmax.f32 %v1707_v34, 0.0 }
 0x3aa   :  { %v1953_v21 = vpack.c.bf16 %v1901_v45, %v1900_v55 }
 0x3ab   :  { %v1952_v53 = vpack.c.bf16 %v1899_v28, %v1898_v3 }
 0x3ad   :  { %5086 = vmatprep.mubr.bf16.mxu1 %v1952_v53 }
 0x3ae   :  { %5087 = vmatmul.mubr.bf16.gmra.mrb[84].mxu1 %v1953_v21 }
 0x3b3   :  { %v5012_v42 = vpop.f32.mrb[24].mxu1 }
 0x3b4   :  { %v1728_v36 = vadd.f32 %v5012_v42, %v7320_v43  ;;  %v1719_v26 = vpop.f32.mrb[25].mxu1 }
 0x3b5   :  { %v1720_v54 = vadd.f32 %v7320_v43, %v1719_v26  ;;  %v5013_v48 = vpop.f32.mrb[26].mxu1 }
 0x3b6   :  { %v1731_v63 = vadd.f32 %v5013_v48, %v7320_v43  ;;  %v1722_v57 = vpop.f32.mrb[27].mxu1  ;;  %v1904_v14 = vmax.f32 %v1728_v36, 0.0 }
 0x3b7   :  { %v1723_v9 = vadd.f32 %v7320_v43, %v1722_v57  ;;  %v1902_v20 = vmax.f32 %v1720_v54, 0.0 }
 0x3b8   :  { %v1905_v58 = vmax.f32 %v1731_v63, 0.0 }
 0x3b9   :  { %v1903_v33 = vmax.f32 %v1723_v9, 0.0 }
 0x3ba   :  { %v1955_v46 = vpack.c.bf16 %v1905_v58, %v1904_v14 }
 0x3bb   :  { %v1954_v0 = vpack.c.bf16 %v1903_v33, %v1902_v20 }
 0x3bd   :  { %5090 = vmatprep.mubr.bf16.mxu1 %v1954_v0 }
 0x3be   :  { %5091 = vmatmul.mubr.bf16.gmra.mrb[88].mxu1 %v1955_v46 }
 0x3c3   :  { %v5016_v1 = vpop.f32.mrb[28].mxu1 }
 0x3c4   :  { %v1744_v27 = vadd.f32 %v5016_v1, %v7320_v43  ;;  %v1735_v34 = vpop.f32.mrb[29].mxu1 }
 0x3c5   :  { %v1736_v55 = vadd.f32 %v7320_v43, %v1735_v34  ;;  %v5017_v45 = vpop.f32.mrb[30].mxu1 }
 0x3c6   :  { %v1747_v3 = vadd.f32 %v5017_v45, %v7320_v43  ;;  %v1738_v28 = vpop.f32.mrb[31].mxu1  ;;  %v1908_v53 = vmax.f32 %v1744_v27, 0.0 }
 0x3c7   :  { %v1739_v21 = vadd.f32 %v7320_v43, %v1738_v28  ;;  %v1906_v36 = vmax.f32 %v1736_v55, 0.0 }
 0x3c8   :  { %v1909_v42 = vmax.f32 %v1747_v3, 0.0 }
 0x3c9   :  { %v1907_v26 = vmax.f32 %v1739_v21, 0.0 }
 0x3ca   :  { %v1957_v54 = vpack.c.bf16 %v1909_v42, %v1908_v53 }
 0x3cb   :  { %v1956_v48 = vpack.c.bf16 %v1907_v26, %v1906_v36 }
 0x3cd   :  { %5094 = vmatprep.mubr.bf16.mxu1 %v1956_v48 }
 0x3ce   :  { %5095 = vmatmul.mubr.bf16.gmra.mrb[92].mxu1 %v1957_v54 }
 0x3d3   :  { %v5020_v63 = vpop.f32.mrb[32].mxu1 }
 0x3d4   :  { %v1760_v57 = vadd.f32 %v5020_v63, %v7320_v43  ;;  %v1751_v9 = vpop.f32.mrb[33].mxu1 }
 0x3d5   :  { %v1752_v14 = vadd.f32 %v7320_v43, %v1751_v9  ;;  %v5021_v58 = vpop.f32.mrb[34].mxu1 }
 0x3d6   :  { %v1763_v20 = vadd.f32 %v5021_v58, %v7320_v43  ;;  %v1754_v33 = vpop.f32.mrb[35].mxu1  ;;  %v1912_v0 = vmax.f32 %v1760_v57, 0.0 }
 0x3d7   :  { %v1755_v46 = vadd.f32 %v7320_v43, %v1754_v33  ;;  %v1910_v27 = vmax.f32 %v1752_v14, 0.0 }
 0x3d8   :  { %v1913_v1 = vmax.f32 %v1763_v20, 0.0 }
 0x3d9   :  { %v1911_v34 = vmax.f32 %v1755_v46, 0.0 }
 0x3da   :  { %v1959_v55 = vpack.c.bf16 %v1913_v1, %v1912_v0 }
 0x3db   :  { %v1958_v45 = vpack.c.bf16 %v1911_v34, %v1910_v27 }
 0x3dd   :  { %5098 = vmatprep.mubr.bf16.mxu1 %v1958_v45 }
 0x3de   :  { %5099 = vmatmul.mubr.bf16.gmra.mrb[96].mxu1 %v1959_v55 }
 0x3e3   :  { %v5024_v3 = vpop.f32.mrb[36].mxu1 }
 0x3e4   :  { %v1776_v28 = vadd.f32 %v5024_v3, %v7320_v43  ;;  %v1767_v21 = vpop.f32.mrb[37].mxu1 }
 0x3e5   :  { %v1768_v53 = vadd.f32 %v7320_v43, %v1767_v21  ;;  %v5025_v42 = vpop.f32.mrb[38].mxu1 }
 0x3e6   :  { %v1779_v36 = vadd.f32 %v5025_v42, %v7320_v43  ;;  %v1770_v26 = vpop.f32.mrb[39].mxu1  ;;  %v1916_v48 = vmax.f32 %v1776_v28, 0.0 }
 0x3e7   :  { %v1771_v54 = vadd.f32 %v7320_v43, %v1770_v26  ;;  %v1914_v57 = vmax.f32 %v1768_v53, 0.0 }
 0x3e8   :  { %v1917_v63 = vmax.f32 %v1779_v36, 0.0 }
 0x3e9   :  { %v1915_v9 = vmax.f32 %v1771_v54, 0.0 }
 0x3ea   :  { %v1961_v14 = vpack.c.bf16 %v1917_v63, %v1916_v48 }
 0x3eb   :  { %v1960_v58 = vpack.c.bf16 %v1915_v9, %v1914_v57 }
 0x3ed   :  { %5102 = vmatprep.mubr.bf16.mxu1 %v1960_v58 }
 0x3ee   :  { %5103 = vmatmul.mubr.bf16.gmra.mrb[100].mxu1 %v1961_v14 }
 0x3f3   :  { %v5028_v20 = vpop.f32.mrb[40].mxu1 }
 0x3f4   :  { %v1792_v33 = vadd.f32 %v5028_v20, %v7320_v43  ;;  %v1783_v46 = vpop.f32.mrb[41].mxu1 }
 0x3f5   :  { %v1784_v0 = vadd.f32 %v7320_v43, %v1783_v46  ;;  %v5029_v1 = vpop.f32.mrb[42].mxu1 }
 0x3f6   :  { %v1795_v27 = vadd.f32 %v5029_v1, %v7320_v43  ;;  %v1786_v34 = vpop.f32.mrb[43].mxu1  ;;  %v1920_v45 = vmax.f32 %v1792_v33, 0.0 }
 0x3f7   :  { %v1787_v55 = vadd.f32 %v7320_v43, %v1786_v34  ;;  %v1918_v28 = vmax.f32 %v1784_v0, 0.0 }
 0x3f8   :  { %v1921_v3 = vmax.f32 %v1795_v27, 0.0 }
 0x3f9   :  { %v1919_v21 = vmax.f32 %v1787_v55, 0.0 }
 0x3fa   :  { %v1963_v53 = vpack.c.bf16 %v1921_v3, %v1920_v45 }
 0x3fb   :  { %v1962_v42 = vpack.c.bf16 %v1919_v21, %v1918_v28 }
 0x3fd   :  { %5106 = vmatprep.mubr.bf16.mxu1 %v1962_v42 }
 0x3fe   :  { %5107 = vmatmul.mubr.bf16.gmra.mrb[104].mxu1 %v1963_v53 }
 0x403   :  { %v5032_v36 = vpop.f32.mrb[44].mxu1 }
 0x404   :  { %v1808_v26 = vadd.f32 %v5032_v36, %v7320_v43  ;;  %v1799_v54 = vpop.f32.mrb[45].mxu1 }
 0x405   :  { %v1800_v48 = vadd.f32 %v7320_v43, %v1799_v54  ;;  %v5033_v63 = vpop.f32.mrb[46].mxu1 }
 0x406   :  { %v1811_v57 = vadd.f32 %v5033_v63, %v7320_v43  ;;  %v1802_v9 = vpop.f32.mrb[47].mxu1  ;;  %v1924_v58 = vmax.f32 %v1808_v26, 0.0 }
 0x407   :  { %v1803_v14 = vadd.f32 %v7320_v43, %v1802_v9  ;;  %v1922_v33 = vmax.f32 %v1800_v48, 0.0 }
 0x408   :  { %v1925_v20 = vmax.f32 %v1811_v57, 0.0 }
 0x409   :  { %v1923_v46 = vmax.f32 %v1803_v14, 0.0 }
 0x40a   :  { %v1965_v0 = vpack.c.bf16 %v1925_v20, %v1924_v58 }
 0x40b   :  { %v1964_v1 = vpack.c.bf16 %v1923_v46, %v1922_v33 }
 0x40d   :  { %5110 = vmatprep.mubr.bf16.mxu1 %v1964_v1 }
 0x40e   :  { %5111 = vmatmul.mubr.bf16.gmra.mrb[108].mxu1 %v1965_v0 }
 0x413   :  { %v5036_v27 = vpop.f32.mrb[48].mxu1 }
 0x414   :  { %v1824_v34 = vadd.f32 %v5036_v27, %v7320_v43  ;;  %v1815_v55 = vpop.f32.mrb[49].mxu1 }
 0x415   :  { %v1816_v45 = vadd.f32 %v7320_v43, %v1815_v55  ;;  %v5037_v3 = vpop.f32.mrb[50].mxu1 }
 0x416   :  { %v1827_v28 = vadd.f32 %v5037_v3, %v7320_v43  ;;  %v1818_v21 = vpop.f32.mrb[51].mxu1  ;;  %v1928_v42 = vmax.f32 %v1824_v34, 0.0 }
 0x417   :  { %v1819_v53 = vadd.f32 %v7320_v43, %v1818_v21  ;;  %v1926_v26 = vmax.f32 %v1816_v45, 0.0 }
 0x418   :  { %v1929_v36 = vmax.f32 %v1827_v28, 0.0 }
 0x419   :  { %v1927_v54 = vmax.f32 %v1819_v53, 0.0 }
 0x41a   :  { %v1967_v48 = vpack.c.bf16 %v1929_v36, %v1928_v42 }
 0x41b   :  { %v1966_v63 = vpack.c.bf16 %v1927_v54, %v1926_v26 }
 0x41d   :  { %5114 = vmatprep.mubr.bf16.mxu1 %v1966_v63 }
 0x41e   :  { %5115 = vmatmul.mubr.bf16.gmra.mrb[112].mxu1 %v1967_v48 }
 0x423   :  { %v5040_v57 = vpop.f32.mrb[52].mxu1 }
 0x424   :  { %v1840_v9 = vadd.f32 %v5040_v57, %v7320_v43  ;;  %v1831_v14 = vpop.f32.mrb[53].mxu1 }
 0x425   :  { %v1832_v58 = vadd.f32 %v7320_v43, %v1831_v14  ;;  %v5041_v20 = vpop.f32.mrb[54].mxu1 }
 0x426   :  { %v1843_v33 = vadd.f32 %v5041_v20, %v7320_v43  ;;  %v1834_v46 = vpop.f32.mrb[55].mxu1  ;;  %v1932_v1 = vmax.f32 %v1840_v9, 0.0 }
 0x427   :  { %v1835_v0 = vadd.f32 %v7320_v43, %v1834_v46  ;;  %v1930_v34 = vmax.f32 %v1832_v58, 0.0 }
 0x428   :  { %v1933_v27 = vmax.f32 %v1843_v33, 0.0 }
 0x429   :  { %v1931_v55 = vmax.f32 %v1835_v0, 0.0 }
 0x42a   :  { %v1969_v45 = vpack.c.bf16 %v1933_v27, %v1932_v1 }
 0x42b   :  { %v1968_v3 = vpack.c.bf16 %v1931_v55, %v1930_v34 }
 0x42d   :  { %5118 = vmatprep.mubr.bf16.mxu1 %v1968_v3 }
 0x42e   :  { %5119 = vmatmul.mubr.bf16.gmra.mrb[116].mxu1 %v1969_v45 }
 0x433   :  { %v5044_v28 = vpop.f32.mrb[56].mxu1 }
 0x434   :  { %v1856_v21 = vadd.f32 %v5044_v28, %v7320_v43  ;;  %v1847_v53 = vpop.f32.mrb[57].mxu1 }
 0x435   :  { %v1848_v42 = vadd.f32 %v7320_v43, %v1847_v53  ;;  %v5045_v36 = vpop.f32.mrb[58].mxu1 }
 0x436   :  { %v1859_v26 = vadd.f32 %v5045_v36, %v7320_v43  ;;  %v1850_v54 = vpop.f32.mrb[59].mxu1  ;;  %v1936_v63 = vmax.f32 %v1856_v21, 0.0  ;;  %v7408_v36 = vld [vmem:[%s9075_s6] ss:$0 sm:$0xff] }
 0x437   :  { %v1851_v48 = vadd.f32 %v7320_v43, %v1850_v54  ;;  %v1934_v9 = vmax.f32 %v1848_v42, 0.0 }
 0x438   :  { %v1937_v57 = vmax.f32 %v1859_v26, 0.0 }
 0x439   :  { %v1935_v14 = vmax.f32 %v1851_v48, 0.0 }
 0x43a   :  { %v1971_v58 = vpack.c.bf16 %v1937_v57, %v1936_v63 }
 0x43b   :  { %v1970_v20 = vpack.c.bf16 %v1935_v14, %v1934_v9 }
 0x43d   :  { %5122 = vmatprep.mubr.bf16.mxu1 %v1970_v20 }
 0x43e   :  { %5123 = vmatmul.mubr.bf16.gmra.mrb[120].mxu1 %v1971_v58  ;;  %v9527_v58 = vunpack.c.l.s8.bf16 %v6221_v12 }
 0x443   :  { %v5048_v33 = vpop.f32.mrb[60].mxu1 }
 0x444   :  { %v1872_v46 = vadd.f32 %v5048_v33, %v7320_v43  ;;  %v1863_v0 = vpop.f32.mrb[61].mxu1 }
 0x445   :  { %v1864_v1 = vadd.f32 %v7320_v43, %v1863_v0  ;;  %v5049_v27 = vpop.f32.mrb[62].mxu1 }
 0x446   :  { %v1875_v34 = vadd.f32 %v5049_v27, %v7320_v43  ;;  %v1866_v55 = vpop.f32.mrb[63].mxu1  ;;  %v1940_v3 = vmax.f32 %v1872_v46, 0.0 }
 0x447   :  { %v1867_v45 = vadd.f32 %v7320_v43, %v1866_v55  ;;  %v1938_v21 = vmax.f32 %v1864_v1, 0.0 }
 0x448   :  { %v1941_v28 = vmax.f32 %v1875_v34, 0.0 }
 0x449   :  { %v1939_v53 = vmax.f32 %v1867_v45, 0.0 }
 0x44a   :  { %v1973_v42 = vpack.c.bf16 %v1941_v28, %v1940_v3 }
 0x44b   :  { %v1972_v26 = vpack.c.bf16 %v1939_v53, %v1938_v21  ;;  %v5068_v54 = vpop.f32.mrb[64].mxu1 }
 0x44c   :  { %v2079_v48 = vpop.f32.mrb[65].mxu1  ;;  %v7422_v20 = vadd.f32 %v5068_v54, %v7408_v36 }
 0x44d   :  { %v7411_v63 = vadd.f32 %v7408_v36, %v2079_v48  ;;  %v5069_v57 = vpop.f32.mrb[66].mxu1  ;;  %5126 = vmatprep.mubr.bf16.mxu1 %v1972_v26 }
 0x44e   :  { %v2082_v9 = vpop.f32.mrb[67].mxu1  ;;  %5127 = vmatmul.mubr.bf16.gmra.mrb[124].mxu1 %v1973_v42  ;;  %v7414_v43 = vadd.f32 %v5069_v57, %v7408_v36  ;;  %v9330_v55 = vmax.f32 %v7422_v20, 0.0 }
 0x44f   :  { %v7417_v14 = vadd.f32 %v7408_v36, %v2082_v9  ;;  %2462 = vmatprep.mubr.bf16.mxu1 %v9527_v58  ;;  %v9334_v33 = vmax.f32 %v7411_v63, 0.0 }
 0x450   :  { %v9327_v0 = vmax.f32 %v7414_v43, 0.0 }
 0x451   :  { %v9333_v46 = vmax.f32 %v7417_v14, 0.0 }
 0x452   :  { %v2399_v21 = vpack.c.bf16 %v9327_v0, %v9330_v55 }
 0x453   :  { %v2398_v1 = vpack.c.bf16 %v9333_v46, %v9334_v33  ;;  %v5072_v27 = vpop.f32.mrb[68].mxu1 }
 0x454   :  { %v2095_v34 = vpop.f32.mrb[69].mxu1  ;;  %v7447_v26 = vadd.f32 %v5072_v27, %v7408_v36 }
 0x455   :  { %v7433_v45 = vadd.f32 %v7408_v36, %v2095_v34  ;;  %v5073_v3 = vpop.f32.mrb[70].mxu1  ;;  %2431 = vmatpush1.bf16.msra.mxu1 %v2398_v1 }
 0x456   :  { %v2098_v28 = vpop.f32.mrb[71].mxu1  ;;  %2432 = vmatprep.subr.bf16.mxu1 %v9496_v52  ;;  %v7441_v53 = vadd.f32 %v5073_v3, %v7408_v36  ;;  %v9332_v34 = vmax.f32 %v7447_v26, 0.0 }
 0x457   :  { %v7444_v42 = vadd.f32 %v7408_v36, %v2098_v28  ;;  %v9329_v54 = vmax.f32 %v7433_v45, 0.0 }
 0x458   :  { %v9331_v57 = vmax.f32 %v7441_v53, 0.0 }
 0x459   :  { %v9328_v48 = vmax.f32 %v7444_v42, 0.0  ;;  %2433 = vmatpush1.bf16.msra.mxu1 %v2399_v21 }
 0x45a   :  { %2434 = vmatprep.subr.bf16.mxu1 %v9496_v52  ;;  %v2401_v21 = vpack.c.bf16 %v9331_v57, %v9332_v34 }
 0x45b   :  { %v2400_v9 = vpack.c.bf16 %v9328_v48, %v9329_v54  ;;  %v5076_v58 = vpop.f32.mrb[72].mxu1 }
 0x45c   :  { %v2111_v1 = vpop.f32.mrb[73].mxu1  ;;  %v7473_v54 = vadd.f32 %v5076_v58, %v7408_v36 }
 0x45d   :  { %v7459_v27 = vadd.f32 %v7408_v36, %v2111_v1  ;;  %v5077_v3 = vpop.f32.mrb[74].mxu1  ;;  %2435 = vmatpush1.bf16.msra.mxu1 %v2400_v9 }
 0x45e   :  { %v2114_v28 = vpop.f32.mrb[75].mxu1  ;;  %2436 = vmatprep.subr.bf16.mxu1 %v9496_v52  ;;  %v7467_v0 = vadd.f32 %v5077_v3, %v7408_v36  ;;  %v9340_v34 = vmax.f32 %v7473_v54, 0.0 }
 0x45f   :  { %v7470_v48 = vadd.f32 %v7408_v36, %v2114_v28  ;;  %v9337_v1 = vmax.f32 %v7459_v27, 0.0 }
 0x460   :  { %v9339_v55 = vmax.f32 %v7467_v0, 0.0 }
 0x461   :  { %v9336_v9 = vmax.f32 %v7470_v48, 0.0  ;;  %2437 = vmatpush1.bf16.msra.mxu1 %v2401_v21 }
 0x462   :  { %2438 = vmatprep.subr.bf16.mxu1 %v9496_v52  ;;  %v2403_v21 = vpack.c.bf16 %v9339_v55, %v9340_v34 }
 0x463   :  { %v2402_v3 = vpack.c.bf16 %v9336_v9, %v9337_v1  ;;  %v5080_v57 = vpop.f32.mrb[76].mxu1 }
 0x464   :  { %v2127_v28 = vpop.f32.mrb[77].mxu1  ;;  %v7499_v1 = vadd.f32 %v5080_v57, %v7408_v36 }
 0x465   :  { %v7485_v58 = vadd.f32 %v7408_v36, %v2127_v28  ;;  %v5081_v46 = vpop.f32.mrb[78].mxu1  ;;  %2439 = vmatpush1.bf16.msra.mxu1 %v2402_v3 }
 0x466   :  { %v2130_v33 = vpop.f32.mrb[79].mxu1  ;;  %2440 = vmatprep.subr.bf16.mxu1 %v9496_v52  ;;  %v7493_v10 = vadd.f32 %v5081_v46, %v7408_v36  ;;  %9530 = vst [vmem:[#allocation109_spill] sm:$0xff] %v7499_v1 }
 0x467   :  { %v7496_v9 = vadd.f32 %v7408_v36, %v2130_v33  ;;  %v9343_v28 = vmax.f32 %v7485_v58, 0.0  ;;  %v9346_v33 = vmax.f32 %v7499_v1, 0.0 }
 0x468   :  { %9528 = vst [vmem:[#allocation107_spill] sm:$0xff] %v7493_v10  ;;  %v9345_v37 = vmax.f32 %v7493_v10, 0.0 }
 0x469   :  { %9529 = vst [vmem:[#allocation108_spill] sm:$0xff] %v7496_v9  ;;  %v9342_v3 = vmax.f32 %v7496_v9, 0.0  ;;  %2441 = vmatpush1.bf16.msra.mxu1 %v2403_v21 }
 0x46a   :  { %2442 = vmatprep.subr.bf16.mxu1 %v9496_v52  ;;  %v2405_v57 = vpack.c.bf16 %v9345_v37, %v9346_v33 }
 0x46b   :  { %v2404_v46 = vpack.c.bf16 %v9342_v3, %v9343_v28 }
 0x46d   :  { %2443 = vmatpush1.bf16.msra.mxu1 %v2404_v46 }
 0x46e   :  { %2444 = vmatprep.subr.bf16.mxu1 %v9496_v52 }
 0x471   :  { %v5084_v21 = vpop.f32.mrb[80].mxu1  ;;  %2445 = vmatpush1.bf16.msra.mxu1 %v2405_v57 }
 0x472   :  { %v2143_v55 = vpop.f32.mrb[81].mxu1  ;;  %2446 = vmatprep.subr.bf16.mxu1 %v9496_v52  ;;  %v7526_v1 = vadd.f32 %v5084_v21, %v7408_v36 }
 0x473   :  { %v7517_v34 = vadd.f32 %v7408_v36, %v2143_v55  ;;  %v5085_v9 = vpop.f32.mrb[82].mxu1 }
 0x474   :  { %v2146_v3 = vpop.f32.mrb[83].mxu1  ;;  %v7520_v28 = vadd.f32 %v5085_v9, %v7408_v36  ;;  %9534 = vst [vmem:[#allocation113_spill] sm:$0xff] %v7526_v1  ;;  %v9354_v9 = vmax.f32 %v7526_v1, 0.0 }
 0x475   :  { %9531 = vst [vmem:[#allocation110_spill] sm:$0xff] %v7517_v34  ;;  %v7523_v46 = vadd.f32 %v7408_v36, %v2146_v3  ;;  %v9351_v37 = vmax.f32 %v7517_v34, 0.0 }
 0x476   :  { %9532 = vst [vmem:[#allocation111_spill] sm:$0xff] %v7520_v28  ;;  %v9353_v33 = vmax.f32 %v7520_v28, 0.0 }
 0x477   :  { %9533 = vst [vmem:[#allocation112_spill] sm:$0xff] %v7523_v46  ;;  %v9350_v57 = vmax.f32 %v7523_v46, 0.0 }
 0x478   :  { %v2407_v3 = vpack.c.bf16 %v9353_v33, %v9354_v9 }
 0x479   :  { %v2406_v55 = vpack.c.bf16 %v9350_v57, %v9351_v37 }
 0x47b   :  { %2447 = vmatpush1.bf16.msra.mxu1 %v2406_v55 }
 0x47c   :  { %2448 = vmatprep.subr.bf16.mxu1 %v9496_v52 }
 0x47f   :  { %2449 = vmatpush1.bf16.msra.mxu1 %v2407_v3 }
 0x480   :  { %2450 = vmatprep.subr.bf16.mxu1 %v9496_v52 }
 0x481   :  { %v5088_v21 = vpop.f32.mrb[84].mxu1 }
 0x482   :  { %v2159_v10 = vpop.f32.mrb[85].mxu1  ;;  %v7552_v1 = vadd.f32 %v5088_v21, %v7408_v36 }
 0x483   :  { %v7543_v34 = vadd.f32 %v7408_v36, %v2159_v10  ;;  %v5089_v46 = vpop.f32.mrb[86].mxu1 }
 0x484   :  { %v2162_v57 = vpop.f32.mrb[87].mxu1  ;;  %v7546_v37 = vadd.f32 %v5089_v46, %v7408_v36  ;;  %9538 = vst [vmem:[#allocation117_spill] sm:$0xff] %v7552_v1  ;;  %v9362_v46 = vmax.f32 %v7552_v1, 0.0 }
 0x485   :  { %9535 = vst [vmem:[#allocation114_spill] sm:$0xff] %v7543_v34  ;;  %v7549_v55 = vadd.f32 %v7408_v36, %v2162_v57  ;;  %v9359_v3 = vmax.f32 %v7543_v34, 0.0 }
 0x486   :  { %9536 = vst [vmem:[#allocation115_spill] sm:$0xff] %v7546_v37  ;;  %v9361_v9 = vmax.f32 %v7546_v37, 0.0 }
 0x487   :  { %9537 = vst [vmem:[#allocation116_spill] sm:$0xff] %v7549_v55  ;;  %v9358_v33 = vmax.f32 %v7549_v55, 0.0 }
 0x488   :  { %v2409_v57 = vpack.c.bf16 %v9361_v9, %v9362_v46 }
 0x489   :  { %v2408_v10 = vpack.c.bf16 %v9358_v33, %v9359_v3 }
 0x48b   :  { %2451 = vmatpush1.bf16.msra.mxu1 %v2408_v10 }
 0x48c   :  { %2452 = vmatprep.subr.bf16.mxu1 %v9496_v52 }
 0x48f   :  { %2453 = vmatpush1.bf16.msra.mxu1 %v2409_v57 }
 0x490   :  { %2454 = vmatprep.subr.bf16.mxu1 %v9496_v52 }
 0x491   :  { %v5092_v21 = vpop.f32.mrb[88].mxu1 }
 0x492   :  { %v2175_v28 = vpop.f32.mrb[89].mxu1  ;;  %v7578_v1 = vadd.f32 %v5092_v21, %v7408_v36 }
 0x493   :  { %v7569_v34 = vadd.f32 %v7408_v36, %v2175_v28  ;;  %v5093_v55 = vpop.f32.mrb[90].mxu1 }
 0x494   :  { %v2178_v33 = vpop.f32.mrb[91].mxu1  ;;  %v7572_v3 = vadd.f32 %v5093_v55, %v7408_v36  ;;  %9542 = vst [vmem:[#allocation121_spill] sm:$0xff] %v7578_v1  ;;  %v9370_v55 = vmax.f32 %v7578_v1, 0.0 }
 0x495   :  { %9539 = vst [vmem:[#allocation118_spill] sm:$0xff] %v7569_v34  ;;  %v7575_v10 = vadd.f32 %v7408_v36, %v2178_v33  ;;  %v9367_v57 = vmax.f32 %v7569_v34, 0.0 }
 0x496   :  { %9540 = vst [vmem:[#allocation119_spill] sm:$0xff] %v7572_v3  ;;  %v9369_v46 = vmax.f32 %v7572_v3, 0.0 }
 0x497   :  { %9541 = vst [vmem:[#allocation120_spill] sm:$0xff] %v7575_v10  ;;  %v9366_v9 = vmax.f32 %v7575_v10, 0.0 }
 0x498   :  { %v2411_v33 = vpack.c.bf16 %v9369_v46, %v9370_v55 }
 0x499   :  { %v2410_v28 = vpack.c.bf16 %v9366_v9, %v9367_v57 }
 0x49b   :  { %2455 = vmatpush1.bf16.msra.mxu1 %v2410_v28 }
 0x49c   :  { %2456 = vmatprep.subr.bf16.mxu1 %v9496_v52 }
 0x49f   :  { %2457 = vmatpush1.bf16.msra.mxu1 %v2411_v33 }
 0x4a0   :  { %2458 = vmatprep.subr.bf16.mxu1 %v9496_v52 }
 0x4a1   :  { %v5096_v21 = vpop.f32.mrb[92].mxu1 }
 0x4a2   :  { %v2191_v37 = vpop.f32.mrb[93].mxu1  ;;  %v7604_v1 = vadd.f32 %v5096_v21, %v7408_v36 }
 0x4a3   :  { %v7595_v34 = vadd.f32 %v7408_v36, %v2191_v37  ;;  %v5097_v10 = vpop.f32.mrb[94].mxu1 }
 0x4a4   :  { %v2194_v9 = vpop.f32.mrb[95].mxu1  ;;  %v7598_v57 = vadd.f32 %v5097_v10, %v7408_v36  ;;  %9545 = vst [vmem:[#allocation124_spill] sm:$0xff] %v7604_v1  ;;  %v9378_v10 = vmax.f32 %v7604_v1, 0.0 }
 0x4a5   :  { %9543 = vst [vmem:[#allocation122_spill] sm:$0xff] %v7595_v34  ;;  %v7601_v28 = vadd.f32 %v7408_v36, %v2194_v9  ;;  %v9374_v33 = vmax.f32 %v7595_v34, 0.0  ;;  %v9546_v34 = vunpack.c.l.s8.bf16 %v6241_v51 }
 0x4a6   :  { %v9377_v55 = vmax.f32 %v7598_v57, 0.0 }
 0x4a7   :  { %9544 = vst [vmem:[#allocation123_spill] sm:$0xff] %v7601_v28  ;;  %v9373_v46 = vmax.f32 %v7601_v28, 0.0 }
 0x4a8   :  { %v2413_v9 = vpack.c.bf16 %v9377_v55, %v9378_v10 }
 0x4a9   :  { %v2412_v37 = vpack.c.bf16 %v9373_v46, %v9374_v33 }
 0x4ab   :  { %2459 = vmatpush1.bf16.msra.mxu1 %v2412_v37  ;;  %v9547_v37 = vunpack.c.h.s8.bf16 %v6221_v12 }
 0x4ac   :  { %2460 = vmatprep.subr.bf16.mxu1 %v9496_v52 }
 0x4af   :  { %2461 = vmatpush1.bf16.msra.mxu1 %v2413_v9 }
 0x4b0   :  { %2719 = vmatprep.subr.bf16.mxu1 %v9496_v52 }
 0x4b1   :  { %v5100_v21 = vpop.f32.mrb[96].mxu1 }
 0x4b2   :  { %v2207_v3 = vpop.f32.mrb[97].mxu1  ;;  %2463 = vmatmul.mubr.bf16.vlgmr.msra.gmra.mrb[128].mxu1 %v9546_v34  ;;  %v7634_v55 = vadd.f32 %v5100_v21, %v7408_v36  ;;  %v9551_v21 = vunpack.c.l.s8.bf16 %v6254_v60 }
 0x4b3   :  { %v7623_v46 = vadd.f32 %v7408_v36, %v2207_v3  ;;  %v5101_v33 = vpop.f32.mrb[98].mxu1  ;;  %2470 = vmatprep.mubr.bf16.mxu1 %v9547_v37 }
 0x4b4   :  { %v2210_v28 = vpop.f32.mrb[99].mxu1  ;;  %v7628_v1 = vadd.f32 %v5101_v33, %v7408_v36  ;;  %9549 = vst [vmem:[#allocation126_spill] sm:$0xff] %v7634_v55  ;;  %v9550_v33 = vunpack.c.h.s8.bf16 %v6241_v51  ;;  %v9552_v51 = vunpack.c.l.s8.bf16 %v6267_v5 }
 0x4b5   :  { %v7631_v9 = vadd.f32 %v7408_v36, %v2210_v28  ;;  %v9380_v10 = vmax.f32 %v7623_v46, 0.0  ;;  %v9384_v28 = vmax.f32 %v7634_v55, 0.0 }
 0x4b6   :  { %v9383_v3 = vmax.f32 %v7628_v1, 0.0 }
 0x4b7   :  { %9548 = vst [vmem:[#allocation125_spill] sm:$0xff] %v7631_v9  ;;  %v9379_v34 = vmax.f32 %v7631_v9, 0.0 }
 0x4b8   :  { %v2415_v37 = vpack.c.bf16 %v9383_v3, %v9384_v28 }
 0x4b9   :  { %v2414_v12 = vpack.c.bf16 %v9379_v34, %v9380_v10 }
 0x4ba   :  { %2471 = vmatmul.mubr.bf16.gmra.mrb[132].mxu1 %v9550_v33 }
 0x4bb   :  { %2720 = vmatpush1.bf16.msra.mxu1 %v2414_v12  ;;  %2478 = vmatprep.mubr.bf16.mxu1 %v9551_v21  ;;  %v9553_v21 = vunpack.c.h.s8.bf16 %v6254_v60 }
 0x4bc   :  { %2721 = vmatprep.subr.bf16.mxu1 %v9496_v52 }
 0x4bf   :  { %2722 = vmatpush1.bf16.msra.mxu1 %v2415_v37 }
 0x4c0   :  { %2723 = vmatprep.subr.bf16.mxu1 %v9496_v52 }
 0x4c1   :  { %v5104_v34 = vpop.f32.mrb[100].mxu1 }
 0x4c2   :  { %v2223_v10 = vpop.f32.mrb[101].mxu1  ;;  %2479 = vmatmul.mubr.bf16.gmra.mrb[136].mxu1 %v9552_v51  ;;  %v7668_v3 = vadd.f32 %v5104_v34, %v7408_v36  ;;  %v9557_v34 = vunpack.c.l.s8.bf16 %v6280_v17 }
 0x4c3   :  { %v7657_v12 = vadd.f32 %v7408_v36, %v2223_v10  ;;  %v5105_v33 = vpop.f32.mrb[102].mxu1  ;;  %2486 = vmatprep.mubr.bf16.mxu1 %v9553_v21 }
 0x4c4   :  { %v2226_v9 = vpop.f32.mrb[103].mxu1  ;;  %v7662_v55 = vadd.f32 %v5105_v33, %v7408_v36  ;;  %9555 = vst [vmem:[#allocation128_spill] sm:$0xff] %v7668_v3  ;;  %v9556_v33 = vunpack.c.h.s8.bf16 %v6267_v5  ;;  %v9558_v5 = vunpack.c.l.s8.bf16 %v6293_v25 }
 0x4c5   :  { %v7665_v37 = vadd.f32 %v7408_v36, %v2226_v9  ;;  %v9386_v28 = vmax.f32 %v7657_v12, 0.0  ;;  %v9390_v9 = vmax.f32 %v7668_v3, 0.0 }
 0x4c6   :  { %v9389_v10 = vmax.f32 %v7662_v55, 0.0 }
 0x4c7   :  { %9554 = vst [vmem:[#allocation127_spill] sm:$0xff] %v7665_v37  ;;  %v9385_v51 = vmax.f32 %v7665_v37, 0.0 }
 0x4c8   :  { %v2417_v21 = vpack.c.bf16 %v9389_v10, %v9390_v9 }
 0x4c9   :  { %v2416_v60 = vpack.c.bf16 %v9385_v51, %v9386_v28 }
 0x4ca   :  { %2487 = vmatmul.mubr.bf16.gmra.mrb[140].mxu1 %v9556_v33 }
 0x4cb   :  { %2724 = vmatpush1.bf16.msra.mxu1 %v2416_v60  ;;  %2494 = vmatprep.mubr.bf16.mxu1 %v9557_v34  ;;  %v9559_v34 = vunpack.c.h.s8.bf16 %v6280_v17 }
 0x4cc   :  { %2725 = vmatprep.subr.bf16.mxu1 %v9496_v52 }
 0x4cf   :  { %2726 = vmatpush1.bf16.msra.mxu1 %v2417_v21 }
 0x4d0   :  { %2727 = vmatprep.subr.bf16.mxu1 %v9496_v52 }
 0x4d1   :  { %v5108_v51 = vpop.f32.mrb[104].mxu1 }
 0x4d2   :  { %v2239_v28 = vpop.f32.mrb[105].mxu1  ;;  %2495 = vmatmul.mubr.bf16.gmra.mrb[144].mxu1 %v9558_v5  ;;  %v7702_v10 = vadd.f32 %v5108_v51, %v7408_v36  ;;  %v9563_v51 = vunpack.c.l.s8.bf16 %v6306_v32 }
 0x4d3   :  { %v7691_v60 = vadd.f32 %v7408_v36, %v2239_v28  ;;  %v5109_v33 = vpop.f32.mrb[106].mxu1  ;;  %2502 = vmatprep.mubr.bf16.mxu1 %v9559_v34 }
 0x4d4   :  { %v2242_v37 = vpop.f32.mrb[107].mxu1  ;;  %v7696_v3 = vadd.f32 %v5109_v33, %v7408_v36  ;;  %9561 = vst [vmem:[#allocation130_spill] sm:$0xff] %v7702_v10  ;;  %v9562_v33 = vunpack.c.h.s8.bf16 %v6293_v25  ;;  %v9564_v25 = vunpack.c.l.s8.bf16 %v6318_v35 }
 0x4d5   :  { %v7699_v21 = vadd.f32 %v7408_v36, %v2242_v37  ;;  %v9392_v9 = vmax.f32 %v7691_v60, 0.0  ;;  %v9396_v37 = vmax.f32 %v7702_v10, 0.0 }
 0x4d6   :  { %v9395_v28 = vmax.f32 %v7696_v3, 0.0 }
 0x4d7   :  { %9560 = vst [vmem:[#allocation129_spill] sm:$0xff] %v7699_v21  ;;  %v9391_v5 = vmax.f32 %v7699_v21, 0.0 }
 0x4d8   :  { %v2419_v34 = vpack.c.bf16 %v9395_v28, %v9396_v37 }
 0x4d9   :  { %v2418_v17 = vpack.c.bf16 %v9391_v5, %v9392_v9 }
 0x4da   :  { %2503 = vmatmul.mubr.bf16.gmra.mrb[148].mxu1 %v9562_v33 }
 0x4db   :  { %2728 = vmatpush1.bf16.msra.mxu1 %v2418_v17  ;;  %2510 = vmatprep.mubr.bf16.mxu1 %v9563_v51  ;;  %v9565_v51 = vunpack.c.h.s8.bf16 %v6306_v32 }
 0x4dc   :  { %2729 = vmatprep.subr.bf16.mxu1 %v9496_v52 }
 0x4df   :  { %2730 = vmatpush1.bf16.msra.mxu1 %v2419_v34 }
 0x4e0   :  { %2731 = vmatprep.subr.bf16.mxu1 %v9496_v52 }
 0x4e1   :  { %v5112_v5 = vpop.f32.mrb[108].mxu1 }
 0x4e2   :  { %v2255_v9 = vpop.f32.mrb[109].mxu1  ;;  %2511 = vmatmul.mubr.bf16.gmra.mrb[152].mxu1 %v9564_v25  ;;  %v7736_v28 = vadd.f32 %v5112_v5, %v7408_v36  ;;  %v9569_v5 = vunpack.c.l.s8.bf16 %v6329_v41 }
 0x4e3   :  { %v7725_v17 = vadd.f32 %v7408_v36, %v2255_v9  ;;  %v5113_v33 = vpop.f32.mrb[110].mxu1  ;;  %2518 = vmatprep.mubr.bf16.mxu1 %v9565_v51 }
 0x4e4   :  { %v2258_v21 = vpop.f32.mrb[111].mxu1  ;;  %v7730_v10 = vadd.f32 %v5113_v33, %v7408_v36  ;;  %9567 = vst [vmem:[#allocation132_spill] sm:$0xff] %v7736_v28  ;;  %v9568_v33 = vunpack.c.h.s8.bf16 %v6318_v35  ;;  %v9570_v35 = vunpack.c.l.s8.bf16 %v6341_v44 }
 0x4e5   :  { %v7733_v34 = vadd.f32 %v7408_v36, %v2258_v21  ;;  %v9398_v37 = vmax.f32 %v7725_v17, 0.0  ;;  %v9402_v21 = vmax.f32 %v7736_v28, 0.0 }
 0x4e6   :  { %v9401_v9 = vmax.f32 %v7730_v10, 0.0 }
 0x4e7   :  { %9566 = vst [vmem:[#allocation131_spill] sm:$0xff] %v7733_v34  ;;  %v9397_v25 = vmax.f32 %v7733_v34, 0.0 }
 0x4e8   :  { %v2421_v51 = vpack.c.bf16 %v9401_v9, %v9402_v21 }
 0x4e9   :  { %v2420_v32 = vpack.c.bf16 %v9397_v25, %v9398_v37 }
 0x4ea   :  { %2519 = vmatmul.mubr.bf16.gmra.mrb[156].mxu1 %v9568_v33 }
 0x4eb   :  { %2732 = vmatpush1.bf16.msra.mxu1 %v2420_v32  ;;  %2526 = vmatprep.mubr.bf16.mxu1 %v9569_v5  ;;  %v9571_v5 = vunpack.c.h.s8.bf16 %v6329_v41 }
 0x4ec   :  { %2733 = vmatprep.subr.bf16.mxu1 %v9496_v52 }
 0x4ef   :  { %2734 = vmatpush1.bf16.msra.mxu1 %v2421_v51 }
 0x4f0   :  { %2735 = vmatprep.subr.bf16.mxu1 %v9496_v52 }
 0x4f1   :  { %v5116_v25 = vpop.f32.mrb[112].mxu1 }
 0x4f2   :  { %v2271_v37 = vpop.f32.mrb[113].mxu1  ;;  %2527 = vmatmul.mubr.bf16.gmra.mrb[160].mxu1 %v9570_v35  ;;  %v7770_v9 = vadd.f32 %v5116_v25, %v7408_v36  ;;  %v9575_v25 = vunpack.c.l.s8.bf16 %v6352_v50 }
 0x4f3   :  { %v7759_v32 = vadd.f32 %v7408_v36, %v2271_v37  ;;  %v5117_v33 = vpop.f32.mrb[114].mxu1  ;;  %2534 = vmatprep.mubr.bf16.mxu1 %v9571_v5 }
 0x4f4   :  { %v2274_v34 = vpop.f32.mrb[115].mxu1  ;;  %v7764_v28 = vadd.f32 %v5117_v33, %v7408_v36  ;;  %9573 = vst [vmem:[#allocation134_spill] sm:$0xff] %v7770_v9  ;;  %v9574_v33 = vunpack.c.h.s8.bf16 %v6341_v44  ;;  %v9576_v44 = vunpack.c.l.s8.bf16 %v6364_v56 }
 0x4f5   :  { %v7767_v51 = vadd.f32 %v7408_v36, %v2274_v34  ;;  %v9404_v21 = vmax.f32 %v7759_v32, 0.0  ;;  %v9408_v34 = vmax.f32 %v7770_v9, 0.0 }
 0x4f6   :  { %v9407_v37 = vmax.f32 %v7764_v28, 0.0 }
 0x4f7   :  { %9572 = vst [vmem:[#allocation133_spill] sm:$0xff] %v7767_v51  ;;  %v9403_v35 = vmax.f32 %v7767_v51, 0.0 }
 0x4f8   :  { %v2423_v5 = vpack.c.bf16 %v9407_v37, %v9408_v34 }
 0x4f9   :  { %v2422_v41 = vpack.c.bf16 %v9403_v35, %v9404_v21 }
 0x4fa   :  { %2535 = vmatmul.mubr.bf16.gmra.mrb[164].mxu1 %v9574_v33 }
 0x4fb   :  { %2736 = vmatpush1.bf16.msra.mxu1 %v2422_v41  ;;  %2542 = vmatprep.mubr.bf16.mxu1 %v9575_v25  ;;  %v9577_v25 = vunpack.c.h.s8.bf16 %v6352_v50 }
 0x4fc   :  { %2737 = vmatprep.subr.bf16.mxu1 %v9496_v52 }
 0x4ff   :  { %2738 = vmatpush1.bf16.msra.mxu1 %v2423_v5 }
 0x500   :  { %2739 = vmatprep.subr.bf16.mxu1 %v9496_v52 }
 0x501   :  { %v5120_v35 = vpop.f32.mrb[116].mxu1 }
 0x502   :  { %v2287_v21 = vpop.f32.mrb[117].mxu1  ;;  %2543 = vmatmul.mubr.bf16.gmra.mrb[168].mxu1 %v9576_v44  ;;  %v7804_v37 = vadd.f32 %v5120_v35, %v7408_v36  ;;  %v9581_v35 = vunpack.c.l.s8.bf16 %v6375_v2 }
 0x503   :  { %v7793_v41 = vadd.f32 %v7408_v36, %v2287_v21  ;;  %v5121_v33 = vpop.f32.mrb[118].mxu1  ;;  %2550 = vmatprep.mubr.bf16.mxu1 %v9577_v25 }
 0x504   :  { %v2290_v51 = vpop.f32.mrb[119].mxu1  ;;  %v7798_v9 = vadd.f32 %v5121_v33, %v7408_v36  ;;  %9579 = vst [vmem:[#allocation136_spill] sm:$0xff] %v7804_v37  ;;  %v9580_v33 = vunpack.c.h.s8.bf16 %v6364_v56  ;;  %v9582_v56 = vunpack.c.l.s8.bf16 %v6387_v6 }
 0x505   :  { %v7801_v5 = vadd.f32 %v7408_v36, %v2290_v51  ;;  %v9410_v34 = vmax.f32 %v7793_v41, 0.0  ;;  %v9414_v51 = vmax.f32 %v7804_v37, 0.0 }
 0x506   :  { %v9413_v21 = vmax.f32 %v7798_v9, 0.0 }
 0x507   :  { %9578 = vst [vmem:[#allocation135_spill] sm:$0xff] %v7801_v5  ;;  %v9409_v44 = vmax.f32 %v7801_v5, 0.0 }
 0x508   :  { %v2425_v25 = vpack.c.bf16 %v9413_v21, %v9414_v51 }
 0x509   :  { %v2424_v50 = vpack.c.bf16 %v9409_v44, %v9410_v34 }
 0x50a   :  { %2551 = vmatmul.mubr.bf16.gmra.mrb[172].mxu1 %v9580_v33 }
 0x50b   :  { %2740 = vmatpush1.bf16.msra.mxu1 %v2424_v50  ;;  %2558 = vmatprep.mubr.bf16.mxu1 %v9581_v35  ;;  %v9583_v35 = vunpack.c.h.s8.bf16 %v6375_v2 }
 0x50c   :  { %2741 = vmatprep.subr.bf16.mxu1 %v9496_v52 }
 0x50f   :  { %2742 = vmatpush1.bf16.msra.mxu1 %v2425_v25 }
 0x510   :  { %2743 = vmatprep.subr.bf16.mxu1 %v9496_v52 }
 0x511   :  { %v5124_v44 = vpop.f32.mrb[120].mxu1 }
 0x512   :  { %v2303_v34 = vpop.f32.mrb[121].mxu1  ;;  %2559 = vmatmul.mubr.bf16.gmra.mrb[176].mxu1 %v9582_v56  ;;  %v7838_v21 = vadd.f32 %v5124_v44, %v7408_v36  ;;  %v9587_v44 = vunpack.c.l.s8.bf16 %v6398_v16 }
 0x513   :  { %v7827_v50 = vadd.f32 %v7408_v36, %v2303_v34  ;;  %v5125_v33 = vpop.f32.mrb[122].mxu1  ;;  %2566 = vmatprep.mubr.bf16.mxu1 %v9583_v35 }
 0x514   :  { %v2306_v5 = vpop.f32.mrb[123].mxu1  ;;  %v7832_v37 = vadd.f32 %v5125_v33, %v7408_v36  ;;  %9585 = vst [vmem:[#allocation138_spill] sm:$0xff] %v7838_v21  ;;  %v9586_v33 = vunpack.c.h.s8.bf16 %v6387_v6  ;;  %v9588_v6 = vunpack.c.l.s8.bf16 %v6410_v22 }
 0x515   :  { %v7835_v25 = vadd.f32 %v7408_v36, %v2306_v5  ;;  %v9416_v51 = vmax.f32 %v7827_v50, 0.0  ;;  %v9420_v5 = vmax.f32 %v7838_v21, 0.0 }
 0x516   :  { %v9419_v34 = vmax.f32 %v7832_v37, 0.0 }
 0x517   :  { %9584 = vst [vmem:[#allocation137_spill] sm:$0xff] %v7835_v25  ;;  %v9415_v56 = vmax.f32 %v7835_v25, 0.0 }
 0x518   :  { %v2427_v35 = vpack.c.bf16 %v9419_v34, %v9420_v5 }
 0x519   :  { %v2426_v2 = vpack.c.bf16 %v9415_v56, %v9416_v51 }
 0x51a   :  { %2567 = vmatmul.mubr.bf16.gmra.mrb[180].mxu1 %v9586_v33 }
 0x51b   :  { %2744 = vmatpush1.bf16.msra.mxu1 %v2426_v2  ;;  %2574 = vmatprep.mubr.bf16.mxu1 %v9587_v44  ;;  %v9589_v44 = vunpack.c.h.s8.bf16 %v6398_v16 }
 0x51c   :  { %2745 = vmatprep.subr.bf16.mxu1 %v9496_v52 }
 0x51f   :  { %2746 = vmatpush1.bf16.msra.mxu1 %v2427_v35 }
 0x520   :  { %2747 = vmatprep.subr.bf16.mxu1 %v9496_v52 }
 0x521   :  { %v5128_v56 = vpop.f32.mrb[124].mxu1 }
 0x522   :  { %v2319_v51 = vpop.f32.mrb[125].mxu1  ;;  %2575 = vmatmul.mubr.bf16.gmra.mrb[184].mxu1 %v9588_v6  ;;  %v7872_v34 = vadd.f32 %v5128_v56, %v7408_v36 }
 0x523   :  { %v7861_v2 = vadd.f32 %v7408_v36, %v2319_v51  ;;  %v5129_v33 = vpop.f32.mrb[126].mxu1  ;;  %2582 = vmatprep.mubr.bf16.mxu1 %v9589_v44  ;;  %v9592_v44 = vunpack.c.l.s8.bf16 %v6445_v13 }
 0x524   :  { %v2322_v25 = vpop.f32.mrb[127].mxu1  ;;  %v7866_v21 = vadd.f32 %v5129_v33, %v7408_v36  ;;  %v9590_v33 = vunpack.c.h.s8.bf16 %v6410_v22  ;;  %v9593_v22 = vunpack.c.h.s8.bf16 %v6427_v39 }
 0x525   :  { %v7869_v35 = vadd.f32 %v7408_v36, %v2322_v25  ;;  %v2394_v5 = vmax.f32 %v7861_v2, 0.0  ;;  %v2396_v25 = vmax.f32 %v7872_v34, 0.0  ;;  %v9591_v36 = vunpack.c.l.s8.bf16 %v6427_v39  ;;  %v9869_v2 = vld [vmem:[#allocation105_spill] sm:$0xff] }
 0x526   :  { %v2397_v51 = vmax.f32 %v7866_v21, 0.0  ;;  %v9599_v39 = vunpack.c.l.s8.bf16 %v6515_v15 }
 0x527   :  { %v9421_v6 = vmax.f32 %v7869_v35, 0.0 }
 0x528   :  { %v2429_v56 = vpack.c.bf16 %v2397_v51, %v2396_v25 }
 0x529   :  { %v2428_v16 = vpack.c.bf16 %v9421_v6, %v2394_v5  ;;  %v5591_v6 = vld [vmem:[#allocation8] sm:$0xff]  }
 0x52a   :  { %2583 = vmatmul.mubr.bf16.gmra.mrb[188].mxu1 %v9590_v33  ;;  %5130 = vmatprep.subr.bf16.mxu0 %v5591_v6  ;;  %v9596_v33 = vunpack.c.l.s8.bf16 %v6492_v30 }
 0x52b   :  { %2748 = vmatpush1.bf16.msra.mxu1 %v2428_v16  ;;  %2590 = vmatprep.mubr.bf16.mxu1 %v9591_v36  ;;  %v9594_v16 = vunpack.c.h.s8.bf16 %v6445_v13  ;;  %v9597_v36 = vunpack.c.h.s8.bf16 %v6469_v59  ;;  %v5592_v13 = vld [vmem:[#allocation8 + $0x8] sm:$0xff]  }
 0x52c   :  { %2749 = vmatprep.subr.bf16.mxu1 %v9496_v52  ;;  %5131 = vmatpush3.bf16.msra.mxu0 %v5591_v6  ;;  %v9595_v52 = vunpack.c.l.s8.bf16 %v6469_v59  ;;  %v9603_v59 = vunpack.c.l.s8.bf16 %v6561_v11 }
 0x52d   :  { %5132 = vmatprep.subr.bf16.mxu0 %v5592_v13 }
 0x52f   :  { %2750 = vmatpush1.bf16.msra.mxu1 %v2429_v56  ;;  %v9598_v56 = vunpack.c.h.s8.bf16 %v6492_v30  ;;  %v9604_v30 = vunpack.c.l.s8.bf16 %v6584_v38 }
 0x530   :  { %5290 = vmatprep.subr.bf16.mxu1 %v5591_v6  ;;  %5133 = vmatpush3.bf16.msra.mxu0 %v5592_v13 }
 0x532   :  { %2591 = vmatmul.mubr.bf16.gmra.mrb[192].mxu1 %v9592_v44  ;;  %v9600_v44 = vunpack.c.l.s8.bf16 %v6538_v62 }
 0x533   :  { %2598 = vmatprep.mubr.bf16.mxu1 %v9593_v22  ;;  %v9601_v22 = vunpack.c.h.s8.bf16 %v6515_v15  ;;  %v9607_v15 = vunpack.c.l.s8.bf16 %v6607_v31 }
 0x53a   :  { %2599 = vmatmul.mubr.bf16.gmra.mrb[196].mxu1 %v9594_v16  ;;  %v9602_v16 = vunpack.c.h.s8.bf16 %v6538_v62  ;;  %v5593_v62 = vld [vmem:[#allocation8 + $0x10] sm:$0xff]  }
 0x53b   :  { %2606 = vmatprep.mubr.bf16.mxu1 %v9595_v52  ;;  %v9605_v52 = vunpack.c.h.s8.bf16 %v6561_v11  ;;  %5134 = vmatprep.subr.bf16.mxu0 %v5593_v62  ;;  %v9611_v11 = vunpack.c.l.s8.bf16 %v6653_v40 }
 0x53c   :  { %5135 = vmatpush3.bf16.msra.mxu0 %v5593_v62 }
 0x542   :  { %2607 = vmatmul.mubr.bf16.gmra.mrb[200].mxu1 %v9596_v33  ;;  %v9606_v33 = vunpack.c.h.s8.bf16 %v6584_v38  ;;  %v9612_v38 = vunpack.c.l.s8.bf16 %v6676_v24 }
 0x543   :  { %2614 = vmatprep.mubr.bf16.mxu1 %v9597_v36  ;;  %v9608_v36 = vunpack.c.l.s8.bf16 %v6630_v47 }
 0x54a   :  { %2615 = vmatmul.mubr.bf16.gmra.mrb[204].mxu1 %v9598_v56  ;;  %v9609_v56 = vunpack.c.h.s8.bf16 %v6607_v31  ;;  %v9615_v31 = vunpack.c.l.s8.bf16 %v6699_v23 }
 0x54b   :  { %2622 = vmatprep.mubr.bf16.mxu1 %v9599_v39  ;;  %v9610_v39 = vunpack.c.h.s8.bf16 %v6630_v47  ;;  %v5594_v47 = vld [vmem:[#allocation8 + $0x18] sm:$0xff]  }
 0x54c   :  { %5136 = vmatprep.subr.bf16.mxu0 %v5594_v47 }
 0x54d   :  { %5137 = vmatpush3.bf16.msra.mxu0 %v5594_v47 }
 0x552   :  { %2623 = vmatmul.mubr.bf16.gmra.mrb[208].mxu1 %v9600_v44  ;;  %v9613_v44 = vunpack.c.h.s8.bf16 %v6653_v40  ;;  %v9619_v40 = vunpack.c.l.s8.bf16 %v6745_v18 }
 0x553   :  { %2630 = vmatprep.mubr.bf16.mxu1 %v9601_v22  ;;  %v9614_v22 = vunpack.c.h.s8.bf16 %v6676_v24  ;;  %v9620_v24 = vunpack.c.l.s8.bf16 %v6768_v8 }
 0x55a   :  { %2631 = vmatmul.mubr.bf16.gmra.mrb[212].mxu1 %v9602_v16  ;;  %v9616_v16 = vunpack.c.l.s8.bf16 %v6722_v19 }
 0x55b   :  { %2638 = vmatprep.mubr.bf16.mxu1 %v9603_v59  ;;  %v9617_v59 = vunpack.c.h.s8.bf16 %v6699_v23  ;;  %v9623_v23 = vunpack.c.l.s8.bf16 %v6791_v7 }
 0x562   :  { %2639 = vmatmul.mubr.bf16.gmra.mrb[216].mxu1 %v9604_v30  ;;  %v9618_v30 = vunpack.c.h.s8.bf16 %v6722_v19  ;;  %v5595_v19 = vld [vmem:[#allocation8 + $0x20] sm:$0xff]  }
 0x563   :  { %2646 = vmatprep.mubr.bf16.mxu1 %v9605_v52  ;;  %v9621_v52 = vunpack.c.h.s8.bf16 %v6745_v18  ;;  %5138 = vmatprep.subr.bf16.mxu0 %v5595_v19  ;;  %v9626_v18 = vunpack.c.h.s8.bf16 %v6802_v4 }
 0x564   :  { %5139 = vmatpush3.bf16.msra.mxu0 %v5595_v19 }
 0x56a   :  { %2647 = vmatmul.mubr.bf16.gmra.mrb[220].mxu1 %v9606_v33  ;;  %v9622_v33 = vunpack.c.h.s8.bf16 %v6768_v8  ;;  %v9627_v8 = vunpack.c.l.s8.bf16 %v6813_v29 }
 0x56b   :  { %2654 = vmatprep.mubr.bf16.mxu1 %v9607_v15  ;;  %v9624_v15 = vunpack.c.l.s8.bf16 %v6802_v4  ;;  %v9631_v4 = vunpack.c.l.s8.bf16 %v6835_v49 }
 0x572   :  { %2655 = vmatmul.mubr.bf16.gmra.mrb[224].mxu1 %v9608_v36  ;;  %v9625_v36 = vunpack.c.h.s8.bf16 %v6791_v7  ;;  %v9629_v7 = vunpack.c.h.s8.bf16 %v6813_v29 }
 0x573   :  { %2662 = vmatprep.mubr.bf16.mxu1 %v9609_v56  ;;  %v9628_v56 = vunpack.c.l.s8.bf16 %v6824_v61 }
 0x57a   :  { %2663 = vmatmul.mubr.bf16.gmra.mrb[228].mxu1 %v9610_v39 }
 0x57b   :  { %2670 = vmatprep.mubr.bf16.mxu1 %v9611_v11  ;;  %v9634_v11 = vunpack.c.h.s8.bf16 %v6835_v49  ;;  %v9642_v49 = vld [vmem:[#allocation19_spill] sm:$0xff] }
 0x582   :  { %2671 = vmatmul.mubr.bf16.gmra.mrb[232].mxu1 %v9612_v38  ;;  %v9636_v38 = vld [vmem:[#allocation17_spill] sm:$0xff] }
 0x583   :  { %2678 = vmatprep.mubr.bf16.mxu1 %v9613_v44  ;;  %v9638_v44 = vld [vmem:[#allocation18_spill] sm:$0xff] }
 0x58a   :  { %2679 = vmatmul.mubr.bf16.gmra.mrb[236].mxu1 %v9614_v22  ;;  %v9639_v22 = vunpack.c.l.s8.bf16 %v9638_v44 }
 0x58b   :  { %2686 = vmatprep.mubr.bf16.mxu1 %v9615_v31  ;;  %v9640_v31 = vunpack.c.h.s8.bf16 %v9636_v38 }
 0x592   :  { %2687 = vmatmul.mubr.bf16.gmra.mrb[240].mxu1 %v9616_v16  ;;  %v9641_v16 = vunpack.c.h.s8.bf16 %v9638_v44 }
 0x593   :  { %2694 = vmatprep.mubr.bf16.mxu1 %v9617_v59  ;;  %v9644_v59 = vld [vmem:[#allocation20_spill] sm:$0xff] }
 0x59a   :  { %2695 = vmatmul.mubr.bf16.gmra.mrb[244].mxu1 %v9618_v30  ;;  %v9645_v30 = vunpack.c.l.s8.bf16 %v9644_v59 }
 0x59b   :  { %2702 = vmatprep.mubr.bf16.mxu1 %v9619_v40  ;;  %v5597_v40 = vld [vmem:[#allocation8 + $0x30] sm:$0xff]  }
 0x5a2   :  { %2703 = vmatmul.mubr.bf16.gmra.mrb[248].mxu1 %v9620_v24  ;;  %v9646_v24 = vunpack.c.h.s8.bf16 %v9642_v49 }
 0x5a3   :  { %2710 = vmatprep.mubr.bf16.mxu1 %v9621_v52  ;;  %v9647_v52 = vunpack.c.h.s8.bf16 %v9644_v59 }
 0x5aa   :  { %2711 = vmatmul.mubr.bf16.gmra.mrb[252].mxu1 %v9622_v33  ;;  %v9648_v33 = vld [vmem:[#allocation21_spill] sm:$0xff] }
 0x5ab   :  { %2751 = vmatprep.mubr.bf16.mxu1 %v9623_v23  ;;  %v9649_v23 = vunpack.c.l.s8.bf16 %v9648_v33 }
 0x5b2   :  { %2752 = vmatmul.mubr.bf16.vlgmr.msra.gmra.mrb[128].mxu1 %v9624_v15  ;;  %v9650_v15 = vld [vmem:[#allocation22_spill] sm:$0xff] }
 0x5b3   :  { %2759 = vmatprep.mubr.bf16.mxu1 %v9625_v36  ;;  %5298 = vmatpush3.bf16.msra.mxu1 %v5591_v6  ;;  %v9630_v6 = vunpack.c.h.s8.bf16 %v6824_v61  ;;  %v9637_v61 = vunpack.c.l.s8.bf16 %v9636_v38  ;;  %v9652_v36 = vunpack.c.h.s8.bf16 %v9648_v33 }
 0x5b4   :  { %5291 = vmatprep.subr.bf16.mxu1 %v5592_v13 }
 0x5b7   :  { %5299 = vmatpush3.bf16.msra.mxu1 %v5592_v13  ;;  %v9632_v13 = vld [vmem:[#allocation16_spill] sm:$0xff] }
 0x5b8   :  { %5292 = vmatprep.subr.bf16.mxu1 %v5593_v62  ;;  %v9633_v39 = vunpack.c.l.s8.bf16 %v9632_v13  ;;  %v9635_v29 = vunpack.c.h.s8.bf16 %v9632_v13 }
 0x5ba   :  { %2760 = vmatmul.mubr.bf16.gmra.mrb[132].mxu1 %v9626_v18  ;;  %v9653_v18 = vunpack.c.h.s8.bf16 %v9650_v15 }
 0x5bb   :  { %2767 = vmatprep.mubr.bf16.mxu1 %v9627_v8  ;;  %5300 = vmatpush3.bf16.msra.mxu1 %v5593_v62  ;;  %v5596_v62 = vld [vmem:[#allocation8 + $0x28] sm:$0xff]   ;;  %v9654_v8 = vld [vmem:[#allocation23_spill] sm:$0xff] }
 0x5bc   :  { %5293 = vmatprep.subr.bf16.mxu1 %v5594_v47  ;;  %5140 = vmatprep.subr.bf16.mxu0 %v5596_v62  ;;  %v9658_v13 = vunpack.c.h.s8.bf16 %v9654_v8 }
 0x5bd   :  { %5141 = vmatpush3.bf16.msra.mxu0 %v5596_v62 }
 0x5be   :  { %5142 = vmatprep.subr.bf16.mxu0 %v5597_v40 }
 0x5bf   :  { %5301 = vmatpush3.bf16.msra.mxu1 %v5594_v47  ;;  %v9643_v47 = vunpack.c.l.s8.bf16 %v9642_v49 }
 0x5c0   :  { %5294 = vmatprep.subr.bf16.mxu1 %v5595_v19 }
 0x5c1   :  { %5143 = vmatpush3.bf16.msra.mxu0 %v5597_v40 }
 0x5c2   :  { %2768 = vmatmul.mubr.bf16.gmra.mrb[136].mxu1 %v9628_v56  ;;  %v9655_v56 = vunpack.c.l.s8.bf16 %v9654_v8 }
 0x5c3   :  { %2775 = vmatprep.mubr.bf16.mxu1 %v9629_v7  ;;  %5302 = vmatpush3.bf16.msra.mxu1 %v5595_v19  ;;  %v9651_v19 = vunpack.c.l.s8.bf16 %v9650_v15  ;;  %v5598_v7 = vld [vmem:[#allocation8 + $0x38] sm:$0xff]  }
 0x5c4   :  { %5295 = vmatprep.subr.bf16.mxu1 %v5596_v62  ;;  %5144 = vmatprep.subr.bf16.mxu0 %v5598_v7  ;;  %v9678_v15 = vld [vmem:[#allocation31_spill] sm:$0xff] }
 0x5c5   :  { %5145 = vmatpush3.bf16.msra.mxu0 %v5598_v7  ;;  %v9682_v8 = vunpack.c.h.s8.bf16 %v9678_v15 }
 0x5c7   :  { %5303 = vmatpush3.bf16.msra.mxu1 %v5596_v62  ;;  %v9660_v62 = vld [vmem:[#allocation25_spill] sm:$0xff] }
 0x5c8   :  { %5296 = vmatprep.subr.bf16.mxu1 %v5597_v40 }
 0x5ca   :  { %2776 = vmatmul.mubr.bf16.gmra.mrb[140].mxu1 %v9630_v6  ;;  %v9656_v6 = vld [vmem:[#allocation24_spill] sm:$0xff] }
 0x5cb   :  { %2783 = vmatprep.mubr.bf16.mxu1 %v9631_v4  ;;  %5304 = vmatpush3.bf16.msra.mxu1 %v5597_v40  ;;  %v9657_v4 = vunpack.c.l.s8.bf16 %v9656_v6 }
 0x5cc   :  { %5297 = vmatprep.subr.bf16.mxu1 %v5598_v7 }
 0x5cf   :  { %5305 = vmatpush3.bf16.msra.mxu1 %v5598_v7  ;;  %v9684_v7 = vld [vmem:[#allocation33_spill] sm:$0xff] }
 0x5d2   :  { %2784 = vmatmul.mubr.bf16.gmra.mrb[144].mxu1 %v9633_v39  ;;  %v9659_v39 = vunpack.c.h.s8.bf16 %v9656_v6  ;;  %v9685_v6 = vunpack.c.l.s8.bf16 %v9684_v7 }
 0x5d3   :  { %2791 = vmatprep.mubr.bf16.mxu1 %v9634_v11  ;;  %v9661_v11 = vunpack.c.l.s8.bf16 %v9660_v62 }
 0x5da   :  { %2792 = vmatmul.mubr.bf16.gmra.mrb[148].mxu1 %v9635_v29  ;;  %v9662_v29 = vld [vmem:[#allocation26_spill] sm:$0xff] }
 0x5db   :  { %2799 = vmatprep.mubr.bf16.mxu1 %v9637_v61  ;;  %v9663_v38 = vunpack.c.l.s8.bf16 %v9662_v29  ;;  %v9664_v61 = vunpack.c.h.s8.bf16 %v9660_v62  ;;  %v9665_v44 = vunpack.c.h.s8.bf16 %v9662_v29 }
 0x5e2   :  { %2800 = vmatmul.mubr.bf16.gmra.mrb[152].mxu1 %v9639_v22  ;;  %v9666_v22 = vld [vmem:[#allocation27_spill] sm:$0xff] }
 0x5e3   :  { %2807 = vmatprep.mubr.bf16.mxu1 %v9640_v31  ;;  %v9667_v31 = vunpack.c.l.s8.bf16 %v9666_v22 }
 0x5ea   :  { %2808 = vmatmul.mubr.bf16.gmra.mrb[156].mxu1 %v9641_v16  ;;  %v9668_v16 = vld [vmem:[#allocation28_spill] sm:$0xff] }
 0x5eb   :  { %2815 = vmatprep.mubr.bf16.mxu1 %v9643_v47  ;;  %v9669_v49 = vunpack.c.l.s8.bf16 %v9668_v16  ;;  %v9670_v47 = vunpack.c.h.s8.bf16 %v9666_v22  ;;  %v9671_v59 = vunpack.c.h.s8.bf16 %v9668_v16 }
 0x5f2   :  { %2816 = vmatmul.mubr.bf16.gmra.mrb[160].mxu1 %v9645_v30  ;;  %v9672_v30 = vld [vmem:[#allocation29_spill] sm:$0xff] }
 0x5f3   :  { %2823 = vmatprep.mubr.bf16.mxu1 %v9646_v24  ;;  %v9673_v40 = vunpack.c.l.s8.bf16 %v9672_v30  ;;  %v9674_v24 = vld [vmem:[#allocation30_spill] sm:$0xff]  ;;  %v9676_v33 = vunpack.c.h.s8.bf16 %v9672_v30 }
 0x5fa   :  { %2824 = vmatmul.mubr.bf16.gmra.mrb[164].mxu1 %v9647_v52  ;;  %v9675_v52 = vunpack.c.l.s8.bf16 %v9674_v24 }
 0x5fb   :  { %2831 = vmatprep.mubr.bf16.mxu1 %v9649_v23  ;;  %v9677_v23 = vunpack.c.h.s8.bf16 %v9674_v24 }
 0x602   :  { %2832 = vmatmul.mubr.bf16.gmra.mrb[168].mxu1 %v9651_v19  ;;  %v9679_v19 = vunpack.c.l.s8.bf16 %v9678_v15 }
 0x603   :  { %2839 = vmatprep.mubr.bf16.mxu1 %v9652_v36  ;;  %v9680_v36 = vld [vmem:[#allocation32_spill] sm:$0xff] }
 0x60a   :  { %2840 = vmatmul.mubr.bf16.gmra.mrb[172].mxu1 %v9653_v18  ;;  %v9681_v18 = vunpack.c.l.s8.bf16 %v9680_v36 }
 0x60b   :  { %2847 = vmatprep.mubr.bf16.mxu1 %v9655_v56  ;;  %v9683_v56 = vunpack.c.h.s8.bf16 %v9680_v36  ;;  %v9703_v36 = vmax.f32 %v7411_v63, 0.0 }
 0x612   :  { %2848 = vmatmul.mubr.bf16.gmra.mrb[176].mxu1 %v9657_v4  ;;  %v9686_v4 = vld [vmem:[#allocation34_spill] sm:$0xff] }
 0x613   :  { %2855 = vmatprep.mubr.bf16.mxu1 %v9658_v13  ;;  %v9687_v13 = vunpack.c.l.s8.bf16 %v9686_v4  ;;  %v9689_v62 = vunpack.c.h.s8.bf16 %v9686_v4 }
 0x61a   :  { %2856 = vmatmul.mubr.bf16.gmra.mrb[180].mxu1 %v9659_v39  ;;  %v9688_v39 = vunpack.c.h.s8.bf16 %v9684_v7 }
 0x61b   :  { %2863 = vmatprep.mubr.bf16.mxu1 %v9661_v11  ;;  %v9690_v11 = vld [vmem:[#allocation35_spill] sm:$0xff] }
 0x61c   :  { %v9691_v29 = vunpack.c.l.s8.bf16 %v9690_v11 }
 0x622   :  { %2864 = vmatmul.mubr.bf16.gmra.mrb[184].mxu1 %v9663_v38  ;;  %v9692_v38 = vld [vmem:[#allocation36_spill] sm:$0xff] }
 0x623   :  { %2871 = vmatprep.mubr.bf16.mxu1 %v9664_v61  ;;  %v9693_v61 = vunpack.c.l.s8.bf16 %v9692_v38  ;;  %v9695_v22 = vunpack.c.h.s8.bf16 %v9692_v38 }
 0x62a   :  { %2872 = vmatmul.mubr.bf16.gmra.mrb[188].mxu1 %v9665_v44  ;;  %v9694_v44 = vunpack.c.h.s8.bf16 %v9690_v11 }
 0x62b   :  { %2879 = vmatprep.mubr.bf16.mxu1 %v9667_v31  ;;  %v9696_v31 = vld [vmem:[#allocation37_spill] sm:$0xff] }
 0x62c   :  { %v9697_v16 = vunpack.c.l.s8.bf16 %v9696_v31 }
 0x632   :  { %2880 = vmatmul.mubr.bf16.gmra.mrb[192].mxu1 %v9669_v49  ;;  %v9698_v49 = vld [vmem:[#allocation38_spill] sm:$0xff] }
 0x633   :  { %2887 = vmatprep.mubr.bf16.mxu1 %v9670_v47  ;;  %v9699_v47 = vunpack.c.l.s8.bf16 %v9698_v49  ;;  %v9705_v7 = vunpack.c.h.s8.bf16 %v9698_v49  ;;  %v9712_v49 = vld [vmem:[#allocation43_spill] sm:$0xff] }
 0x63a   :  { %2888 = vmatmul.mubr.bf16.gmra.mrb[196].mxu1 %v9671_v59  ;;  %v9700_v59 = vunpack.c.h.s8.bf16 %v9696_v31  ;;  %v9711_v31 = vmax.f32 %v7414_v43, 0.0 }
 0x63b   :  { %2895 = vmatprep.mubr.bf16.mxu1 %v9673_v40  ;;  %v9701_v40 = vld [vmem:[#allocation39_spill] sm:$0xff] }
 0x642   :  { %2896 = vmatmul.mubr.bf16.gmra.mrb[200].mxu1 %v9675_v52 }
 0x643   :  { %2903 = vmatprep.mubr.bf16.mxu1 %v9676_v33 }
 0x64a   :  { %2904 = vmatmul.mubr.bf16.gmra.mrb[204].mxu1 %v9677_v23  ;;  %v9702_v23 = vld [vmem:[#allocation41_spill] sm:$0xff] }
 0x64b   :  { %2911 = vmatprep.mubr.bf16.mxu1 %v9679_v19 }
 0x652   :  { %2912 = vmatmul.mubr.bf16.gmra.mrb[208].mxu1 %v9681_v18 }
 0x653   :  { %2919 = vmatprep.mubr.bf16.mxu1 %v9682_v8  ;;  %v9704_v8 = vmax.f32 %v7417_v14, 0.0 }
 0x65a   :  { %2920 = vmatmul.mubr.bf16.gmra.mrb[212].mxu1 %v9683_v56 }
 0x65b   :  { %2927 = vmatprep.mubr.bf16.mxu1 %v9685_v6  ;;  %v9706_v6 = vld [vmem:[#allocation40_spill] sm:$0xff] }
 0x65c   :  { %v9707_v4 = vunpack.c.l.s8.bf16 %v9706_v6 }
 0x662   :  { %2928 = vmatmul.mubr.bf16.gmra.mrb[216].mxu1 %v9687_v13 }
 0x663   :  { %2935 = vmatprep.mubr.bf16.mxu1 %v9688_v39 }
 0x66a   :  { %2936 = vmatmul.mubr.bf16.gmra.mrb[220].mxu1 %v9689_v62  ;;  %v9708_v62 = vld [vmem:[#allocation42_spill] sm:$0xff] }
 0x66b   :  { %2943 = vmatprep.mubr.bf16.mxu1 %v9691_v29 }
 0x672   :  { %2944 = vmatmul.mubr.bf16.gmra.mrb[224].mxu1 %v9693_v61  ;;  %v9709_v61 = vld [vmem:[#allocation44_spill] sm:$0xff] }
 0x673   :  { %2951 = vmatprep.mubr.bf16.mxu1 %v9694_v44 }
 0x67a   :  { %2952 = vmatmul.mubr.bf16.gmra.mrb[228].mxu1 %v9695_v22  ;;  %v9710_v22 = vmax.f32 %v7422_v20, 0.0 }
 0x67b   :  { %2959 = vmatprep.mubr.bf16.mxu1 %v9697_v16 }
 0x682   :  { %2960 = vmatmul.mubr.bf16.gmra.mrb[232].mxu1 %v9699_v47  ;;  %v9713_v47 = vunpack.c.l.s8.bf16 %v9712_v49 }
 0x683   :  { %2967 = vmatprep.mubr.bf16.mxu1 %v9700_v59  ;;  %v9714_v59 = vunpack.c.h.s8.bf16 %v9706_v6 }
 0x685   :  { %v2753_v30 = vpop.f32.mrb[128].mxu1 }
 0x686   :  { %v3008_v24 = vmul.f32 %v2753_v30, %v9701_v40  ;;  %v2755_v52 = vpop.f32.mrb[129].mxu1 }
 0x687   :  { %v2756_v33 = vpop.f32.mrb[130].mxu1 }
 0x688   :  { %v3009_v15 = vmul.f32 %v2756_v33, %v9702_v23  ;;  %v2758_v19 = vpop.f32.mrb[131].mxu1  ;;  %v3072_v18 = vadd.f32 %v3008_v24, %v9703_v36  ;;  %v9715_v24 = vld [vmem:[#allocation46_spill] sm:$0xff]  ;;  %v9717_v36 = vmax.f32 %v7433_v45, 0.0 }
 0x68a   :  { %v3073_v56 = vadd.f32 %v3009_v15, %v9704_v8  ;;  %2968 = vmatmul.mubr.bf16.gmra.mrb[236].mxu1 %v9705_v7  ;;  %v9716_v15 = vld [vmem:[#allocation47_spill] sm:$0xff]  ;;  %v9720_v7 = vld [vmem:[#allocation45_spill] sm:$0xff] }
 0x68b   :  { %2975 = vmatprep.mubr.bf16.mxu1 %v9707_v4  ;;  %v9721_v6 = vunpack.c.l.s8.bf16 %v9720_v7 }
 0x68c   :  { %v3136_v13 = vpack.c.bf16 %v3073_v56, %v3072_v18  ;;  %v9718_v18 = vmax.f32 %v7444_v42, 0.0  ;;  %v9719_v56 = vunpack.c.h.s8.bf16 %v9712_v49 }
 0x68d   :  { %v2761_v39 = vpop.f32.mrb[132].mxu1 }
 0x68e   :  { %v3010_v11 = vmul.f32 %v2761_v39, %v9708_v62  ;;  %v2763_v29 = vpop.f32.mrb[133].mxu1  ;;  %5146 = vmatprep.mubr.bf16.mxu0 %v3136_v13  ;;  %v9722_v39 = vld [vmem:[#allocation49_spill] sm:$0xff] }
 0x68f   :  { %v2764_v38 = vpop.f32.mrb[134].mxu1 }
 0x690   :  { %v3011_v44 = vmul.f32 %v2764_v38, %v9709_v61  ;;  %v2766_v63 = vpop.f32.mrb[135].mxu1  ;;  %v3074_v14 = vadd.f32 %v3010_v11, %v9710_v22  ;;  %v9723_v38 = vld [vmem:[#allocation50_spill] sm:$0xff] }
 0x691   :  { %v9725_v63 = vmax.f32 %v7441_v53, 0.0  ;;  %v9731_v53 = vmax.f32 %v7459_v27, 0.0  ;;  %v9736_v27 = vmax.f32 %v7473_v54, 0.0 }
 0x692   :  { %v3075_v16 = vadd.f32 %v3011_v44, %v9711_v31  ;;  %2976 = vmatmul.mubr.bf16.gmra.mrb[240].mxu1 %v9713_v47  ;;  %v9724_v44 = vmax.f32 %v7447_v26, 0.0 }
 0x693   :  { %2983 = vmatprep.mubr.bf16.mxu1 %v9714_v59  ;;  %v9729_v59 = vld [vmem:[#allocation51_spill] sm:$0xff] }
 0x694   :  { %v3137_v30 = vpack.c.bf16 %v3075_v16, %v3074_v14  ;;  %v9726_v14 = vld [vmem:[#allocation48_spill] sm:$0xff]  ;;  %v9728_v16 = vunpack.c.h.s8.bf16 %v9720_v7 }
 0x695   :  { %v2769_v40 = vpop.f32.mrb[136].mxu1  ;;  %v9727_v31 = vunpack.c.l.s8.bf16 %v9726_v14 }
 0x696   :  { %v3012_v52 = vmul.f32 %v2769_v40, %v9715_v24  ;;  %v2771_v33 = vpop.f32.mrb[137].mxu1  ;;  %5147 = vmatmul.mubr.bf16.vlgmr.msra.gmra.mrb[128].mxu0 %v3137_v30 }
 0x697   :  { %v2772_v23 = vpop.f32.mrb[138].mxu1 }
 0x698   :  { %v3013_v19 = vmul.f32 %v2772_v23, %v9716_v15  ;;  %v2774_v20 = vpop.f32.mrb[139].mxu1  ;;  %v3076_v43 = vadd.f32 %v3012_v52, %v9717_v36  ;;  %v9730_v52 = vld [vmem:[#allocation52_spill] sm:$0xff]  ;;  %v9733_v36 = vunpack.c.h.s8.bf16 %v9726_v14 }
 0x699   :  { %v5599_v23 = vld [vmem:[#allocation10] sm:$0xff]  }
 0x69a   :  { %v3077_v8 = vadd.f32 %v3013_v19, %v9718_v18  ;;  %2984 = vmatmul.mubr.bf16.gmra.mrb[244].mxu1 %v9719_v56  ;;  %v9732_v19 = vmax.f32 %v7470_v48, 0.0  ;;  %5210 = vmatprep.subr.bf16.mxu0 %v5599_v23  ;;  %v9737_v48 = vmax.f32 %v7467_v0, 0.0 }
 0x69b   :  { %2991 = vmatprep.mubr.bf16.mxu1 %v9721_v6  ;;  %5211 = vmatpush3.bf16.msra.mxu0 %v5599_v23 }
 0x69c   :  { %v3138_v4 = vpack.c.bf16 %v3077_v8, %v3076_v43  ;;  %v9734_v8 = vld [vmem:[#allocation53_spill] sm:$0xff] }
 0x69d   :  { %v2777_v13 = vpop.f32.mrb[140].mxu1 }
 0x69e   :  { %v3014_v62 = vmul.f32 %v2777_v13, %v9722_v39  ;;  %v2779_v11 = vpop.f32.mrb[141].mxu1  ;;  %5150 = vmatprep.mubr.bf16.mxu0 %v3138_v4  ;;  %v9735_v4 = vld [vmem:[#allocation54_spill] sm:$0xff] }
 0x69f   :  { %v2780_v29 = vpop.f32.mrb[142].mxu1 }
 0x6a0   :  { %v3015_v61 = vmul.f32 %v2780_v29, %v9723_v38  ;;  %v2782_v45 = vpop.f32.mrb[143].mxu1  ;;  %v3078_v42 = vadd.f32 %v3014_v62, %v9724_v44  ;;  %v5600_v29 = vld [vmem:[#allocation10 + $0x8] sm:$0xff]  }
 0x6a1   :  { %5212 = vmatprep.subr.bf16.mxu0 %v5600_v29  ;;  %v9738_v45 = vld [vmem:[#allocation55_spill] sm:$0xff] }
 0x6a2   :  { %v3079_v22 = vadd.f32 %v3015_v61, %v9725_v63  ;;  %2992 = vmatmul.mubr.bf16.gmra.mrb[248].mxu1 %v9727_v31  ;;  %5213 = vmatpush3.bf16.msra.mxu0 %v5600_v29 }
 0x6a3   :  { %2999 = vmatprep.mubr.bf16.mxu1 %v9728_v16  ;;  %v9740_v16 = vmax.f32 %v7485_v58, 0.0 }
 0x6a4   :  { %v3139_v49 = vpack.c.bf16 %v3079_v22, %v3078_v42  ;;  %v9739_v22 = vld [vmem:[#allocation56_spill] sm:$0xff] }
 0x6a5   :  { %v2785_v47 = vpop.f32.mrb[144].mxu1 }
 0x6a6   :  { %v3016_v30 = vmul.f32 %v2785_v47, %v9729_v59  ;;  %v2787_v40 = vpop.f32.mrb[145].mxu1  ;;  %5151 = vmatmul.mubr.bf16.gmra.mrb[132].mxu0 %v3139_v49  ;;  %v9741_v49 = vld [vmem:[#allocation108_spill] sm:$0xff] }
 0x6a7   :  { %v2788_v24 = vpop.f32.mrb[146].mxu1  ;;  %v9742_v47 = vmax.f32 %v9741_v49, 0.0  ;;  %v9743_v40 = vld [vmem:[#allocation57_spill] sm:$0xff] }
 0x6a8   :  { %v3017_v33 = vmul.f32 %v2788_v24, %v9730_v52  ;;  %v2790_v26 = vpop.f32.mrb[147].mxu1  ;;  %v3080_v15 = vadd.f32 %v3016_v30, %v9731_v53 }
 0x6a9   :  { %v9744_v26 = vld [vmem:[#allocation58_spill] sm:$0xff] }
 0x6aa   :  { %v3081_v20 = vadd.f32 %v3017_v33, %v9732_v19  ;;  %3000 = vmatmul.mubr.bf16.gmra.mrb[252].mxu1 %v9733_v36  ;;  %v9747_v36 = vld [vmem:[#allocation107_spill] sm:$0xff] }
 0x6ac   :  { %v3140_v43 = vpack.c.bf16 %v3081_v20, %v3080_v15  ;;  %v9745_v15 = vld [vmem:[#allocation109_spill] sm:$0xff] }
 0x6ad   :  { %v2793_v18 = vpop.f32.mrb[148].mxu1  ;;  %v9746_v19 = vmax.f32 %v9745_v15, 0.0 }
 0x6ae   :  { %v3018_v56 = vmul.f32 %v2793_v18, %v9734_v8  ;;  %v2795_v7 = vpop.f32.mrb[149].mxu1  ;;  %5154 = vmatprep.mubr.bf16.mxu0 %v3140_v43  ;;  %v9748_v43 = vmax.f32 %v9747_v36, 0.0  ;;  %v5601_v18 = vld [vmem:[#allocation10 + $0x10] sm:$0xff]  }
 0x6af   :  { %v2796_v6 = vpop.f32.mrb[150].mxu1  ;;  %5214 = vmatprep.subr.bf16.mxu0 %v5601_v18  ;;  %v9749_v7 = vld [vmem:[#allocation59_spill] sm:$0xff] }
 0x6b0   :  { %v3019_v13 = vmul.f32 %v2796_v6, %v9735_v4  ;;  %v2798_v39 = vpop.f32.mrb[151].mxu1  ;;  %v3082_v62 = vadd.f32 %v3018_v56, %v9736_v27  ;;  %5215 = vmatpush3.bf16.msra.mxu0 %v5601_v18 }
 0x6b1   :  { %v9750_v39 = vld [vmem:[#allocation60_spill] sm:$0xff] }
 0x6b2   :  { %v3083_v11 = vadd.f32 %v3019_v13, %v9737_v48  ;;  %v9751_v48 = vld [vmem:[#allocation110_spill] sm:$0xff] }
 0x6b4   :  { %v3141_v38 = vpack.c.bf16 %v3083_v11, %v3082_v62  ;;  %v9752_v11 = vmax.f32 %v9751_v48, 0.0 }
 0x6b5   :  { %v2801_v61 = vpop.f32.mrb[152].mxu1 }
 0x6b6   :  { %v3020_v44 = vmul.f32 %v2801_v61, %v9738_v45  ;;  %v2803_v42 = vpop.f32.mrb[153].mxu1  ;;  %5155 = vmatmul.mubr.bf16.gmra.mrb[136].mxu0 %v3141_v38  ;;  %v9753_v38 = vld [vmem:[#allocation112_spill] sm:$0xff] }
 0x6b7   :  { %v2804_v63 = vpop.f32.mrb[154].mxu1  ;;  %v9754_v61 = vmax.f32 %v9753_v38, 0.0 }
 0x6b8   :  { %v3021_v14 = vmul.f32 %v2804_v63, %v9739_v22  ;;  %v2806_v31 = vpop.f32.mrb[155].mxu1  ;;  %v3084_v54 = vadd.f32 %v3020_v44, %v9740_v16  ;;  %v9755_v63 = vld [vmem:[#allocation61_spill] sm:$0xff]  ;;  %v9756_v16 = vld [vmem:[#allocation62_spill] sm:$0xff] }
 0x6ba   :  { %v3085_v0 = vadd.f32 %v3021_v14, %v9742_v47  ;;  %v9757_v47 = vld [vmem:[#allocation113_spill] sm:$0xff] }
 0x6bc   :  { %v3142_v59 = vpack.c.bf16 %v3085_v0, %v3084_v54  ;;  %v9758_v0 = vmax.f32 %v9757_v47, 0.0 }
 0x6bd   :  { %v2809_v30 = vpop.f32.mrb[156].mxu1 }
 0x6be   :  { %v3022_v24 = vmul.f32 %v2809_v30, %v9743_v40  ;;  %v2811_v52 = vpop.f32.mrb[157].mxu1  ;;  %5158 = vmatprep.mubr.bf16.mxu0 %v3142_v59  ;;  %v9759_v30 = vld [vmem:[#allocation111_spill] sm:$0xff] }
 0x6bf   :  { %v2812_v33 = vpop.f32.mrb[158].mxu1  ;;  %v9760_v40 = vmax.f32 %v9759_v30, 0.0  ;;  %v5602_v52 = vld [vmem:[#allocation10 + $0x18] sm:$0xff]   ;;  %v9774_v30 = vld [vmem:[#allocation68_spill] sm:$0xff] }
 0x6c0   :  { %v3023_v23 = vmul.f32 %v2812_v33, %v9744_v26  ;;  %v2814_v53 = vpop.f32.mrb[159].mxu1  ;;  %v3086_v20 = vadd.f32 %v3022_v24, %v9746_v19  ;;  %5216 = vmatprep.subr.bf16.mxu0 %v5602_v52 }
 0x6c1   :  { %5217 = vmatpush3.bf16.msra.mxu0 %v5602_v52  ;;  %v9775_v52 = vld [vmem:[#allocation118_spill] sm:$0xff] }
 0x6c2   :  { %v3087_v58 = vadd.f32 %v3023_v23, %v9748_v43  ;;  %v9761_v23 = vld [vmem:[#allocation63_spill] sm:$0xff] }
 0x6c4   :  { %v3143_v8 = vpack.c.bf16 %v3087_v58, %v3086_v20  ;;  %v9762_v20 = vld [vmem:[#allocation64_spill] sm:$0xff]  ;;  %v9763_v58 = vld [vmem:[#allocation114_spill] sm:$0xff] }
 0x6c5   :  { %v2817_v56 = vpop.f32.mrb[160].mxu1  ;;  %v9764_v18 = vmax.f32 %v9763_v58, 0.0 }
 0x6c6   :  { %v3024_v6 = vmul.f32 %v2817_v56, %v9749_v7  ;;  %v2819_v4 = vpop.f32.mrb[161].mxu1  ;;  %5159 = vmatmul.mubr.bf16.gmra.mrb[140].mxu0 %v3143_v8  ;;  %v9765_v56 = vld [vmem:[#allocation116_spill] sm:$0xff] }
 0x6c7   :  { %v2820_v13 = vpop.f32.mrb[162].mxu1  ;;  %v9766_v7 = vmax.f32 %v9765_v56, 0.0 }
 0x6c8   :  { %v3025_v27 = vmul.f32 %v2820_v13, %v9750_v39  ;;  %v2822_v62 = vpop.f32.mrb[163].mxu1  ;;  %v3088_v29 = vadd.f32 %v3024_v6, %v9752_v11  ;;  %v9767_v39 = vld [vmem:[#allocation65_spill] sm:$0xff]  ;;  %v9768_v11 = vld [vmem:[#allocation66_spill] sm:$0xff] }
 0x6ca   :  { %v3089_v45 = vadd.f32 %v3025_v27, %v9754_v61  ;;  %v5603_v61 = vld [vmem:[#allocation10 + $0x20] sm:$0xff]  }
 0x6cb   :  { %5218 = vmatprep.subr.bf16.mxu0 %v5603_v61 }
 0x6cc   :  { %v3144_v44 = vpack.c.bf16 %v3089_v45, %v3088_v29  ;;  %v9769_v45 = vld [vmem:[#allocation117_spill] sm:$0xff]  ;;  %5219 = vmatpush3.bf16.msra.mxu0 %v5603_v61  ;;  %v9785_v61 = vld [vmem:[#allocation71_spill] sm:$0xff] }
 0x6cd   :  { %v2825_v42 = vpop.f32.mrb[164].mxu1 }
 0x6ce   :  { %v3026_v22 = vmul.f32 %v2825_v42, %v9755_v63  ;;  %v2827_v14 = vpop.f32.mrb[165].mxu1  ;;  %5162 = vmatprep.mubr.bf16.mxu0 %v3144_v44  ;;  %v9770_v44 = vmax.f32 %v9769_v45, 0.0  ;;  %v9771_v63 = vld [vmem:[#allocation115_spill] sm:$0xff] }
 0x6cf   :  { %v2828_v31 = vpop.f32.mrb[166].mxu1 }
 0x6d0   :  { %v3027_v54 = vmul.f32 %v2828_v31, %v9756_v16  ;;  %v2830_v49 = vpop.f32.mrb[167].mxu1  ;;  %v3090_v59 = vadd.f32 %v3026_v22, %v9758_v0  ;;  %v9772_v22 = vmax.f32 %v9771_v63, 0.0  ;;  %v5604_v0 = vld [vmem:[#allocation10 + $0x28] sm:$0xff]   ;;  %v9786_v63 = vld [vmem:[#allocation72_spill] sm:$0xff] }
 0x6d1   :  { %5220 = vmatprep.subr.bf16.mxu0 %v5604_v0 }
 0x6d2   :  { %v3091_v24 = vadd.f32 %v3027_v54, %v9760_v40  ;;  %v9773_v54 = vld [vmem:[#allocation67_spill] sm:$0xff]  ;;  %5221 = vmatpush3.bf16.msra.mxu0 %v5604_v0 }
 0x6d4   :  { %v3145_v33 = vpack.c.bf16 %v3091_v24, %v3090_v59 }
 0x6d5   :  { %v2833_v26 = vpop.f32.mrb[168].mxu1 }
 0x6d6   :  { %v3028_v53 = vmul.f32 %v2833_v26, %v9761_v23  ;;  %v2835_v15 = vpop.f32.mrb[169].mxu1  ;;  %5163 = vmatmul.mubr.bf16.gmra.mrb[144].mxu0 %v3145_v33  ;;  %v9776_v33 = vmax.f32 %v9775_v52, 0.0  ;;  %v9777_v23 = vld [vmem:[#allocation120_spill] sm:$0xff] }
 0x6d7   :  { %v2836_v19 = vpop.f32.mrb[170].mxu1 }
 0x6d8   :  { %v3029_v36 = vmul.f32 %v2836_v19, %v9762_v20  ;;  %v2838_v43 = vpop.f32.mrb[171].mxu1  ;;  %v3092_v8 = vadd.f32 %v3028_v53, %v9764_v18  ;;  %v9778_v53 = vmax.f32 %v9777_v23, 0.0  ;;  %v5605_v19 = vld [vmem:[#allocation10 + $0x30] sm:$0xff]  }
 0x6d9   :  { %5222 = vmatprep.subr.bf16.mxu0 %v5605_v19  ;;  %v9779_v43 = vld [vmem:[#allocation69_spill] sm:$0xff] }
 0x6da   :  { %v3093_v6 = vadd.f32 %v3029_v36, %v9766_v7  ;;  %5223 = vmatpush3.bf16.msra.mxu0 %v5605_v19  ;;  %v9780_v7 = vld [vmem:[#allocation70_spill] sm:$0xff] }
 0x6dc   :  { %v3146_v4 = vpack.c.bf16 %v3093_v6, %v3092_v8  ;;  %v5606_v8 = vld [vmem:[#allocation10 + $0x38] sm:$0xff]  }
 0x6dd   :  { %v2841_v13 = vpop.f32.mrb[172].mxu1  ;;  %5224 = vmatprep.subr.bf16.mxu0 %v5606_v8 }
 0x6de   :  { %v3030_v27 = vmul.f32 %v2841_v13, %v9767_v39  ;;  %v2843_v62 = vpop.f32.mrb[173].mxu1  ;;  %5166 = vmatprep.mubr.bf16.mxu0 %v3146_v4  ;;  %5225 = vmatpush3.bf16.msra.mxu0 %v5606_v8  ;;  %v9781_v13 = vld [vmem:[#allocation121_spill] sm:$0xff]  ;;  %v9796_v8 = vld [vmem:[#allocation75_spill] sm:$0xff] }
 0x6df   :  { %v2844_v48 = vpop.f32.mrb[174].mxu1  ;;  %v9782_v39 = vmax.f32 %v9781_v13, 0.0  ;;  %v9783_v62 = vld [vmem:[#allocation119_spill] sm:$0xff] }
 0x6e0   :  { %v3031_v29 = vmul.f32 %v2844_v48, %v9768_v11  ;;  %v2846_v38 = vpop.f32.mrb[175].mxu1  ;;  %v3094_v42 = vadd.f32 %v3030_v27, %v9770_v44  ;;  %v9784_v48 = vmax.f32 %v9783_v62, 0.0 }
 0x6e2   :  { %v3095_v14 = vadd.f32 %v3031_v29, %v9772_v22 }
 0x6e4   :  { %v3147_v31 = vpack.c.bf16 %v3095_v14, %v3094_v42 }
 0x6e5   :  { %v2849_v16 = vpop.f32.mrb[176].mxu1 }
 0x6e6   :  { %v3032_v49 = vmul.f32 %v2849_v16, %v9773_v54  ;;  %v2851_v47 = vpop.f32.mrb[177].mxu1  ;;  %5167 = vmatmul.mubr.bf16.gmra.mrb[148].mxu0 %v3147_v31  ;;  %v9787_v31 = vld [vmem:[#allocation122_spill] sm:$0xff] }
 0x6e7   :  { %v2852_v59 = vpop.f32.mrb[178].mxu1  ;;  %v9788_v16 = vmax.f32 %v9787_v31, 0.0  ;;  %v9803_v31 = vld [vmem:[#allocation126_spill] sm:$0xff] }
 0x6e8   :  { %v3033_v40 = vmul.f32 %v2852_v59, %v9774_v30  ;;  %v2854_v24 = vpop.f32.mrb[179].mxu1  ;;  %v3096_v26 = vadd.f32 %v3032_v49, %v9776_v33  ;;  %v9789_v49 = vld [vmem:[#allocation123_spill] sm:$0xff] }
 0x6e9   :  { %v9790_v47 = vmax.f32 %v9789_v49, 0.0  ;;  %v9805_v49 = vmax.f32 %v7628_v1, 0.0  ;;  %v9811_v1 = vld [vmem:[#allocation81_spill] sm:$0xff] }
 0x6ea   :  { %v3097_v15 = vadd.f32 %v3033_v40, %v9778_v53  ;;  %v9791_v40 = vld [vmem:[#allocation73_spill] sm:$0xff] }
 0x6ec   :  { %v3148_v20 = vpack.c.bf16 %v3097_v15, %v3096_v26  ;;  %v9792_v26 = vld [vmem:[#allocation74_spill] sm:$0xff]  ;;  %v9793_v15 = vld [vmem:[#allocation124_spill] sm:$0xff] }
 0x6ed   :  { %v2857_v36 = vpop.f32.mrb[180].mxu1  ;;  %v9794_v19 = vmax.f32 %v9793_v15, 0.0  ;;  %v9809_v15 = vld [vmem:[#allocation127_spill] sm:$0xff] }
 0x6ee   :  { %v3034_v58 = vmul.f32 %v2857_v36, %v9779_v43  ;;  %v2859_v18 = vpop.f32.mrb[181].mxu1  ;;  %5170 = vmatprep.mubr.bf16.mxu0 %v3148_v20  ;;  %v9795_v36 = vmax.f32 %v7598_v57, 0.0  ;;  %v9801_v57 = vld [vmem:[#allocation77_spill] sm:$0xff] }
 0x6ef   :  { %v2860_v56 = vpop.f32.mrb[182].mxu1 }
 0x6f0   :  { %v3035_v6 = vmul.f32 %v2860_v56, %v9780_v7  ;;  %v2862_v4 = vpop.f32.mrb[183].mxu1  ;;  %v3098_v27 = vadd.f32 %v3034_v58, %v9782_v39 }
 0x6f1   :  { %v9797_v4 = vld [vmem:[#allocation76_spill] sm:$0xff] }
 0x6f2   :  { %v3099_v11 = vadd.f32 %v3035_v6, %v9784_v48  ;;  %v9799_v48 = vld [vmem:[#allocation125_spill] sm:$0xff] }
 0x6f4   :  { %v3149_v29 = vpack.c.bf16 %v3099_v11, %v3098_v27  ;;  %v9798_v27 = vmax.f32 %v7623_v46, 0.0  ;;  %v9800_v11 = vmax.f32 %v9799_v48, 0.0 }
 0x6f5   :  { %v2865_v38 = vpop.f32.mrb[184].mxu1 }
 0x6f6   :  { %v3036_v45 = vmul.f32 %v2865_v38, %v9785_v61  ;;  %v2867_v44 = vpop.f32.mrb[185].mxu1  ;;  %5171 = vmatmul.mubr.bf16.gmra.mrb[152].mxu0 %v3149_v29 }
 0x6f7   :  { %v2868_v42 = vpop.f32.mrb[186].mxu1 }
 0x6f8   :  { %v3037_v22 = vmul.f32 %v2868_v42, %v9786_v63  ;;  %v2870_v14 = vpop.f32.mrb[187].mxu1  ;;  %v3100_v54 = vadd.f32 %v3036_v45, %v9788_v16  ;;  %v9802_v63 = vld [vmem:[#allocation78_spill] sm:$0xff]  ;;  %v9804_v16 = vmax.f32 %v9803_v31, 0.0 }
 0x6fa   :  { %v3101_v0 = vadd.f32 %v3037_v22, %v9790_v47 }
 0x6fc   :  { %v3150_v59 = vpack.c.bf16 %v3101_v0, %v3100_v54 }
 0x6fd   :  { %v2873_v30 = vpop.f32.mrb[188].mxu1 }
 0x6fe   :  { %v3038_v24 = vmul.f32 %v2873_v30, %v9791_v40  ;;  %v2875_v52 = vpop.f32.mrb[189].mxu1  ;;  %5174 = vmatprep.mubr.bf16.mxu0 %v3150_v59  ;;  %v9806_v59 = vld [vmem:[#allocation79_spill] sm:$0xff] }
 0x6ff   :  { %v2876_v33 = vpop.f32.mrb[190].mxu1  ;;  %v9807_v52 = vld [vmem:[#allocation80_spill] sm:$0xff] }
 0x700   :  { %v3039_v23 = vmul.f32 %v2876_v33, %v9792_v26  ;;  %v2878_v53 = vpop.f32.mrb[191].mxu1  ;;  %v3102_v20 = vadd.f32 %v3038_v24, %v9794_v19  ;;  %v9810_v19 = vmax.f32 %v9809_v15, 0.0 }
 0x702   :  { %v3103_v43 = vadd.f32 %v3039_v23, %v9795_v36  ;;  %v9808_v23 = vmax.f32 %v7657_v12, 0.0 }
 0x704   :  { %v3151_v58 = vpack.c.bf16 %v3103_v43, %v3102_v20 }
 0x705   :  { %v2881_v18 = vpop.f32.mrb[192].mxu1 }
 0x706   :  { %v3040_v56 = vmul.f32 %v2881_v18, %v9796_v8  ;;  %v2883_v7 = vpop.f32.mrb[193].mxu1  ;;  %5175 = vmatmul.mubr.bf16.gmra.mrb[156].mxu0 %v3151_v58 }
 0x707   :  { %v2884_v6 = vpop.f32.mrb[194].mxu1 }
 0x708   :  { %v3041_v13 = vmul.f32 %v2884_v6, %v9797_v4  ;;  %v2886_v39 = vpop.f32.mrb[195].mxu1  ;;  %v3104_v62 = vadd.f32 %v3040_v56, %v9798_v27  ;;  %v9812_v56 = vld [vmem:[#allocation82_spill] sm:$0xff]  ;;  %v9813_v4 = vld [vmem:[#allocation128_spill] sm:$0xff]  ;;  %v9815_v27 = vmax.f32 %v7662_v55, 0.0  ;;  %v9821_v55 = vld [vmem:[#allocation85_spill] sm:$0xff] }
 0x70a   :  { %v3105_v29 = vadd.f32 %v3041_v13, %v9800_v11  ;;  %v9814_v13 = vmax.f32 %v9813_v4, 0.0  ;;  %v9816_v11 = vld [vmem:[#allocation83_spill] sm:$0xff] }
 0x70c   :  { %v3152_v38 = vpack.c.bf16 %v3105_v29, %v3104_v62 }
 0x70d   :  { %v2889_v61 = vpop.f32.mrb[196].mxu1 }
 0x70e   :  { %v3042_v45 = vmul.f32 %v2889_v61, %v9801_v57  ;;  %v2891_v44 = vpop.f32.mrb[197].mxu1  ;;  %5178 = vmatprep.mubr.bf16.mxu0 %v3152_v38  ;;  %v9817_v57 = vld [vmem:[#allocation84_spill] sm:$0xff] }
 0x70f   :  { %v2892_v42 = vpop.f32.mrb[198].mxu1 }
 0x710   :  { %v3043_v22 = vmul.f32 %v2892_v42, %v9802_v63  ;;  %v2894_v14 = vpop.f32.mrb[199].mxu1  ;;  %v3106_v54 = vadd.f32 %v3042_v45, %v9804_v16  ;;  %v9818_v42 = vmax.f32 %v7691_v60, 0.0 }
 0x712   :  { %v3107_v46 = vadd.f32 %v3043_v22, %v9805_v49  ;;  %v9819_v22 = vld [vmem:[#allocation129_spill] sm:$0xff] }
 0x713   :  { %v9820_v14 = vmax.f32 %v9819_v22, 0.0 }
 0x714   :  { %v3153_v47 = vpack.c.bf16 %v3107_v46, %v3106_v54 }
 0x715   :  { %v2897_v0 = vpop.f32.mrb[200].mxu1 }
 0x716   :  { %v3044_v30 = vmul.f32 %v2897_v0, %v9806_v59  ;;  %v2899_v40 = vpop.f32.mrb[201].mxu1  ;;  %5179 = vmatmul.mubr.bf16.gmra.mrb[160].mxu0 %v3153_v47  ;;  %v9822_v0 = vld [vmem:[#allocation86_spill] sm:$0xff] }
 0x717   :  { %v2900_v24 = vpop.f32.mrb[202].mxu1  ;;  %v9823_v40 = vld [vmem:[#allocation130_spill] sm:$0xff] }
 0x718   :  { %v3045_v33 = vmul.f32 %v2900_v24, %v9807_v52  ;;  %v2902_v26 = vpop.f32.mrb[203].mxu1  ;;  %v3108_v53 = vadd.f32 %v3044_v30, %v9808_v23  ;;  %v9824_v24 = vmax.f32 %v9823_v40, 0.0 }
 0x71a   :  { %v3109_v20 = vadd.f32 %v3045_v33, %v9810_v19  ;;  %v9825_v33 = vmax.f32 %v7696_v3, 0.0  ;;  %v9831_v3 = vld [vmem:[#allocation89_spill] sm:$0xff] }
 0x71c   :  { %v3154_v36 = vpack.c.bf16 %v3109_v20, %v3108_v53  ;;  %v9826_v53 = vld [vmem:[#allocation87_spill] sm:$0xff] }
 0x71d   :  { %v2905_v43 = vpop.f32.mrb[204].mxu1 }
 0x71e   :  { %v3046_v58 = vmul.f32 %v2905_v43, %v9811_v1  ;;  %v2907_v18 = vpop.f32.mrb[205].mxu1  ;;  %5182 = vmatprep.mubr.bf16.mxu0 %v3154_v36  ;;  %v9827_v36 = vld [vmem:[#allocation88_spill] sm:$0xff] }
 0x71f   :  { %v2908_v8 = vpop.f32.mrb[206].mxu1 }
 0x720   :  { %v3047_v7 = vmul.f32 %v2908_v8, %v9812_v56  ;;  %v2910_v6 = vpop.f32.mrb[207].mxu1  ;;  %v3110_v39 = vadd.f32 %v3046_v58, %v9814_v13  ;;  %v9828_v58 = vmax.f32 %v7725_v17, 0.0  ;;  %v9829_v8 = vld [vmem:[#allocation131_spill] sm:$0xff] }
 0x721   :  { %v9830_v56 = vmax.f32 %v9829_v8, 0.0 }
 0x722   :  { %v3111_v12 = vadd.f32 %v3047_v7, %v9815_v27 }
 0x724   :  { %v3155_v62 = vpack.c.bf16 %v3111_v12, %v3110_v39  ;;  %v9832_v12 = vld [vmem:[#allocation90_spill] sm:$0xff] }
 0x725   :  { %v2913_v48 = vpop.f32.mrb[208].mxu1 }
 0x726   :  { %v3048_v29 = vmul.f32 %v2913_v48, %v9816_v11  ;;  %v2915_v38 = vpop.f32.mrb[209].mxu1  ;;  %5183 = vmatmul.mubr.bf16.gmra.mrb[164].mxu0 %v3155_v62  ;;  %v9833_v11 = vld [vmem:[#allocation132_spill] sm:$0xff] }
 0x727   :  { %v2916_v61 = vpop.f32.mrb[210].mxu1 }
 0x728   :  { %v3049_v45 = vmul.f32 %v2916_v61, %v9817_v57  ;;  %v2918_v44 = vpop.f32.mrb[211].mxu1  ;;  %v3112_v63 = vadd.f32 %v3048_v29, %v9818_v42  ;;  %v9834_v29 = vmax.f32 %v9833_v11, 0.0  ;;  %v9835_v61 = vmax.f32 %v7730_v10, 0.0  ;;  %v9841_v10 = vld [vmem:[#allocation93_spill] sm:$0xff]  ;;  %v9852_v11 = vld [vmem:[#allocation98_spill] sm:$0xff] }
 0x729   :  { %v9836_v44 = vld [vmem:[#allocation91_spill] sm:$0xff] }
 0x72a   :  { %v3113_v31 = vadd.f32 %v3049_v45, %v9820_v14  ;;  %v9837_v14 = vld [vmem:[#allocation92_spill] sm:$0xff] }
 0x72c   :  { %v3156_v16 = vpack.c.bf16 %v3113_v31, %v3112_v63 }
 0x72d   :  { %v2921_v54 = vpop.f32.mrb[212].mxu1 }
 0x72e   :  { %v3050_v49 = vmul.f32 %v2921_v54, %v9821_v55  ;;  %v2923_v46 = vpop.f32.mrb[213].mxu1  ;;  %5186 = vmatprep.mubr.bf16.mxu0 %v3156_v16  ;;  %v9838_v54 = vmax.f32 %v7759_v32, 0.0 }
 0x72f   :  { %v2924_v47 = vpop.f32.mrb[214].mxu1 }
 0x730   :  { %v3051_v59 = vmul.f32 %v2924_v47, %v9822_v0  ;;  %v2926_v30 = vpop.f32.mrb[215].mxu1  ;;  %v3114_v52 = vadd.f32 %v3050_v49, %v9824_v24  ;;  %v9839_v49 = vld [vmem:[#allocation133_spill] sm:$0xff] }
 0x731   :  { %v9840_v46 = vmax.f32 %v9839_v49, 0.0 }
 0x732   :  { %v3115_v60 = vadd.f32 %v3051_v59, %v9825_v33 }
 0x734   :  { %v3157_v26 = vpack.c.bf16 %v3115_v60, %v3114_v52  ;;  %v9842_v52 = vld [vmem:[#allocation94_spill] sm:$0xff] }
 0x735   :  { %v2929_v23 = vpop.f32.mrb[216].mxu1 }
 0x736   :  { %v3052_v15 = vmul.f32 %v2929_v23, %v9826_v53  ;;  %v2931_v19 = vpop.f32.mrb[217].mxu1  ;;  %5187 = vmatmul.mubr.bf16.gmra.mrb[168].mxu0 %v3157_v26  ;;  %v9843_v26 = vld [vmem:[#allocation134_spill] sm:$0xff] }
 0x737   :  { %v2932_v20 = vpop.f32.mrb[218].mxu1  ;;  %v9844_v23 = vmax.f32 %v9843_v26, 0.0 }
 0x738   :  { %v3053_v43 = vmul.f32 %v2932_v20, %v9827_v36  ;;  %v2934_v1 = vpop.f32.mrb[219].mxu1  ;;  %v3116_v18 = vadd.f32 %v3052_v15, %v9828_v58  ;;  %v9845_v15 = vmax.f32 %v7764_v28, 0.0  ;;  %v9846_v36 = vld [vmem:[#allocation95_spill] sm:$0xff]  ;;  %v9851_v28 = vld [vmem:[#allocation97_spill] sm:$0xff] }
 0x73a   :  { %v3117_v7 = vadd.f32 %v3053_v43, %v9830_v56 }
 0x73c   :  { %v3158_v6 = vpack.c.bf16 %v3117_v7, %v3116_v18  ;;  %v9847_v18 = vld [vmem:[#allocation96_spill] sm:$0xff]  ;;  %v9848_v7 = vmax.f32 %v7793_v41, 0.0 }
 0x73d   :  { %v2937_v4 = vpop.f32.mrb[220].mxu1 }
 0x73e   :  { %v3054_v13 = vmul.f32 %v2937_v4, %v9831_v3  ;;  %v2939_v39 = vpop.f32.mrb[221].mxu1  ;;  %5190 = vmatprep.mubr.bf16.mxu0 %v3158_v6  ;;  %v9849_v4 = vld [vmem:[#allocation135_spill] sm:$0xff] }
 0x73f   :  { %v2940_v27 = vpop.f32.mrb[222].mxu1  ;;  %v9850_v3 = vmax.f32 %v9849_v4, 0.0 }
 0x740   :  { %v3055_v62 = vmul.f32 %v2940_v27, %v9832_v12  ;;  %v2942_v48 = vpop.f32.mrb[223].mxu1  ;;  %v3118_v38 = vadd.f32 %v3054_v13, %v9834_v29 }
 0x742   :  { %v3119_v17 = vadd.f32 %v3055_v62, %v9835_v61  ;;  %v9853_v61 = vld [vmem:[#allocation136_spill] sm:$0xff] }
 0x744   :  { %v3159_v57 = vpack.c.bf16 %v3119_v17, %v3118_v38  ;;  %v9854_v17 = vmax.f32 %v9853_v61, 0.0 }
 0x745   :  { %v2945_v45 = vpop.f32.mrb[224].mxu1 }
 0x746   :  { %v3056_v42 = vmul.f32 %v2945_v45, %v9836_v44  ;;  %v2947_v63 = vpop.f32.mrb[225].mxu1  ;;  %5191 = vmatmul.mubr.bf16.gmra.mrb[172].mxu0 %v3159_v57  ;;  %v9855_v45 = vmax.f32 %v7798_v9, 0.0 }
 0x747   :  { %v2948_v22 = vpop.f32.mrb[226].mxu1  ;;  %v9856_v63 = vld [vmem:[#allocation99_spill] sm:$0xff] }
 0x748   :  { %v3057_v31 = vmul.f32 %v2948_v22, %v9837_v14  ;;  %v2950_v16 = vpop.f32.mrb[227].mxu1  ;;  %v3120_v55 = vadd.f32 %v3056_v42, %v9838_v54  ;;  %v9857_v54 = vld [vmem:[#allocation100_spill] sm:$0xff] }
 0x749   :  { %v8253_v16 = vld [vmem:[%s9077_s8] ss:$0 sm:$0xff] }
 0x74a   :  { %v3121_v47 = vadd.f32 %v3057_v31, %v9840_v46 }
 0x74c   :  { %v3160_v0 = vpack.c.bf16 %v3121_v47, %v3120_v55  ;;  %v9858_v47 = vmax.f32 %v7827_v50, 0.0  ;;  %v9861_v50 = vld [vmem:[#allocation101_spill] sm:$0xff] }
 0x74d   :  { %v2953_v59 = vpop.f32.mrb[228].mxu1 }
 0x74e   :  { %v3058_v30 = vmul.f32 %v2953_v59, %v9841_v10  ;;  %v2955_v40 = vpop.f32.mrb[229].mxu1  ;;  %5194 = vmatprep.mubr.bf16.mxu0 %v3160_v0  ;;  %v9859_v0 = vld [vmem:[#allocation137_spill] sm:$0xff] }
 0x74f   :  { %v2956_v24 = vpop.f32.mrb[230].mxu1  ;;  %v9860_v59 = vmax.f32 %v9859_v0, 0.0 }
 0x750   :  { %v3059_v33 = vmul.f32 %v2956_v24, %v9842_v52  ;;  %v2958_v60 = vpop.f32.mrb[231].mxu1  ;;  %v3122_v53 = vadd.f32 %v3058_v30, %v9844_v23 }
 0x752   :  { %v3123_v32 = vadd.f32 %v3059_v33, %v9845_v15 }
 0x754   :  { %v3161_v19 = vpack.c.bf16 %v3123_v32, %v3122_v53 }
 0x755   :  { %v2961_v20 = vpop.f32.mrb[232].mxu1 }
 0x756   :  { %v3060_v43 = vmul.f32 %v2961_v20, %v9846_v36  ;;  %v2963_v1 = vpop.f32.mrb[233].mxu1  ;;  %5195 = vmatmul.mubr.bf16.gmra.mrb[176].mxu0 %v3161_v19 }
 0x757   :  { %v2964_v58 = vpop.f32.mrb[234].mxu1 }
 0x758   :  { %v3061_v8 = vmul.f32 %v2964_v58, %v9847_v18  ;;  %v2966_v56 = vpop.f32.mrb[235].mxu1  ;;  %v3124_v6 = vadd.f32 %v3060_v43, %v9848_v7  ;;  %v9862_v18 = vld [vmem:[#allocation102_spill] sm:$0xff] }
 0x75a   :  { %v3125_v13 = vadd.f32 %v3061_v8, %v9850_v3 }
 0x75c   :  { %v3162_v39 = vpack.c.bf16 %v3125_v13, %v3124_v6  ;;  %v9863_v6 = vld [vmem:[#allocation138_spill] sm:$0xff]  ;;  %v9865_v13 = vmax.f32 %v7832_v37, 0.0 }
 0x75d   :  { %v2969_v27 = vpop.f32.mrb[236].mxu1  ;;  %v9864_v4 = vmax.f32 %v9863_v6, 0.0 }
 0x75e   :  { %v3062_v12 = vmul.f32 %v2969_v27, %v9851_v28  ;;  %v2971_v62 = vpop.f32.mrb[237].mxu1  ;;  %5198 = vmatprep.mubr.bf16.mxu0 %v3162_v39 }
 0x75f   :  { %v2972_v48 = vpop.f32.mrb[238].mxu1 }
 0x760   :  { %v3063_v29 = vmul.f32 %v2972_v48, %v9852_v11  ;;  %v2974_v38 = vpop.f32.mrb[239].mxu1  ;;  %v3126_v57 = vadd.f32 %v3062_v12, %v9854_v17  ;;  %v9866_v12 = vld [vmem:[#allocation103_spill] sm:$0xff] }
 0x762   :  { %v3127_v41 = vadd.f32 %v3063_v29, %v9855_v45  ;;  %v9867_v29 = vld [vmem:[#allocation104_spill] sm:$0xff]  ;;  %v9868_v45 = vmax.f32 %v7869_v35, 0.0 }
 0x764   :  { %v3163_v44 = vpack.c.bf16 %v3127_v41, %v3126_v57 }
 0x765   :  { %v2977_v42 = vpop.f32.mrb[240].mxu1 }
 0x766   :  { %v3064_v22 = vmul.f32 %v2977_v42, %v9856_v63  ;;  %v2979_v14 = vpop.f32.mrb[241].mxu1  ;;  %5199 = vmatmul.mubr.bf16.gmra.mrb[180].mxu0 %v3163_v44 }
 0x767   :  { %v2980_v31 = vpop.f32.mrb[242].mxu1 }
 0x768   :  { %v3065_v55 = vmul.f32 %v2980_v31, %v9857_v54  ;;  %v2982_v49 = vpop.f32.mrb[243].mxu1  ;;  %v3128_v9 = vadd.f32 %v3064_v22, %v9858_v47 }
 0x769   :  { %v5148_v46 = vpop.f32.mrb[128].mxu0 }
 0x76a   :  { %v3129_v10 = vadd.f32 %v3065_v55, %v9860_v59  ;;  %v3282_v30 = vadd.f32 %v5148_v46, %v8253_v16  ;;  %v3273_v40 = vpop.f32.mrb[129].mxu0 }
 0x76b   :  { %v3274_v24 = vadd.f32 %v8253_v16, %v3273_v40  ;;  %v5149_v52 = vpop.f32.mrb[130].mxu0 }
 0x76c   :  { %v3285_v33 = vadd.f32 %v5149_v52, %v8253_v16  ;;  %v3276_v60 = vpop.f32.mrb[131].mxu0  ;;  %v3164_v26 = vpack.c.bf16 %v3129_v10, %v3128_v9  ;;  %v3530_v15 = vmax.f32 %v3282_v30, 0.0  ;;  %v9870_v10 = vld [vmem:[#allocation106_spill] sm:$0xff] }
 0x76d   :  { %v3277_v23 = vadd.f32 %v8253_v16, %v3276_v60  ;;  %v2985_v53 = vpop.f32.mrb[244].mxu1  ;;  %v3528_v36 = vmax.f32 %v3274_v24, 0.0 }
 0x76e   :  { %v3531_v32 = vmax.f32 %v3285_v33, 0.0  ;;  %v3066_v19 = vmul.f32 %v2985_v53, %v9861_v50  ;;  %v2987_v20 = vpop.f32.mrb[245].mxu1  ;;  %5202 = vmatprep.mubr.bf16.mxu1 %v3164_v26 }
 0x76f   :  { %v3529_v43 = vmax.f32 %v3277_v23, 0.0  ;;  %v2988_v1 = vpop.f32.mrb[246].mxu1 }
 0x770   :  { %v3593_v58 = vpack.c.bf16 %v3531_v32, %v3530_v15  ;;  %v3067_v8 = vmul.f32 %v2988_v1, %v9862_v18  ;;  %v2990_v56 = vpop.f32.mrb[247].mxu1  ;;  %v3130_v3 = vadd.f32 %v3066_v19, %v9864_v4 }
 0x771   :  { %v3592_v7 = vpack.c.bf16 %v3529_v43, %v3528_v36 }
 0x772   :  { %v3131_v39 = vadd.f32 %v3067_v8, %v9865_v13 }
 0x773   :  { %5226 = vmatprep.mubr.bf16.mxu0 %v3592_v7 }
 0x774   :  { %v3165_v27 = vpack.c.bf16 %v3131_v39, %v3130_v3  ;;  %5227 = vmatmul.mubr.bf16.vlgmr.msra.gmra.mrb[184].mxu0 %v3593_v58 }
 0x775   :  { %v2993_v28 = vpop.f32.mrb[248].mxu1 }
 0x776   :  { %v3068_v62 = vmul.f32 %v2993_v28, %v9866_v12  ;;  %v2995_v48 = vpop.f32.mrb[249].mxu1  ;;  %5203 = vmatmul.mubr.bf16.vlgmr.msra.gmra.mrb[0].mxu1 %v3165_v27 }
 0x777   :  { %v2996_v11 = vpop.f32.mrb[250].mxu1 }
 0x778   :  { %v3069_v38 = vmul.f32 %v2996_v11, %v9867_v29  ;;  %v2998_v61 = vpop.f32.mrb[251].mxu1  ;;  %v3132_v57 = vadd.f32 %v3068_v62, %v2394_v5 }
 0x779   :  { %v5152_v17 = vpop.f32.mrb[132].mxu0 }
 0x77a   :  { %v3133_v37 = vadd.f32 %v3069_v38, %v9868_v45  ;;  %v3298_v41 = vadd.f32 %v5152_v17, %v8253_v16  ;;  %v3289_v44 = vpop.f32.mrb[133].mxu0 }
 0x77b   :  { %v3290_v42 = vadd.f32 %v8253_v16, %v3289_v44  ;;  %v5153_v63 = vpop.f32.mrb[134].mxu0 }
 0x77c   :  { %v3301_v22 = vadd.f32 %v5153_v63, %v8253_v16  ;;  %v3292_v14 = vpop.f32.mrb[135].mxu0  ;;  %v3166_v31 = vpack.c.bf16 %v3133_v37, %v3132_v57  ;;  %v3534_v49 = vmax.f32 %v3298_v41, 0.0 }
 0x77d   :  { %v3293_v54 = vadd.f32 %v8253_v16, %v3292_v14  ;;  %v3001_v55 = vpop.f32.mrb[252].mxu1  ;;  %v3532_v35 = vmax.f32 %v3290_v42, 0.0 }
 0x77e   :  { %v3535_v46 = vmax.f32 %v3301_v22, 0.0  ;;  %v3070_v5 = vmul.f32 %v3001_v55, %v9869_v2  ;;  %v3003_v47 = vpop.f32.mrb[253].mxu1  ;;  %5206 = vmatprep.mubr.bf16.mxu1 %v3166_v31 }
 0x77f   :  { %v3533_v9 = vmax.f32 %v3293_v54, 0.0  ;;  %v3004_v0 = vpop.f32.mrb[254].mxu1 }
 0x780   :  { %v3595_v59 = vpack.c.bf16 %v3535_v46, %v3534_v49  ;;  %v3071_v30 = vmul.f32 %v3004_v0, %v9870_v10  ;;  %v3006_v40 = vpop.f32.mrb[255].mxu1  ;;  %v3134_v52 = vadd.f32 %v3070_v5, %v2396_v25 }
 0x781   :  { %v3594_v24 = vpack.c.bf16 %v3533_v9, %v3532_v35 }
 0x782   :  { %v3135_v33 = vadd.f32 %v3071_v30, %v2397_v51 }
 0x783   :  { %5230 = vmatprep.mubr.bf16.mxu0 %v3594_v24 }
 0x784   :  { %v3167_v60 = vpack.c.bf16 %v3135_v33, %v3134_v52  ;;  %5231 = vmatmul.mubr.bf16.gmra.mrb[188].mxu0 %v3595_v59 }
 0x786   :  { %5207 = vmatmul.mubr.bf16.gmra.mrb[4].mxu1 %v3167_v60 }
 0x789   :  { %v5156_v26 = vpop.f32.mrb[136].mxu0 }
 0x78a   :  { %v3314_v23 = vadd.f32 %v5156_v26, %v8253_v16  ;;  %v3305_v53 = vpop.f32.mrb[137].mxu0 }
 0x78b   :  { %v3306_v15 = vadd.f32 %v8253_v16, %v3305_v53  ;;  %v5157_v32 = vpop.f32.mrb[138].mxu0 }
 0x78c   :  { %v3317_v50 = vadd.f32 %v5157_v32, %v8253_v16  ;;  %v3308_v19 = vpop.f32.mrb[139].mxu0  ;;  %v3538_v25 = vmax.f32 %v3314_v23, 0.0 }
 0x78d   :  { %v3309_v34 = vadd.f32 %v8253_v16, %v3308_v19  ;;  %v3536_v21 = vmax.f32 %v3306_v15, 0.0 }
 0x78e   :  { %v3539_v20 = vmax.f32 %v3317_v50, 0.0 }
 0x78f   :  { %v3537_v51 = vmax.f32 %v3309_v34, 0.0 }
 0x790   :  { %v3597_v36 = vpack.c.bf16 %v3539_v20, %v3538_v25 }
 0x791   :  { %v3596_v43 = vpack.c.bf16 %v3537_v51, %v3536_v21 }
 0x793   :  { %5234 = vmatprep.mubr.bf16.mxu0 %v3596_v43 }
 0x794   :  { %5235 = vmatmul.mubr.bf16.gmra.mrb[192].mxu0 %v3597_v36 }
 0x799   :  { %v5160_v1 = vpop.f32.mrb[140].mxu0 }
 0x79a   :  { %v3330_v58 = vadd.f32 %v5160_v1, %v8253_v16  ;;  %v3321_v18 = vpop.f32.mrb[141].mxu0 }
 0x79b   :  { %v3322_v8 = vadd.f32 %v8253_v16, %v3321_v18  ;;  %v5161_v56 = vpop.f32.mrb[142].mxu0 }
 0x79c   :  { %v3333_v7 = vadd.f32 %v5161_v56, %v8253_v16  ;;  %v3324_v6 = vpop.f32.mrb[143].mxu0  ;;  %v3542_v3 = vmax.f32 %v3330_v58, 0.0 }
 0x79d   :  { %v3325_v4 = vadd.f32 %v8253_v16, %v3324_v6  ;;  %v3540_v39 = vmax.f32 %v3322_v8, 0.0 }
 0x79e   :  { %v3543_v13 = vmax.f32 %v3333_v7, 0.0 }
 0x79f   :  { %v3541_v27 = vmax.f32 %v3325_v4, 0.0 }
 0x7a0   :  { %v3599_v28 = vpack.c.bf16 %v3543_v13, %v3542_v3 }
 0x7a1   :  { %v3598_v12 = vpack.c.bf16 %v3541_v27, %v3540_v39 }
 0x7a3   :  { %5238 = vmatprep.mubr.bf16.mxu0 %v3598_v12 }
 0x7a4   :  { %5239 = vmatmul.mubr.bf16.gmra.mrb[196].mxu0 %v3599_v28 }
 0x7a9   :  { %v5164_v62 = vpop.f32.mrb[144].mxu0 }
 0x7aa   :  { %v3346_v48 = vadd.f32 %v5164_v62, %v8253_v16  ;;  %v3337_v11 = vpop.f32.mrb[145].mxu0 }
 0x7ab   :  { %v3338_v29 = vadd.f32 %v8253_v16, %v3337_v11  ;;  %v5165_v38 = vpop.f32.mrb[146].mxu0 }
 0x7ac   :  { %v3349_v61 = vadd.f32 %v5165_v38, %v8253_v16  ;;  %v3340_v17 = vpop.f32.mrb[147].mxu0  ;;  %v3546_v45 = vmax.f32 %v3346_v48, 0.0 }
 0x7ad   :  { %v3341_v57 = vadd.f32 %v8253_v16, %v3340_v17  ;;  %v3544_v41 = vmax.f32 %v3338_v29, 0.0 }
 0x7ae   :  { %v3547_v37 = vmax.f32 %v3349_v61, 0.0 }
 0x7af   :  { %v3545_v44 = vmax.f32 %v3341_v57, 0.0 }
 0x7b0   :  { %v3601_v42 = vpack.c.bf16 %v3547_v37, %v3546_v45 }
 0x7b1   :  { %v3600_v63 = vpack.c.bf16 %v3545_v44, %v3544_v41 }
 0x7b3   :  { %5242 = vmatprep.mubr.bf16.mxu0 %v3600_v63 }
 0x7b4   :  { %5243 = vmatmul.mubr.bf16.gmra.mrb[200].mxu0 %v3601_v42 }
 0x7b9   :  { %v5168_v22 = vpop.f32.mrb[148].mxu0 }
 0x7ba   :  { %v3362_v14 = vadd.f32 %v5168_v22, %v8253_v16  ;;  %v3353_v31 = vpop.f32.mrb[149].mxu0 }
 0x7bb   :  { %v3354_v54 = vadd.f32 %v8253_v16, %v3353_v31  ;;  %v5169_v55 = vpop.f32.mrb[150].mxu0 }
 0x7bc   :  { %v3365_v49 = vadd.f32 %v5169_v55, %v8253_v16  ;;  %v3356_v46 = vpop.f32.mrb[151].mxu0  ;;  %v3550_v5 = vmax.f32 %v3362_v14, 0.0 }
 0x7bd   :  { %v3357_v2 = vadd.f32 %v8253_v16, %v3356_v46  ;;  %v3548_v35 = vmax.f32 %v3354_v54, 0.0 }
 0x7be   :  { %v3551_v47 = vmax.f32 %v3365_v49, 0.0 }
 0x7bf   :  { %v3549_v9 = vmax.f32 %v3357_v2, 0.0 }
 0x7c0   :  { %v3603_v0 = vpack.c.bf16 %v3551_v47, %v3550_v5 }
 0x7c1   :  { %v3602_v59 = vpack.c.bf16 %v3549_v9, %v3548_v35 }
 0x7c3   :  { %5246 = vmatprep.mubr.bf16.mxu0 %v3602_v59 }
 0x7c4   :  { %5247 = vmatmul.mubr.bf16.gmra.mrb[204].mxu0 %v3603_v0 }
 0x7c9   :  { %v5172_v10 = vpop.f32.mrb[152].mxu0 }
 0x7ca   :  { %v3378_v30 = vadd.f32 %v5172_v10, %v8253_v16  ;;  %v3369_v40 = vpop.f32.mrb[153].mxu0 }
 0x7cb   :  { %v3370_v24 = vadd.f32 %v8253_v16, %v3369_v40  ;;  %v5173_v52 = vpop.f32.mrb[154].mxu0 }
 0x7cc   :  { %v3381_v33 = vadd.f32 %v5173_v52, %v8253_v16  ;;  %v3372_v60 = vpop.f32.mrb[155].mxu0  ;;  %v3554_v23 = vmax.f32 %v3378_v30, 0.0 }
 0x7cd   :  { %v3373_v26 = vadd.f32 %v8253_v16, %v3372_v60  ;;  %v3552_v15 = vmax.f32 %v3370_v24, 0.0 }
 0x7ce   :  { %v3555_v53 = vmax.f32 %v3381_v33, 0.0 }
 0x7cf   :  { %v3553_v32 = vmax.f32 %v3373_v26, 0.0 }
 0x7d0   :  { %v3605_v50 = vpack.c.bf16 %v3555_v53, %v3554_v23 }
 0x7d1   :  { %v3604_v19 = vpack.c.bf16 %v3553_v32, %v3552_v15 }
 0x7d3   :  { %5250 = vmatprep.mubr.bf16.mxu0 %v3604_v19 }
 0x7d4   :  { %5251 = vmatmul.mubr.bf16.gmra.mrb[208].mxu0 %v3605_v50 }
 0x7d9   :  { %v5176_v34 = vpop.f32.mrb[156].mxu0 }
 0x7da   :  { %v3394_v25 = vadd.f32 %v5176_v34, %v8253_v16  ;;  %v3385_v20 = vpop.f32.mrb[157].mxu0 }
 0x7db   :  { %v3386_v21 = vadd.f32 %v8253_v16, %v3385_v20  ;;  %v5177_v51 = vpop.f32.mrb[158].mxu0 }
 0x7dc   :  { %v3397_v36 = vadd.f32 %v5177_v51, %v8253_v16  ;;  %v3388_v43 = vpop.f32.mrb[159].mxu0  ;;  %v3558_v58 = vmax.f32 %v3394_v25, 0.0 }
 0x7dd   :  { %v3389_v1 = vadd.f32 %v8253_v16, %v3388_v43  ;;  %v3556_v8 = vmax.f32 %v3386_v21, 0.0 }
 0x7de   :  { %v3559_v18 = vmax.f32 %v3397_v36, 0.0 }
 0x7df   :  { %v3557_v56 = vmax.f32 %v3389_v1, 0.0 }
 0x7e0   :  { %v3607_v7 = vpack.c.bf16 %v3559_v18, %v3558_v58 }
 0x7e1   :  { %v3606_v6 = vpack.c.bf16 %v3557_v56, %v3556_v8 }
 0x7e3   :  { %5254 = vmatprep.mubr.bf16.mxu0 %v3606_v6 }
 0x7e4   :  { %5255 = vmatmul.mubr.bf16.gmra.mrb[212].mxu0 %v3607_v7 }
 0x7e9   :  { %v5180_v4 = vpop.f32.mrb[160].mxu0 }
 0x7ea   :  { %v3410_v3 = vadd.f32 %v5180_v4, %v8253_v16  ;;  %v3401_v13 = vpop.f32.mrb[161].mxu0 }
 0x7eb   :  { %v3402_v39 = vadd.f32 %v8253_v16, %v3401_v13  ;;  %v5181_v27 = vpop.f32.mrb[162].mxu0 }
 0x7ec   :  { %v3413_v28 = vadd.f32 %v5181_v27, %v8253_v16  ;;  %v3404_v12 = vpop.f32.mrb[163].mxu0  ;;  %v3562_v48 = vmax.f32 %v3410_v3, 0.0 }
 0x7ed   :  { %v3405_v62 = vadd.f32 %v8253_v16, %v3404_v12  ;;  %v3560_v29 = vmax.f32 %v3402_v39, 0.0 }
 0x7ee   :  { %v3563_v11 = vmax.f32 %v3413_v28, 0.0 }
 0x7ef   :  { %v3561_v38 = vmax.f32 %v3405_v62, 0.0 }
 0x7f0   :  { %v3609_v61 = vpack.c.bf16 %v3563_v11, %v3562_v48 }
 0x7f1   :  { %v3608_v17 = vpack.c.bf16 %v3561_v38, %v3560_v29 }
 0x7f3   :  { %5258 = vmatprep.mubr.bf16.mxu0 %v3608_v17 }
 0x7f4   :  { %5259 = vmatmul.mubr.bf16.gmra.mrb[216].mxu0 %v3609_v61 }
 0x7f9   :  { %v5184_v57 = vpop.f32.mrb[164].mxu0 }
 0x7fa   :  { %v3426_v45 = vadd.f32 %v5184_v57, %v8253_v16  ;;  %v3417_v37 = vpop.f32.mrb[165].mxu0 }
 0x7fb   :  { %v3418_v41 = vadd.f32 %v8253_v16, %v3417_v37  ;;  %v5185_v44 = vpop.f32.mrb[166].mxu0 }
 0x7fc   :  { %v3429_v42 = vadd.f32 %v5185_v44, %v8253_v16  ;;  %v3420_v63 = vpop.f32.mrb[167].mxu0  ;;  %v3566_v14 = vmax.f32 %v3426_v45, 0.0 }
 0x7fd   :  { %v3421_v22 = vadd.f32 %v8253_v16, %v3420_v63  ;;  %v3564_v54 = vmax.f32 %v3418_v41, 0.0 }
 0x7fe   :  { %v3567_v31 = vmax.f32 %v3429_v42, 0.0  ;;  %v3984_v42 = vlaneseq }
 0x7ff   :  { %v3565_v55 = vmax.f32 %v3421_v22, 0.0 }
 0x800   :  { %v3611_v49 = vpack.c.bf16 %v3567_v31, %v3566_v14  ;;  %v8334_v14 = vand.u32 127, %v3984_v42  ;;  %v8339_v31 = vld [vmem:[%s9079_s10] ss:$0 sm:$0xff]  ;;  %s6077_s10 = smov [#allocation11]  }
 0x801   :  { %v3610_v46 = vpack.c.bf16 %v3565_v55, %v3564_v54  ;;  %s4760_s20 = sshll.u32 %s6077_s10, 4  ;;  %s4761_s20 = int_to_ptr.vmem [resolvable:$true] %s4760_s20 }
 0x802   :  { %vm3986_vm0 = vcmp.lt.s32.totalorder %v8334_v14, 8  ;;  %s6037_s21 = scalar_lea.vmem %s4761_s20, 8192  ;;  %p6042_p13 = scmp.lt.s32.totalorder %s4761_s20, %s4761_s20 }
 0x803   :  { %5262 = vmatprep.mubr.bf16.mxu0 %v3610_v46  ;;  %p6038_p12 = scmp.ne.s32.totalorder %s4761_s20, %s6037_s21  ;;  %p6043_p0 = scmp.lt.s32.totalorder %s6037_s21, %s6037_s21 }
 0x804   :  { %5263 = vmatmul.mubr.bf16.gmra.mrb[220].mxu0 %v3611_v49 }
 0x805   :  { %p6044_p1 = por %p6043_p0, %p6042_p13 }
 0x807   :  { %p6045_p2 = pnand %p6044_p1, %p6038_p12 }
 0x809   :  { %v5188_v2 = vpop.f32.mrb[168].mxu0 }
 0x80a   :  { %v3442_v5 = vadd.f32 %v5188_v2, %v8253_v16  ;;  %v3433_v47 = vpop.f32.mrb[169].mxu0 }
 0x80b   :  { %v3434_v35 = vadd.f32 %v8253_v16, %v3433_v47  ;;  %v5189_v9 = vpop.f32.mrb[170].mxu0 }
 0x80c   :  { %v3445_v0 = vadd.f32 %v5189_v9, %v8253_v16  ;;  %v3436_v59 = vpop.f32.mrb[171].mxu0  ;;  %v3570_v30 = vmax.f32 %v3442_v5, 0.0 }
 0x80d   :  { %v3437_v10 = vadd.f32 %v8253_v16, %v3436_v59  ;;  %v3568_v24 = vmax.f32 %v3434_v35, 0.0 }
 0x80e   :  { %v3571_v40 = vmax.f32 %v3445_v0, 0.0 }
 0x80f   :  { %v3569_v52 = vmax.f32 %v3437_v10, 0.0 }
 0x810   :  { %v3613_v33 = vpack.c.bf16 %v3571_v40, %v3570_v30 }
 0x811   :  { %v3612_v60 = vpack.c.bf16 %v3569_v52, %v3568_v24 }
 0x813   :  { %5266 = vmatprep.mubr.bf16.mxu0 %v3612_v60 }
 0x814   :  { %5267 = vmatmul.mubr.bf16.gmra.mrb[224].mxu0 %v3613_v33 }
 0x819   :  { %v5192_v26 = vpop.f32.mrb[172].mxu0 }
 0x81a   :  { %v3458_v23 = vadd.f32 %v5192_v26, %v8253_v16  ;;  %v3449_v53 = vpop.f32.mrb[173].mxu0 }
 0x81b   :  { %v3450_v15 = vadd.f32 %v8253_v16, %v3449_v53  ;;  %v5193_v32 = vpop.f32.mrb[174].mxu0 }
 0x81c   :  { %v3461_v50 = vadd.f32 %v5193_v32, %v8253_v16  ;;  %v3452_v19 = vpop.f32.mrb[175].mxu0  ;;  %v3574_v25 = vmax.f32 %v3458_v23, 0.0 }
 0x81d   :  { %v3453_v34 = vadd.f32 %v8253_v16, %v3452_v19  ;;  %v3572_v21 = vmax.f32 %v3450_v15, 0.0 }
 0x81e   :  { %v3575_v20 = vmax.f32 %v3461_v50, 0.0 }
 0x81f   :  { %v3573_v51 = vmax.f32 %v3453_v34, 0.0 }
 0x820   :  { %v3615_v36 = vpack.c.bf16 %v3575_v20, %v3574_v25 }
 0x821   :  { %v3614_v43 = vpack.c.bf16 %v3573_v51, %v3572_v21 }
 0x823   :  { %5270 = vmatprep.mubr.bf16.mxu0 %v3614_v43 }
 0x824   :  { %5271 = vmatmul.mubr.bf16.gmra.mrb[228].mxu0 %v3615_v36 }
 0x829   :  { %v5196_v1 = vpop.f32.mrb[176].mxu0 }
 0x82a   :  { %v3474_v58 = vadd.f32 %v5196_v1, %v8253_v16  ;;  %v3465_v18 = vpop.f32.mrb[177].mxu0 }
 0x82b   :  { %v3466_v8 = vadd.f32 %v8253_v16, %v3465_v18  ;;  %v5197_v56 = vpop.f32.mrb[178].mxu0 }
 0x82c   :  { %v3477_v7 = vadd.f32 %v5197_v56, %v8253_v16  ;;  %v3468_v6 = vpop.f32.mrb[179].mxu0  ;;  %v3578_v3 = vmax.f32 %v3474_v58, 0.0 }
 0x82d   :  { %v3469_v4 = vadd.f32 %v8253_v16, %v3468_v6  ;;  %v3576_v39 = vmax.f32 %v3466_v8, 0.0 }
 0x82e   :  { %v3579_v13 = vmax.f32 %v3477_v7, 0.0 }
 0x82f   :  { %v3577_v27 = vmax.f32 %v3469_v4, 0.0 }
 0x830   :  { %v3617_v28 = vpack.c.bf16 %v3579_v13, %v3578_v3 }
 0x831   :  { %v3616_v12 = vpack.c.bf16 %v3577_v27, %v3576_v39 }
 0x833   :  { %5274 = vmatprep.mubr.bf16.mxu0 %v3616_v12 }
 0x834   :  { %5275 = vmatmul.mubr.bf16.gmra.mrb[232].mxu0 %v3617_v28 }
 0x839   :  { %v5200_v62 = vpop.f32.mrb[180].mxu0 }
 0x83a   :  { %v3490_v48 = vadd.f32 %v5200_v62, %v8253_v16  ;;  %v3481_v11 = vpop.f32.mrb[181].mxu0 }
 0x83b   :  { %v3482_v29 = vadd.f32 %v8253_v16, %v3481_v11  ;;  %v5201_v38 = vpop.f32.mrb[182].mxu0 }
 0x83c   :  { %v3493_v61 = vadd.f32 %v5201_v38, %v8253_v16  ;;  %v3484_v17 = vpop.f32.mrb[183].mxu0  ;;  %v3582_v45 = vmax.f32 %v3490_v48, 0.0 }
 0x83d   :  { %v3485_v57 = vadd.f32 %v8253_v16, %v3484_v17  ;;  %v3580_v41 = vmax.f32 %v3482_v29, 0.0 }
 0x83e   :  { %v3583_v37 = vmax.f32 %v3493_v61, 0.0 }
 0x83f   :  { %v3581_v44 = vmax.f32 %v3485_v57, 0.0 }
 0x840   :  { %v3619_v63 = vpack.c.bf16 %v3583_v37, %v3582_v45 }
 0x841   :  { %v3618_v22 = vpack.c.bf16 %v3581_v44, %v3580_v41 }
 0x843   :  { %5278 = vmatprep.mubr.bf16.mxu0 %v3618_v22 }
 0x844   :  { %5279 = vmatmul.mubr.bf16.gmra.mrb[236].mxu0 %v3619_v63 }
 0x847   :  { %v5228_v54 = vpop.f32.mrb[184].mxu0 }
 0x848   :  { %v3738_v55 = vadd.f32 %v5228_v54, %v8339_v31  ;;  %v3729_v49 = vpop.f32.mrb[185].mxu0 }
 0x849   :  { %v5204_v46 = vpop.f32.mrb[0].mxu1  ;;  %v5229_v2 = vpop.f32.mrb[186].mxu0  ;;  %v3730_v5 = vadd.f32 %v8339_v31, %v3729_v49 }
 0x84a   :  { %v3506_v47 = vadd.f32 %v5204_v46, %v8253_v16  ;;  %v3497_v35 = vpop.f32.mrb[1].mxu1  ;;  %v3732_v9 = vpop.f32.mrb[187].mxu0  ;;  %v8347_v0 = vsel %vm3986_vm0, %v3738_v55, -1e+30  ;;  %v3741_v26 = vadd.f32 %v5229_v2, %v8339_v31 }
 0x84b   :  { %v3498_v59 = vadd.f32 %v8253_v16, %v3497_v35  ;;  %v3733_v10 = vadd.f32 %v8339_v31, %v3732_v9  ;;  %v5205_v30 = vpop.f32.mrb[2].mxu1  ;;  %4055 = vmax.xlane.f32.xlu0 %v8347_v0  ;;  %v8362_v53 = vsel %vm3986_vm0, %v3730_v5, -1e+30 }
 0x84c   :  { %v3509_v40 = vadd.f32 %v5205_v30, %v8253_v16  ;;  %v3500_v24 = vpop.f32.mrb[3].mxu1  ;;  %v3586_v60 = vmax.f32 %v3506_v47, 0.0  ;;  %v8367_v34 = vsel %vm3986_vm0, %v3741_v26, -1e+30 }
 0x84d   :  { %v3501_v52 = vadd.f32 %v8253_v16, %v3500_v24  ;;  %v8356_v33 = vsel %vm3986_vm0, %v3733_v10, -1e+30  ;;  %v3584_v15 = vmax.f32 %v3498_v59, 0.0 }
 0x84e   :  { %v3587_v23 = vmax.f32 %v3509_v40, 0.0  ;;  %4053 = vmax.xlane.f32.xlu1 %v8356_v33 }
 0x84f   :  { %v3585_v32 = vmax.f32 %v3501_v52, 0.0  ;;  %4051 = vmax.xlane.f32.xlu0 %v8362_v53 }
 0x850   :  { %v3621_v50 = vpack.c.bf16 %v3587_v23, %v3586_v60 }
 0x851   :  { %v3620_v19 = vpack.c.bf16 %v3585_v32, %v3584_v15 }
 0x853   :  { %5282 = vmatprep.mubr.bf16.mxu0 %v3620_v19  ;;  %4057 = vmax.xlane.f32.xlu0 %v8367_v34 }
 0x854   :  { %5283 = vmatmul.mubr.bf16.gmra.mrb[240].mxu0 %v3621_v50 }
 0x857   :  { %v5232_v25 = vpop.f32.mrb[188].mxu0 }
 0x858   :  { %v3754_v20 = vadd.f32 %v5232_v25, %v8339_v31  ;;  %v3745_v21 = vpop.f32.mrb[189].mxu0 }
 0x859   :  { %v5208_v51 = vpop.f32.mrb[4].mxu1  ;;  %v5233_v36 = vpop.f32.mrb[190].mxu0  ;;  %v3746_v43 = vadd.f32 %v8339_v31, %v3745_v21 }
 0x85a   :  { %v3522_v1 = vadd.f32 %v5208_v51, %v8253_v16  ;;  %v3757_v58 = vadd.f32 %v5233_v36, %v8339_v31  ;;  %v3513_v18 = vpop.f32.mrb[5].mxu1  ;;  %v3748_v8 = vpop.f32.mrb[191].mxu0  ;;  %v8376_v56 = vsel %vm3986_vm0, %v3754_v20, -1e+30 }
 0x85b   :  { %v3514_v7 = vadd.f32 %v8253_v16, %v3513_v18  ;;  %v5209_v6 = vpop.f32.mrb[6].mxu1  ;;  %4063 = vmax.xlane.f32.xlu1 %v8376_v56  ;;  %v3749_v4 = vadd.f32 %v8339_v31, %v3748_v8  ;;  %v8390_v62 = vsel %vm3986_vm0, %v3746_v43, -1e+30 }
 0x85c   :  { %v3525_v3 = vadd.f32 %v5209_v6, %v8253_v16  ;;  %v3516_v13 = vpop.f32.mrb[7].mxu1  ;;  %v8384_v39 = vsel %vm3986_vm0, %v3757_v58, -1e+30  ;;  %v3590_v28 = vmax.f32 %v3522_v1, 0.0 }
 0x85d   :  { %v3517_v27 = vadd.f32 %v8253_v16, %v3516_v13  ;;  %4065 = vmax.xlane.f32.xlu0 %v8384_v39  ;;  %v3588_v48 = vmax.f32 %v3514_v7, 0.0  ;;  %v8395_v38 = vsel %vm3986_vm0, %v3749_v4, -1e+30 }
 0x85e   :  { %v3591_v12 = vmax.f32 %v3525_v3, 0.0 }
 0x85f   :  { %v3589_v11 = vmax.f32 %v3517_v27, 0.0  ;;  %4059 = vmax.xlane.f32.xlu1 %v8390_v62 }
 0x860   :  { %v3623_v29 = vpack.c.bf16 %v3591_v12, %v3590_v28 }
 0x861   :  { %v3622_v61 = vpack.c.bf16 %v3589_v11, %v3588_v48  ;;  %4061 = vmax.xlane.f32.xlu0 %v8395_v38 }
 0x863   :  { %5286 = vmatprep.mubr.bf16.mxu0 %v3622_v61 }
 0x864   :  { %5287 = vmatmul.mubr.bf16.gmra.mrb[244].mxu0 %v3623_v29 }
 0x867   :  { %v5236_v16 = vpop.f32.mrb[192].mxu0 }
 0x868   :  { %v3770_v17 = vadd.f32 %v5236_v16, %v8339_v31  ;;  %v3761_v57 = vpop.f32.mrb[193].mxu0 }
 0x869   :  { %v5237_v45 = vpop.f32.mrb[194].mxu0  ;;  %v3762_v37 = vadd.f32 %v8339_v31, %v3761_v57 }
 0x86a   :  { %v3773_v41 = vadd.f32 %v5237_v45, %v8339_v31  ;;  %v3764_v44 = vpop.f32.mrb[195].mxu0  ;;  %v8403_v42 = vsel %vm3986_vm0, %v3770_v17, -1e+30 }
 0x86b   :  { %4071 = vmax.xlane.f32.xlu1 %v8403_v42  ;;  %v3765_v63 = vadd.f32 %v8339_v31, %v3764_v44  ;;  %v8414_v54 = vsel %vm3986_vm0, %v3762_v37, -1e+30 }
 0x86c   :  { %v8409_v22 = vsel %vm3986_vm0, %v3773_v41, -1e+30 }
 0x86d   :  { %4073 = vmax.xlane.f32.xlu0 %v8409_v22  ;;  %v8419_v55 = vsel %vm3986_vm0, %v3765_v63, -1e+30 }
 0x86f   :  { %4067 = vmax.xlane.f32.xlu1 %v8414_v54 }
 0x871   :  { %4069 = vmax.xlane.f32.xlu0 %v8419_v55 }
 0x877   :  { %v5240_v49 = vpop.f32.mrb[196].mxu0 }
 0x878   :  { %v3786_v46 = vadd.f32 %v5240_v49, %v8339_v31  ;;  %v3777_v2 = vpop.f32.mrb[197].mxu0 }
 0x879   :  { %v5241_v5 = vpop.f32.mrb[198].mxu0  ;;  %v3778_v47 = vadd.f32 %v8339_v31, %v3777_v2 }
 0x87a   :  { %v3789_v35 = vadd.f32 %v5241_v5, %v8339_v31  ;;  %v3780_v9 = vpop.f32.mrb[199].mxu0  ;;  %v8427_v59 = vsel %vm3986_vm0, %v3786_v46, -1e+30 }
 0x87b   :  { %4079 = vmax.xlane.f32.xlu1 %v8427_v59  ;;  %v3781_v10 = vadd.f32 %v8339_v31, %v3780_v9  ;;  %v8438_v40 = vsel %vm3986_vm0, %v3778_v47, -1e+30 }
 0x87c   :  { %v8433_v30 = vsel %vm3986_vm0, %v3789_v35, -1e+30 }
 0x87d   :  { %4081 = vmax.xlane.f32.xlu0 %v8433_v30  ;;  %v8443_v24 = vsel %vm3986_vm0, %v3781_v10, -1e+30 }
 0x87f   :  { %4075 = vmax.xlane.f32.xlu1 %v8438_v40 }
 0x881   :  { %4077 = vmax.xlane.f32.xlu0 %v8443_v24 }
 0x887   :  { %v5244_v52 = vpop.f32.mrb[200].mxu0 }
 0x888   :  { %v3802_v60 = vadd.f32 %v5244_v52, %v8339_v31  ;;  %v3793_v26 = vpop.f32.mrb[201].mxu0 }
 0x889   :  { %v5245_v23 = vpop.f32.mrb[202].mxu0  ;;  %v3794_v15 = vadd.f32 %v8339_v31, %v3793_v26 }
 0x88a   :  { %v3805_v32 = vadd.f32 %v5245_v23, %v8339_v31  ;;  %v3796_v50 = vpop.f32.mrb[203].mxu0  ;;  %v8451_v19 = vsel %vm3986_vm0, %v3802_v60, -1e+30 }
 0x88b   :  { %4087 = vmax.xlane.f32.xlu1 %v8451_v19  ;;  %v3797_v25 = vadd.f32 %v8339_v31, %v3796_v50  ;;  %v8462_v21 = vsel %vm3986_vm0, %v3794_v15, -1e+30 }
 0x88c   :  { %v8457_v20 = vsel %vm3986_vm0, %v3805_v32, -1e+30 }
 0x88d   :  { %4089 = vmax.xlane.f32.xlu0 %v8457_v20  ;;  %v8467_v51 = vsel %vm3986_vm0, %v3797_v25, -1e+30 }
 0x88f   :  { %4083 = vmax.xlane.f32.xlu1 %v8462_v21 }
 0x891   :  { %4085 = vmax.xlane.f32.xlu0 %v8467_v51 }
 0x897   :  { %v5248_v36 = vpop.f32.mrb[204].mxu0 }
 0x898   :  { %v3818_v43 = vadd.f32 %v5248_v36, %v8339_v31  ;;  %v3809_v1 = vpop.f32.mrb[205].mxu0 }
 0x899   :  { %v5249_v58 = vpop.f32.mrb[206].mxu0  ;;  %v3810_v18 = vadd.f32 %v8339_v31, %v3809_v1 }
 0x89a   :  { %v3821_v8 = vadd.f32 %v5249_v58, %v8339_v31  ;;  %v3812_v7 = vpop.f32.mrb[207].mxu0  ;;  %v8475_v6 = vsel %vm3986_vm0, %v3818_v43, -1e+30 }
 0x89b   :  { %4095 = vmax.xlane.f32.xlu1 %v8475_v6  ;;  %v3813_v4 = vadd.f32 %v8339_v31, %v3812_v7  ;;  %v8486_v13 = vsel %vm3986_vm0, %v3810_v18, -1e+30 }
 0x89c   :  { %v8481_v3 = vsel %vm3986_vm0, %v3821_v8, -1e+30 }
 0x89d   :  { %4097 = vmax.xlane.f32.xlu0 %v8481_v3  ;;  %v8491_v27 = vsel %vm3986_vm0, %v3813_v4, -1e+30 }
 0x89f   :  { %4091 = vmax.xlane.f32.xlu1 %v8486_v13 }
 0x8a1   :  { %4093 = vmax.xlane.f32.xlu0 %v8491_v27 }
 0x8a7   :  { %v5252_v28 = vpop.f32.mrb[208].mxu0 }
 0x8a8   :  { %v3834_v12 = vadd.f32 %v5252_v28, %v8339_v31  ;;  %v3825_v48 = vpop.f32.mrb[209].mxu0 }
 0x8a9   :  { %v5253_v11 = vpop.f32.mrb[210].mxu0  ;;  %v3826_v29 = vadd.f32 %v8339_v31, %v3825_v48 }
 0x8aa   :  { %v3837_v61 = vadd.f32 %v5253_v11, %v8339_v31  ;;  %v3828_v16 = vpop.f32.mrb[211].mxu0  ;;  %v8499_v17 = vsel %vm3986_vm0, %v3834_v12, -1e+30 }
 0x8ab   :  { %4103 = vmax.xlane.f32.xlu1 %v8499_v17  ;;  %v3829_v57 = vadd.f32 %v8339_v31, %v3828_v16  ;;  %v8510_v37 = vsel %vm3986_vm0, %v3826_v29, -1e+30 }
 0x8ac   :  { %v8505_v45 = vsel %vm3986_vm0, %v3837_v61, -1e+30 }
 0x8ad   :  { %4105 = vmax.xlane.f32.xlu0 %v8505_v45  ;;  %v8515_v41 = vsel %vm3986_vm0, %v3829_v57, -1e+30 }
 0x8af   :  { %4099 = vmax.xlane.f32.xlu1 %v8510_v37 }
 0x8b1   :  { %4101 = vmax.xlane.f32.xlu0 %v8515_v41 }
 0x8b7   :  { %v5256_v44 = vpop.f32.mrb[212].mxu0 }
 0x8b8   :  { %v3850_v63 = vadd.f32 %v5256_v44, %v8339_v31  ;;  %v3841_v49 = vpop.f32.mrb[213].mxu0 }
 0x8b9   :  { %v5257_v46 = vpop.f32.mrb[214].mxu0  ;;  %v3842_v2 = vadd.f32 %v8339_v31, %v3841_v49 }
 0x8ba   :  { %v3853_v5 = vadd.f32 %v5257_v46, %v8339_v31  ;;  %v3844_v47 = vpop.f32.mrb[215].mxu0  ;;  %v8523_v35 = vsel %vm3986_vm0, %v3850_v63, -1e+30 }
 0x8bb   :  { %4111 = vmax.xlane.f32.xlu1 %v8523_v35  ;;  %v3845_v9 = vadd.f32 %v8339_v31, %v3844_v47  ;;  %v8534_v52 = vsel %vm3986_vm0, %v3842_v2, -1e+30 }
 0x8bc   :  { %v8529_v10 = vsel %vm3986_vm0, %v3853_v5, -1e+30 }
 0x8bd   :  { %4113 = vmax.xlane.f32.xlu0 %v8529_v10  ;;  %v8539_v60 = vsel %vm3986_vm0, %v3845_v9, -1e+30 }
 0x8bf   :  { %4107 = vmax.xlane.f32.xlu1 %v8534_v52 }
 0x8c1   :  { %4109 = vmax.xlane.f32.xlu0 %v8539_v60 }
 0x8c7   :  { %v5260_v26 = vpop.f32.mrb[216].mxu0 }
 0x8c8   :  { %v3866_v23 = vadd.f32 %v5260_v26, %v8339_v31  ;;  %v3857_v15 = vpop.f32.mrb[217].mxu0 }
 0x8c9   :  { %v5261_v32 = vpop.f32.mrb[218].mxu0  ;;  %v3858_v50 = vadd.f32 %v8339_v31, %v3857_v15 }
 0x8ca   :  { %v3869_v25 = vadd.f32 %v5261_v32, %v8339_v31  ;;  %v3860_v36 = vpop.f32.mrb[219].mxu0  ;;  %v8547_v43 = vsel %vm3986_vm0, %v3866_v23, -1e+30 }
 0x8cb   :  { %4119 = vmax.xlane.f32.xlu1 %v8547_v43  ;;  %v3861_v1 = vadd.f32 %v8339_v31, %v3860_v36  ;;  %v8558_v18 = vsel %vm3986_vm0, %v3858_v50, -1e+30 }
 0x8cc   :  { %v8553_v58 = vsel %vm3986_vm0, %v3869_v25, -1e+30 }
 0x8cd   :  { %4121 = vmax.xlane.f32.xlu0 %v8553_v58  ;;  %v8563_v8 = vsel %vm3986_vm0, %v3861_v1, -1e+30 }
 0x8cf   :  { %4115 = vmax.xlane.f32.xlu1 %v8558_v18 }
 0x8d1   :  { %4117 = vmax.xlane.f32.xlu0 %v8563_v8 }
 0x8d7   :  { %v5264_v7 = vpop.f32.mrb[220].mxu0 }
 0x8d8   :  { %v3882_v4 = vadd.f32 %v5264_v7, %v8339_v31  ;;  %v4056_v28 = vpop.xlane.xlu0 %4055  ;;  %v3873_v12 = vpop.f32.mrb[221].mxu0 }
 0x8d9   :  { %v8568_v48 = vsub.f32 %v8347_v0, %v4056_v28  ;;  %v5265_v11 = vpop.f32.mrb[222].mxu0  ;;  %v3874_v29 = vadd.f32 %v8339_v31, %v3873_v12 }
 0x8da   :  { %v3885_v61 = vadd.f32 %v5265_v11, %v8339_v31  ;;  %v3876_v16 = vpop.f32.mrb[223].mxu0  ;;  %v8574_v57 = vsel %vm3986_vm0, %v3882_v4, -1e+30 }
 0x8db   :  { %v4247_v44 = vmul.f32 1.442695, %v8568_v48  ;;  %4127 = vmax.xlane.f32.xlu1 %v8574_v57  ;;  %v3877_v63 = vadd.f32 %v8339_v31, %v3876_v16  ;;  %v4054_v2 = vpop.xlane.xlu1 %4053  ;;  %v8589_v5 = vsel %vm3986_vm0, %v3874_v29, -1e+30 }
 0x8dc   :  { %v4052_v49 = vpop.xlane.xlu0 %4051  ;;  %v8581_v0 = vsel %vm3986_vm0, %v3885_v61, -1e+30  ;;  %v8598_v23 = vsub.f32 %v8356_v33, %v4054_v2 }
 0x8dd   :  { %5607 = vpow2.f32 %v4247_v44  ;;  %v8584_v46 = vsub.f32 %v8362_v53, %v4052_v49  ;;  %4129 = vmax.xlane.f32.xlu0 %v8581_v0  ;;  %v8595_v26 = vsel %vm3986_vm0, %v3877_v63, -1e+30 }
 0x8de   :  { %v4245_v32 = vmul.f32 1.442695, %v8598_v23 }
 0x8df   :  { %v4243_v47 = vmul.f32 1.442695, %v8584_v46  ;;  %4123 = vmax.xlane.f32.xlu1 %v8589_v5 }
 0x8e0   :  { %v4058_v9 = vpop.xlane.xlu0 %4057 }
 0x8e1   :  { %5609 = vpow2.f32 %v4243_v47  ;;  %v8601_v53 = vsub.f32 %v8367_v34, %v4058_v9  ;;  %4125 = vmax.xlane.f32.xlu0 %v8595_v26 }
 0x8e3   :  { %v4249_v15 = vmul.f32 1.442695, %v8601_v53 }
 0x8e5   :  { %5611 = vpow2.f32 %v4249_v15 }
 0x8e6   :  { %5613 = vpow2.f32 %v4245_v32 }
 0x8e7   :  { %v5608_v50 = vpop.eup %5607  ;;  %v5268_v25 = vpop.f32.mrb[224].mxu0 }
 0x8e8   :  { %v3889_v36 = vpop.f32.mrb[225].mxu0  ;;  %4375 = vadd.xlane.f32.xlu1 %v5608_v50  ;;  %v4064_v1 = vpop.xlane.xlu1 %4063  ;;  %v3898_v12 = vadd.f32 %v5268_v25, %v8339_v31 }
 0x8e9   :  { %v8607_v33 = vsub.f32 %v8376_v56, %v4064_v1  ;;  %v5269_v7 = vpop.f32.mrb[226].mxu0  ;;  %v3890_v63 = vadd.f32 %v8339_v31, %v3889_v36 }
 0x8ea   :  { %v3892_v4 = vpop.f32.mrb[227].mxu0  ;;  %v4066_v34 = vpop.xlane.xlu0 %4065  ;;  %v8621_v2 = vsel %vm3986_vm0, %v3898_v12, -1e+30  ;;  %v3901_v9 = vadd.f32 %v5269_v7, %v8339_v31 }
 0x8eb   :  { %v5610_v28 = vpop.eup %5609  ;;  %v4255_v11 = vmul.f32 1.442695, %v8607_v33  ;;  %v8612_v61 = vsub.f32 %v8384_v39, %v4066_v34  ;;  %v8631_v15 = vsel %vm3986_vm0, %v3890_v63, -1e+30  ;;  %v3893_v25 = vadd.f32 %v8339_v31, %v3892_v4 }
 0x8ec   :  { %v4060_v29 = vpop.xlane.xlu1 %4059  ;;  %4371 = vadd.xlane.f32.xlu1 %v5610_v28 }
 0x8ed   :  { %5615 = vpow2.f32 %v4255_v11  ;;  %v8615_v16 = vsub.f32 %v8390_v62, %v4060_v29  ;;  %v4257_v47 = vmul.f32 1.442695, %v8612_v61 }
 0x8ee   :  { %v4062_v44 = vpop.xlane.xlu0 %4061 }
 0x8ef   :  { %v5612_v56 = vpop.eup %5611  ;;  %v4251_v49 = vmul.f32 1.442695, %v8615_v16  ;;  %v8626_v39 = vsub.f32 %v8395_v38, %v4062_v44  ;;  %v8638_v38 = vsel %vm3986_vm0, %v3901_v9, -1e+30 }
 0x8f0   :  { %4135 = vmax.xlane.f32.xlu1 %v8621_v2  ;;  %4377 = vadd.xlane.f32.xlu0 %v5612_v56  ;;  %v5614_v62 = vpop.eup %5613  ;;  %v8648_v56 = vsel %vm3986_vm0, %v3893_v25, -1e+30 }
 0x8f1   :  { %5617 = vpow2.f32 %v4251_v49  ;;  %v4253_v32 = vmul.f32 1.442695, %v8626_v39 }
 0x8f2   :  { %5619 = vpow2.f32 %v4257_v47 }
 0x8f3   :  { %5621 = vpow2.f32 %v4253_v32 }
 0x8f4   :  { %4131 = vmax.xlane.f32.xlu1 %v8631_v15  ;;  %4373 = vadd.xlane.f32.xlu0 %v5614_v62 }
 0x8f7   :  { %v5616_v50 = vpop.eup %5615  ;;  %v5272_v36 = vpop.f32.mrb[228].mxu0 }
 0x8f8   :  { %v3905_v1 = vpop.f32.mrb[229].mxu0  ;;  %v4072_v7 = vpop.xlane.xlu1 %4071  ;;  %4383 = vadd.xlane.f32.xlu1 %v5616_v50  ;;  %4137 = vmax.xlane.f32.xlu0 %v8638_v38  ;;  %v3914_v4 = vadd.f32 %v5272_v36, %v8339_v31 }
 0x8f9   :  { %v8642_v34 = vsub.f32 %v8403_v42, %v4072_v7  ;;  %v5273_v28 = vpop.f32.mrb[230].mxu0  ;;  %v3906_v9 = vadd.f32 %v8339_v31, %v3905_v1 }
 0x8fa   :  { %v3908_v12 = vpop.f32.mrb[231].mxu0  ;;  %v4074_v11 = vpop.xlane.xlu0 %4073  ;;  %v8661_v50 = vsel %vm3986_vm0, %v3914_v4, -1e+30  ;;  %v3917_v36 = vadd.f32 %v5273_v28, %v8339_v31 }
 0x8fb   :  { %v5618_v29 = vpop.eup %5617  ;;  %v4263_v44 = vmul.f32 1.442695, %v8642_v34  ;;  %v8652_v42 = vsub.f32 %v8409_v22, %v4074_v11  ;;  %v8671_v1 = vsel %vm3986_vm0, %v3906_v9, -1e+30 }
 0x8fc   :  { %v4068_v63 = vpop.xlane.xlu1 %4067  ;;  %4379 = vadd.xlane.f32.xlu1 %v5618_v29  ;;  %4133 = vmax.xlane.f32.xlu0 %v8648_v56  ;;  %v5620_v62 = vpop.eup %5619  ;;  %v3909_v29 = vadd.f32 %v8339_v31, %v3908_v12 }
 0x8fd   :  { %5623 = vpow2.f32 %v4263_v44  ;;  %v8655_v49 = vsub.f32 %v8414_v54, %v4068_v63  ;;  %v4265_v25 = vmul.f32 1.442695, %v8652_v42  ;;  %v5622_v54 = vpop.eup %5621 }
 0x8fe   :  { %v4070_v47 = vpop.xlane.xlu0 %4069 }
 0x8ff   :  { %v4259_v32 = vmul.f32 1.442695, %v8655_v49  ;;  %v8666_v22 = vsub.f32 %v8419_v55, %v4070_v47  ;;  %v8678_v55 = vsel %vm3986_vm0, %v3917_v36, -1e+30 }
 0x900   :  { %4143 = vmax.xlane.f32.xlu1 %v8661_v50  ;;  %4385 = vadd.xlane.f32.xlu0 %v5620_v62 }
 0x901   :  { %5625 = vpow2.f32 %v4259_v32  ;;  %v4261_v7 = vmul.f32 1.442695, %v8666_v22 }
 0x902   :  { %5627 = vpow2.f32 %v4265_v25 }
 0x903   :  { %5629 = vpow2.f32 %v4261_v7 }
 0x904   :  { %4139 = vmax.xlane.f32.xlu1 %v8671_v1  ;;  %4381 = vadd.xlane.f32.xlu0 %v5622_v54  ;;  %v8688_v54 = vsel %vm3986_vm0, %v3909_v29, -1e+30 }
 0x907   :  { %v5624_v11 = vpop.eup %5623  ;;  %v5276_v4 = vpop.f32.mrb[232].mxu0 }
 0x908   :  { %v3921_v44 = vpop.f32.mrb[233].mxu0  ;;  %v4080_v28 = vpop.xlane.xlu1 %4079  ;;  %4391 = vadd.xlane.f32.xlu1 %v5624_v11  ;;  %4145 = vmax.xlane.f32.xlu0 %v8678_v55  ;;  %v3930_v12 = vadd.f32 %v5276_v4, %v8339_v31 }
 0x909   :  { %v8682_v63 = vsub.f32 %v8427_v59, %v4080_v28  ;;  %v5277_v47 = vpop.f32.mrb[234].mxu0  ;;  %v3922_v4 = vadd.f32 %v8339_v31, %v3921_v44 }
 0x90a   :  { %v3924_v62 = vpop.f32.mrb[235].mxu0  ;;  %v4082_v9 = vpop.xlane.xlu0 %4081  ;;  %v8701_v29 = vsel %vm3986_vm0, %v3930_v12, -1e+30 }
 0x90b   :  { %9871 = vst [vmem:[#allocation16_spill] sm:$0xff] %v8682_v63  ;;  %v5626_v32 = vpop.eup %5625  ;;  %v4271_v25 = vmul.f32 1.442695, %v8682_v63  ;;  %v8692_v59 = vsub.f32 %v8433_v30, %v4082_v9  ;;  %v3933_v9 = vadd.f32 %v5277_v47, %v8339_v31  ;;  %v8711_v44 = vsel %vm3986_vm0, %v3922_v4, -1e+30 }
 0x90c   :  { %v4076_v36 = vpop.xlane.xlu1 %4075  ;;  %4387 = vadd.xlane.f32.xlu1 %v5626_v32  ;;  %4141 = vmax.xlane.f32.xlu0 %v8688_v54  ;;  %v5628_v28 = vpop.eup %5627 }
 0x90d   :  { %5631 = vpow2.f32 %v4271_v25  ;;  %9872 = vst [vmem:[#allocation17_spill] sm:$0xff] %v8692_v59  ;;  %v8695_v7 = vsub.f32 %v8438_v40, %v4076_v36  ;;  %v4273_v32 = vmul.f32 1.442695, %v8692_v59  ;;  %v5630_v40 = vpop.eup %5629  ;;  %v3925_v36 = vadd.f32 %v8339_v31, %v3924_v62 }
 0x90e   :  { %v4078_v11 = vpop.xlane.xlu0 %4077 }
 0x90f   :  { %9873 = vst [vmem:[#allocation18_spill] sm:$0xff] %v8695_v7  ;;  %v4267_v63 = vmul.f32 1.442695, %v8695_v7  ;;  %v8706_v30 = vsub.f32 %v8443_v24, %v4078_v11  ;;  %v8718_v24 = vsel %vm3986_vm0, %v3933_v9, -1e+30 }
 0x910   :  { %4151 = vmax.xlane.f32.xlu1 %v8701_v29  ;;  %4393 = vadd.xlane.f32.xlu0 %v5628_v28  ;;  %v8728_v9 = vsel %vm3986_vm0, %v3925_v36, -1e+30 }
 0x911   :  { %5633 = vpow2.f32 %v4267_v63  ;;  %9874 = vst [vmem:[#allocation19_spill] sm:$0xff] %v8706_v30  ;;  %v4269_v12 = vmul.f32 1.442695, %v8706_v30 }
 0x912   :  { %5635 = vpow2.f32 %v4273_v32 }
 0x913   :  { %5637 = vpow2.f32 %v4269_v12 }
 0x914   :  { %4147 = vmax.xlane.f32.xlu1 %v8711_v44  ;;  %4389 = vadd.xlane.f32.xlu0 %v5630_v40 }
 0x917   :  { %v5632_v25 = vpop.eup %5631  ;;  %v5280_v63 = vpop.f32.mrb[236].mxu0 }
 0x918   :  { %v3937_v11 = vpop.f32.mrb[237].mxu0  ;;  %v4088_v47 = vpop.xlane.xlu1 %4087  ;;  %4399 = vadd.xlane.f32.xlu1 %v5632_v25  ;;  %4153 = vmax.xlane.f32.xlu0 %v8718_v24  ;;  %v3946_v62 = vadd.f32 %v5280_v63, %v8339_v31 }
 0x919   :  { %v8722_v28 = vsub.f32 %v8451_v19, %v4088_v47  ;;  %v5281_v4 = vpop.f32.mrb[238].mxu0  ;;  %v3938_v63 = vadd.f32 %v8339_v31, %v3937_v11 }
 0x91a   :  { %v3940_v32 = vpop.f32.mrb[239].mxu0  ;;  %v4090_v40 = vpop.xlane.xlu0 %4089  ;;  %v8741_v36 = vsel %vm3986_vm0, %v3946_v62, -1e+30 }
 0x91b   :  { %9875 = vst [vmem:[#allocation20_spill] sm:$0xff] %v8722_v28  ;;  %v5634_v30 = vpop.eup %5633  ;;  %v4279_v59 = vmul.f32 1.442695, %v8722_v28  ;;  %v8732_v19 = vsub.f32 %v8457_v20, %v4090_v40  ;;  %v3941_v62 = vadd.f32 %v8339_v31, %v3940_v32 }
 0x91c   :  { %v4084_v7 = vpop.xlane.xlu1 %4083  ;;  %4395 = vadd.xlane.f32.xlu1 %v5634_v30  ;;  %4149 = vmax.xlane.f32.xlu0 %v8728_v9  ;;  %v5636_v47 = vpop.eup %5635  ;;  %v8751_v30 = vsel %vm3986_vm0, %v3938_v63, -1e+30 }
 0x91d   :  { %5639 = vpow2.f32 %v4279_v59  ;;  %9876 = vst [vmem:[#allocation21_spill] sm:$0xff] %v8732_v19  ;;  %v8735_v12 = vsub.f32 %v8462_v21, %v4084_v7  ;;  %v4281_v59 = vmul.f32 1.442695, %v8732_v19  ;;  %v5638_v21 = vpop.eup %5637  ;;  %v3949_v7 = vadd.f32 %v5281_v4, %v8339_v31 }
 0x91e   :  { %v4086_v25 = vpop.xlane.xlu0 %4085 }
 0x91f   :  { %9877 = vst [vmem:[#allocation22_spill] sm:$0xff] %v8735_v12  ;;  %v4275_v28 = vmul.f32 1.442695, %v8735_v12  ;;  %v8746_v20 = vsub.f32 %v8467_v51, %v4086_v25  ;;  %v8758_v51 = vsel %vm3986_vm0, %v3949_v7, -1e+30 }
 0x920   :  { %4159 = vmax.xlane.f32.xlu1 %v8741_v36  ;;  %4401 = vadd.xlane.f32.xlu0 %v5636_v47 }
 0x921   :  { %5641 = vpow2.f32 %v4275_v28  ;;  %9878 = vst [vmem:[#allocation23_spill] sm:$0xff] %v8746_v20  ;;  %v4277_v11 = vmul.f32 1.442695, %v8746_v20  ;;  %v8764_v20 = vsel %vm3986_vm0, %v3941_v62, -1e+30 }
 0x922   :  { %5643 = vpow2.f32 %v4281_v59  ;;  %9879 = vst [vmem:[#allocation24_spill] sm:$0xff] %v8764_v20 }
 0x923   :  { %5645 = vpow2.f32 %v4277_v11 }
 0x924   :  { %4155 = vmax.xlane.f32.xlu1 %v8751_v30  ;;  %4397 = vadd.xlane.f32.xlu0 %v5638_v21 }
 0x927   :  { %v5640_v40 = vpop.eup %5639  ;;  %v5284_v28 = vpop.f32.mrb[240].mxu0 }
 0x928   :  { %v3953_v25 = vpop.f32.mrb[241].mxu0  ;;  %v4096_v4 = vpop.xlane.xlu1 %4095  ;;  %4407 = vadd.xlane.f32.xlu1 %v5640_v40  ;;  %4161 = vmax.xlane.f32.xlu0 %v8758_v51  ;;  %v3962_v59 = vadd.f32 %v5284_v28, %v8339_v31 }
 0x929   :  { %v5285_v47 = vpop.f32.mrb[242].mxu0  ;;  %v3954_v40 = vadd.f32 %v8339_v31, %v3953_v25  ;;  %v8782_v25 = vsub.f32 %v8475_v6, %v4096_v4 }
 0x92a   :  { %v3956_v63 = vpop.f32.mrb[243].mxu0  ;;  %v4098_v32 = vpop.xlane.xlu0 %4097  ;;  %v8770_v11 = vsel %vm3986_vm0, %v3962_v59, -1e+30 }
 0x92b   :  { %v5642_v21 = vpop.eup %5641  ;;  %9882 = vst [vmem:[#allocation27_spill] sm:$0xff] %v8782_v25 }
 0x92c   :  { %4403 = vadd.xlane.f32.xlu1 %v5642_v21  ;;  %4157 = vmax.xlane.f32.xlu0 %v8764_v20  ;;  %v4092_v7 = vpop.xlane.xlu1 %4091  ;;  %v5644_v19 = vpop.eup %5643  ;;  %v3965_v21 = vadd.f32 %v5285_v47, %v8339_v31  ;;  %v8779_v20 = vsel %vm3986_vm0, %v3954_v40, -1e+30  ;;  %v4287_v40 = vmul.f32 1.442695, %v8782_v25 }
 0x92d   :  { %v8773_v12 = vsub.f32 %v8486_v13, %v4092_v7  ;;  %v5646_v28 = vpop.eup %5645  ;;  %9881 = vst [vmem:[#allocation26_spill] sm:$0xff] %v8779_v20 }
 0x92e   :  { %v4094_v62 = vpop.xlane.xlu0 %4093  ;;  %v8792_v47 = vsel %vm3986_vm0, %v3965_v21, -1e+30 }
 0x92f   :  { %9880 = vst [vmem:[#allocation25_spill] sm:$0xff] %v8773_v12  ;;  %v4283_v59 = vmul.f32 1.442695, %v8773_v12  ;;  %v8787_v13 = vsub.f32 %v8491_v27, %v4094_v62 }
 0x930   :  { %4167 = vmax.xlane.f32.xlu1 %v8770_v11  ;;  %4409 = vadd.xlane.f32.xlu0 %v5644_v19  ;;  %v3957_v19 = vadd.f32 %v8339_v31, %v3956_v63 }
 0x931   :  { %5647 = vpow2.f32 %v4283_v59  ;;  %v4285_v27 = vmul.f32 1.442695, %v8787_v13 }
 0x932   :  { %5649 = vpow2.f32 %v4287_v40 }
 0x933   :  { %5651 = vpow2.f32 %v4285_v27 }
 0x934   :  { %4163 = vmax.xlane.f32.xlu1 %v8779_v20  ;;  %4405 = vadd.xlane.f32.xlu0 %v5646_v28  ;;  %v8798_v28 = vsub.f32 %v8481_v3, %v4098_v32  ;;  %v8813_v3 = vsel %vm3986_vm0, %v3957_v19, -1e+30 }
 0x936   :  { %v4289_v32 = vmul.f32 1.442695, %v8798_v28 }
 0x937   :  { %v5288_v7 = vpop.f32.mrb[244].mxu0 }
 0x938   :  { %v3978_v6 = vadd.f32 %v5288_v7, %v8339_v31  ;;  %v3969_v4 = vpop.f32.mrb[245].mxu0  ;;  %v4104_v12 = vpop.xlane.xlu1 %4103  ;;  %4169 = vmax.xlane.f32.xlu0 %v8792_v47 }
 0x939   :  { %v8802_v63 = vsub.f32 %v8499_v17, %v4104_v12  ;;  %v5289_v62 = vpop.f32.mrb[246].mxu0  ;;  %v3970_v21 = vadd.f32 %v8339_v31, %v3969_v4 }
 0x93a   :  { %v3972_v20 = vpop.f32.mrb[247].mxu0  ;;  %v4106_v25 = vpop.xlane.xlu0 %4105  ;;  %v8807_v59 = vsel %vm3986_vm0, %v3978_v6, -1e+30  ;;  %v3981_v7 = vadd.f32 %v5289_v62, %v8339_v31 }
 0x93b   :  { %9883 = vst [vmem:[#allocation28_spill] sm:$0xff] %v8802_v63  ;;  %4175 = vmax.xlane.f32.xlu1 %v8807_v59  ;;  %v4295_v17 = vmul.f32 1.442695, %v8802_v63  ;;  %v8819_v6 = vsub.f32 %v8505_v45, %v4106_v25  ;;  %v8826_v19 = vsel %vm3986_vm0, %v3970_v21, -1e+30  ;;  %v3973_v40 = vadd.f32 %v8339_v31, %v3972_v20  ;;  %v5648_v27 = vpop.eup %5647 }
 0x93c   :  { %v4100_v12 = vpop.xlane.xlu1 %4099  ;;  %4165 = vmax.xlane.f32.xlu0 %v8813_v3  ;;  %v8832_v63 = vsel %vm3986_vm0, %v3981_v7, -1e+30  ;;  %v5650_v21 = vpop.eup %5649 }
 0x93d   :  { %v8822_v4 = vsub.f32 %v8510_v37, %v4100_v12  ;;  %5653 = vpow2.f32 %v4295_v17  ;;  %v4297_v37 = vmul.f32 1.442695, %v8819_v6  ;;  %v8842_v31 = vsel %vm3986_vm0, %v3973_v40, -1e+30  ;;  %v5652_v7 = vpop.eup %5651 }
 0x93e   :  { %v4102_v62 = vpop.xlane.xlu0 %4101  ;;  %5655 = vpow2.f32 %v4289_v32 }
 0x93f   :  { %4171 = vmax.xlane.f32.xlu1 %v8826_v19  ;;  %v4291_v45 = vmul.f32 1.442695, %v8822_v4  ;;  %v8838_v25 = vsub.f32 %v8515_v41, %v4102_v62 }
 0x940   :  { %4177 = vmax.xlane.f32.xlu0 %v8832_v63 }
 0x941   :  { %5657 = vpow2.f32 %v4291_v45  ;;  %v4293_v20 = vmul.f32 1.442695, %v8838_v25 }
 0x942   :  { %5659 = vpow2.f32 %v4297_v37 }
 0x943   :  { %4411 = vadd.xlane.f32.xlu1 %v5648_v27  ;;  %5661 = vpow2.f32 %v4293_v20 }
 0x944   :  { %4173 = vmax.xlane.f32.xlu0 %v8842_v31 }
 0x947   :  { %4415 = vadd.xlane.f32.xlu1 %v5650_v21  ;;  %v5654_v12 = vpop.eup %5653 }
 0x948   :  { %v4112_v17 = vpop.xlane.xlu1 %4111  ;;  %4413 = vadd.xlane.f32.xlu0 %v5652_v7  ;;  %v5656_v14 = vpop.eup %5655 }
 0x949   :  { %v8847_v41 = vsub.f32 %v8523_v35, %v4112_v17 }
 0x94a   :  { %v4114_v32 = vpop.xlane.xlu0 %4113 }
 0x94b   :  { %v4303_v62 = vmul.f32 1.442695, %v8847_v41  ;;  %v8851_v40 = vsub.f32 %v8529_v10, %v4114_v32  ;;  %4423 = vadd.xlane.f32.xlu1 %v5654_v12  ;;  %v5658_v20 = vpop.eup %5657 }
 0x94c   :  { %v4108_v45 = vpop.xlane.xlu1 %4107  ;;  %4417 = vadd.xlane.f32.xlu0 %v5656_v14  ;;  %v5660_v21 = vpop.eup %5659 }
 0x94d   :  { %5663 = vpow2.f32 %v4303_v62  ;;  %v4305_v37 = vmul.f32 1.442695, %v8851_v40  ;;  %v8855_v27 = vsub.f32 %v8534_v52, %v4108_v45  ;;  %v5662_v12 = vpop.eup %5661 }
 0x94e   :  { %v4110_v35 = vpop.xlane.xlu0 %4109 }
 0x94f   :  { %5665 = vpow2.f32 %v4305_v37  ;;  %v4299_v7 = vmul.f32 1.442695, %v8855_v27  ;;  %v8859_v17 = vsub.f32 %v8539_v60, %v4110_v35  ;;  %4419 = vadd.xlane.f32.xlu1 %v5658_v20 }
 0x950   :  { %4425 = vadd.xlane.f32.xlu0 %v5660_v21 }
 0x951   :  { %5667 = vpow2.f32 %v4299_v7  ;;  %v4301_v10 = vmul.f32 1.442695, %v8859_v17 }
 0x953   :  { %5669 = vpow2.f32 %v4301_v10 }
 0x954   :  { %4421 = vadd.xlane.f32.xlu0 %v5662_v12 }
 0x957   :  { %v5664_v32 = vpop.eup %5663 }
 0x958   :  { %v4120_v52 = vpop.xlane.xlu1 %4119  ;;  %4431 = vadd.xlane.f32.xlu1 %v5664_v32 }
 0x959   :  { %v5666_v14 = vpop.eup %5665  ;;  %v8863_v62 = vsub.f32 %v8547_v43, %v4120_v52 }
 0x95a   :  { %4433 = vadd.xlane.f32.xlu0 %v5666_v14  ;;  %v4122_v45 = vpop.xlane.xlu0 %4121 }
 0x95b   :  { %v5668_v37 = vpop.eup %5667  ;;  %v4311_v60 = vmul.f32 1.442695, %v8863_v62  ;;  %v8867_v20 = vsub.f32 %v8553_v58, %v4122_v45 }
 0x95c   :  { %v4116_v35 = vpop.xlane.xlu1 %4115  ;;  %4427 = vadd.xlane.f32.xlu1 %v5668_v37 }
 0x95d   :  { %v5670_v21 = vpop.eup %5669  ;;  %5671 = vpow2.f32 %v4311_v60  ;;  %v4313_v7 = vmul.f32 1.442695, %v8867_v20  ;;  %v8871_v10 = vsub.f32 %v8558_v18, %v4116_v35 }
 0x95e   :  { %4429 = vadd.xlane.f32.xlu0 %v5670_v21  ;;  %v4118_v43 = vpop.xlane.xlu0 %4117 }
 0x95f   :  { %5673 = vpow2.f32 %v4313_v7  ;;  %v4307_v12 = vmul.f32 1.442695, %v8871_v10  ;;  %v8875_v32 = vsub.f32 %v8563_v8, %v4118_v43 }
 0x961   :  { %5675 = vpow2.f32 %v4307_v12  ;;  %v4309_v58 = vmul.f32 1.442695, %v8875_v32 }
 0x963   :  { %5677 = vpow2.f32 %v4309_v58 }
 0x967   :  { %v5672_v52 = vpop.eup %5671 }
 0x968   :  { %v4128_v14 = vpop.xlane.xlu1 %4127  ;;  %4439 = vadd.xlane.f32.xlu1 %v5672_v52 }
 0x969   :  { %v5674_v45 = vpop.eup %5673  ;;  %v8879_v37 = vsub.f32 %v8574_v57, %v4128_v14 }
 0x96a   :  { %4441 = vadd.xlane.f32.xlu0 %v5674_v45  ;;  %v4130_v18 = vpop.xlane.xlu0 %4129 }
 0x96b   :  { %v5676_v60 = vpop.eup %5675  ;;  %v4319_v35 = vmul.f32 1.442695, %v8879_v37  ;;  %v8883_v21 = vsub.f32 %v8581_v0, %v4130_v18 }
 0x96c   :  { %v4124_v8 = vpop.xlane.xlu1 %4123  ;;  %4435 = vadd.xlane.f32.xlu1 %v5676_v60 }
 0x96d   :  { %v5678_v7 = vpop.eup %5677  ;;  %5679 = vpow2.f32 %v4319_v35  ;;  %v4321_v43 = vmul.f32 1.442695, %v8883_v21  ;;  %v8887_v12 = vsub.f32 %v8589_v5, %v4124_v8 }
 0x96e   :  { %4437 = vadd.xlane.f32.xlu0 %v5678_v7  ;;  %v4126_v57 = vpop.xlane.xlu0 %4125 }
 0x96f   :  { %5681 = vpow2.f32 %v4321_v43  ;;  %v4315_v58 = vmul.f32 1.442695, %v8887_v12  ;;  %v8891_v52 = vsub.f32 %v8595_v26, %v4126_v57 }
 0x971   :  { %5683 = vpow2.f32 %v4315_v58  ;;  %v4317_v0 = vmul.f32 1.442695, %v8891_v52 }
 0x973   :  { %5685 = vpow2.f32 %v4317_v0 }
 0x975   :  { %v4376_v14 = vpop.xlane.xlu1 %4375 }
 0x976   :  { %5687 = vlog2.f32 %v4376_v14 }
 0x977   :  { %v5680_v45 = vpop.eup %5679 }
 0x978   :  { %4447 = vadd.xlane.f32.xlu1 %v5680_v45 }
 0x979   :  { %v5682_v18 = vpop.eup %5681  ;;  %v4372_v60 = vpop.xlane.xlu1 %4371 }
 0x97a   :  { %5689 = vlog2.f32 %v4372_v60  ;;  %4449 = vadd.xlane.f32.xlu0 %v5682_v18 }
 0x97b   :  { %v5684_v5 = vpop.eup %5683 }
 0x97c   :  { %4443 = vadd.xlane.f32.xlu1 %v5684_v5 }
 0x97d   :  { %v5686_v35 = vpop.eup %5685  ;;  %v4136_v8 = vpop.xlane.xlu1 %4135 }
 0x97e   :  { %v4378_v7 = vpop.xlane.xlu0 %4377  ;;  %v8895_v26 = vsub.f32 %v8621_v2, %v4136_v8  ;;  %4445 = vadd.xlane.f32.xlu0 %v5686_v35 }
 0x97f   :  { %5691 = vlog2.f32 %v4378_v7 }
 0x980   :  { %v5688_v43 = vpop.eup %5687  ;;  %v4327_v57 = vmul.f32 1.442695, %v8895_v26 }
 0x981   :  { %v4504_v58 = vmul.f32 0.6931472, %v5688_v43  ;;  %v4132_v0 = vpop.xlane.xlu1 %4131 }
 0x982   :  { %v4374_v14 = vpop.xlane.xlu0 %4373  ;;  %5693 = vpow2.f32 %v4327_v57  ;;  %v8899_v45 = vsub.f32 %v8631_v15, %v4132_v0 }
 0x983   :  { %v4629_v18 = vsub.f32 %v8568_v48, %v4504_v58  ;;  %5695 = vlog2.f32 %v4374_v14 }
 0x984   :  { %v5690_v60 = vpop.eup %5689  ;;  %v4323_v5 = vmul.f32 1.442695, %v8899_v45 }
 0x985   :  { %4693 = vst [vmem:[#allocation11 + $0x10] sm:$0xff] %v4629_v18  ;;  %v4500_v2 = vmul.f32 0.6931472, %v5690_v60  ;;  %v4384_v8 = vpop.xlane.xlu1 %4383 }
 0x986   :  { %v4138_v35 = vpop.xlane.xlu0 %4137  ;;  %5697 = vpow2.f32 %v4323_v5 }
 0x987   :  { %v8904_v7 = vsub.f32 %v8638_v38, %v4138_v35  ;;  %v4627_v43 = vsub.f32 %v8584_v46, %v4500_v2  ;;  %5699 = vlog2.f32 %v4384_v8 }
 0x989   :  { %v5692_v57 = vpop.eup %5691  ;;  %v4329_v15 = vmul.f32 1.442695, %v8904_v7  ;;  %4691 = vst [vmem:[#allocation11] sm:$0xff] %v4627_v43  ;;  %v4380_v58 = vpop.xlane.xlu1 %4379 }
 0x98a   :  { %v4506_v48 = vmul.f32 0.6931472, %v5692_v57  ;;  %v4134_v0 = vpop.xlane.xlu0 %4133 }
 0x98b   :  { %5701 = vpow2.f32 %v4329_v15  ;;  %v8909_v14 = vsub.f32 %v8648_v56, %v4134_v0 }
 0x98c   :  { %v4630_v18 = vsub.f32 %v8601_v53, %v4506_v48  ;;  %5703 = vlog2.f32 %v4380_v58  ;;  %v5694_v60 = vpop.eup %5693 }
 0x98d   :  { %v4325_v38 = vmul.f32 1.442695, %v8909_v14  ;;  %v5696_v5 = vpop.eup %5695  ;;  %4455 = vadd.xlane.f32.xlu1 %v5694_v60  ;;  %v4144_v46 = vpop.xlane.xlu1 %4143 }
 0x98e   :  { %4694 = vst [vmem:[#allocation11 + $0x18] sm:$0xff] %v4630_v18  ;;  %v4386_v2 = vpop.xlane.xlu0 %4385  ;;  %v4502_v8 = vmul.f32 0.6931472, %v5696_v5  ;;  %v8914_v35 = vsub.f32 %v8661_v50, %v4144_v46 }
 0x98f   :  { %5705 = vpow2.f32 %v4325_v38 }
 0x990   :  { %5707 = vlog2.f32 %v4386_v2  ;;  %v5698_v43 = vpop.eup %5697  ;;  %v4628_v56 = vsub.f32 %v8598_v23, %v4502_v8  ;;  %v4335_v53 = vmul.f32 1.442695, %v8914_v35 }
 0x991   :  { %v5700_v57 = vpop.eup %5699  ;;  %4451 = vadd.xlane.f32.xlu1 %v5698_v43  ;;  %v4140_v15 = vpop.xlane.xlu1 %4139 }
 0x992   :  { %v4382_v48 = vpop.xlane.xlu0 %4381  ;;  %4692 = vst [vmem:[#allocation11 + $0x8] sm:$0xff] %v4628_v56  ;;  %v4512_v58 = vmul.f32 0.6931472, %v5700_v57  ;;  %5709 = vpow2.f32 %v4335_v53  ;;  %v8919_v0 = vsub.f32 %v8671_v1, %v4140_v15 }
 0x993   :  { %5711 = vlog2.f32 %v4382_v48 }
 0x994   :  { %v4633_v50 = vsub.f32 %v8607_v33, %v4512_v58  ;;  %v4331_v60 = vmul.f32 1.442695, %v8919_v0 }
 0x995   :  { %v5702_v18 = vpop.eup %5701  ;;  %v4392_v23 = vpop.xlane.xlu1 %4391 }
 0x996   :  { %v5704_v38 = vpop.eup %5703  ;;  %4457 = vadd.xlane.f32.xlu0 %v5702_v18  ;;  %v4146_v5 = vpop.xlane.xlu0 %4145  ;;  %4697 = vst [vmem:[#allocation11 + $0x30] sm:$0xff] %v4633_v50  ;;  %5713 = vpow2.f32 %v4331_v60 }
 0x997   :  { %v4508_v46 = vmul.f32 0.6931472, %v5704_v38  ;;  %v8924_v2 = vsub.f32 %v8678_v55, %v4146_v5  ;;  %5715 = vlog2.f32 %v4392_v23 }
 0x999   :  { %v5706_v8 = vpop.eup %5705  ;;  %v4631_v1 = vsub.f32 %v8615_v16, %v4508_v46  ;;  %v4337_v43 = vmul.f32 1.442695, %v8924_v2  ;;  %v4388_v33 = vpop.xlane.xlu1 %4387 }
 0x99a   :  { %v5708_v56 = vpop.eup %5707  ;;  %4453 = vadd.xlane.f32.xlu0 %v5706_v8  ;;  %v4142_v53 = vpop.xlane.xlu0 %4141 }
 0x99b   :  { %4695 = vst [vmem:[#allocation11 + $0x20] sm:$0xff] %v4631_v1  ;;  %v4514_v57 = vmul.f32 0.6931472, %v5708_v56  ;;  %5717 = vpow2.f32 %v4337_v43  ;;  %v8929_v15 = vsub.f32 %v8688_v54, %v4142_v53 }
 0x99c   :  { %5719 = vlog2.f32 %v4388_v33  ;;  %v5710_v48 = vpop.eup %5709 }
 0x99d   :  { %v4634_v55 = vsub.f32 %v8612_v61, %v4514_v57  ;;  %v4333_v58 = vmul.f32 1.442695, %v8929_v15  ;;  %v5712_v18 = vpop.eup %5711  ;;  %4463 = vadd.xlane.f32.xlu1 %v5710_v48  ;;  %v4152_v16 = vpop.xlane.xlu1 %4151 }
 0x99e   :  { %v4394_v50 = vpop.xlane.xlu0 %4393  ;;  %v4510_v60 = vmul.f32 0.6931472, %v5712_v18  ;;  %v8934_v38 = vsub.f32 %v8701_v29, %v4152_v16 }
 0x99f   :  { %4698 = vst [vmem:[#allocation11 + $0x38] sm:$0xff] %v4634_v55  ;;  %5721 = vpow2.f32 %v4333_v58 }
 0x9a0   :  { %5723 = vlog2.f32 %v4394_v50  ;;  %v5714_v23 = vpop.eup %5713  ;;  %v4632_v54 = vsub.f32 %v8626_v39, %v4510_v60  ;;  %v4343_v5 = vmul.f32 1.442695, %v8934_v38 }
 0x9a1   :  { %v5716_v46 = vpop.eup %5715  ;;  %4459 = vadd.xlane.f32.xlu1 %v5714_v23  ;;  %v4148_v61 = vpop.xlane.xlu1 %4147 }
 0x9a2   :  { %v4390_v8 = vpop.xlane.xlu0 %4389  ;;  %4696 = vst [vmem:[#allocation11 + $0x28] sm:$0xff] %v4632_v54  ;;  %v4520_v1 = vmul.f32 0.6931472, %v5716_v46  ;;  %5725 = vpow2.f32 %v4343_v5  ;;  %v8939_v43 = vsub.f32 %v8711_v44, %v4148_v61 }
 0x9a3   :  { %5727 = vlog2.f32 %v4390_v8 }
 0x9a4   :  { %v4637_v29 = vsub.f32 %v8642_v34, %v4520_v1  ;;  %v4339_v33 = vmul.f32 1.442695, %v8939_v43 }
 0x9a5   :  { %v5718_v56 = vpop.eup %5717  ;;  %v4400_v39 = vpop.xlane.xlu1 %4399 }
 0x9a6   :  { %v5720_v53 = vpop.eup %5719  ;;  %4465 = vadd.xlane.f32.xlu0 %v5718_v56  ;;  %v4154_v57 = vpop.xlane.xlu0 %4153  ;;  %4701 = vst [vmem:[#allocation11 + $0x50] sm:$0xff] %v4637_v29  ;;  %5729 = vpow2.f32 %v4339_v33 }
 0x9a7   :  { %v4516_v48 = vmul.f32 0.6931472, %v5720_v53  ;;  %v8944_v55 = vsub.f32 %v8718_v24, %v4154_v57  ;;  %5731 = vlog2.f32 %v4400_v39 }
 0x9a9   :  { %v5722_v58 = vpop.eup %5721  ;;  %v4635_v44 = vsub.f32 %v8655_v49, %v4516_v48  ;;  %v4345_v18 = vmul.f32 1.442695, %v8944_v55  ;;  %v4396_v34 = vpop.xlane.xlu1 %4395 }
 0x9aa   :  { %v5724_v16 = vpop.eup %5723  ;;  %4461 = vadd.xlane.f32.xlu0 %v5722_v58  ;;  %v4150_v50 = vpop.xlane.xlu0 %4149 }
 0x9ab   :  { %4699 = vst [vmem:[#allocation11 + $0x40] sm:$0xff] %v4635_v44  ;;  %v4522_v60 = vmul.f32 0.6931472, %v5724_v16  ;;  %5733 = vpow2.f32 %v4345_v18  ;;  %v8949_v23 = vsub.f32 %v8728_v9, %v4150_v50 }
 0x9ac   :  { %5735 = vlog2.f32 %v4396_v34  ;;  %v5726_v54 = vpop.eup %5725 }
 0x9ad   :  { %v4638_v24 = vsub.f32 %v8652_v42, %v4522_v60  ;;  %v4341_v5 = vmul.f32 1.442695, %v8949_v23  ;;  %v5728_v46 = vpop.eup %5727  ;;  %4471 = vadd.xlane.f32.xlu1 %v5726_v54  ;;  %v4160_v49 = vpop.xlane.xlu1 %4159 }
 0x9ae   :  { %v4402_v61 = vpop.xlane.xlu0 %4401  ;;  %v4518_v8 = vmul.f32 0.6931472, %v5728_v46  ;;  %v8954_v1 = vsub.f32 %v8741_v36, %v4160_v49  ;;  %v9884_v36 = vld [vmem:[#allocation16_spill] sm:$0xff] }
 0x9af   :  { %4702 = vst [vmem:[#allocation11 + $0x58] sm:$0xff] %v4638_v24  ;;  %5737 = vpow2.f32 %v4341_v5 }
 0x9b0   :  { %5739 = vlog2.f32 %v4402_v61  ;;  %v5730_v56 = vpop.eup %5729  ;;  %v4636_v9 = vsub.f32 %v8666_v22, %v4518_v8  ;;  %v4351_v29 = vmul.f32 1.442695, %v8954_v1  ;;  %v9886_v8 = vld [vmem:[#allocation24_spill] sm:$0xff] }
 0x9b1   :  { %v5732_v33 = vpop.eup %5731  ;;  %4467 = vadd.xlane.f32.xlu1 %v5730_v56  ;;  %v4156_v42 = vpop.xlane.xlu1 %4155 }
 0x9b2   :  { %v4398_v53 = vpop.xlane.xlu0 %4397  ;;  %4700 = vst [vmem:[#allocation11 + $0x48] sm:$0xff] %v4636_v9  ;;  %v4528_v39 = vmul.f32 0.6931472, %v5732_v33  ;;  %5741 = vpow2.f32 %v4351_v29  ;;  %v8959_v57 = vsub.f32 %v8751_v30, %v4156_v42  ;;  %v9885_v30 = vld [vmem:[#allocation18_spill] sm:$0xff] }
 0x9b3   :  { %5743 = vlog2.f32 %v4398_v53 }
 0x9b4   :  { %v4641_v58 = vsub.f32 %v9884_v36, %v4528_v39  ;;  %v4347_v44 = vmul.f32 1.442695, %v8959_v57 }
 0x9b5   :  { %v5734_v48 = vpop.eup %5733  ;;  %v4408_v22 = vpop.xlane.xlu1 %4407 }
 0x9b6   :  { %v5736_v18 = vpop.eup %5735  ;;  %4473 = vadd.xlane.f32.xlu0 %v5734_v48  ;;  %v4162_v16 = vpop.xlane.xlu0 %4161  ;;  %4705 = vst [vmem:[#allocation11 + $0x70] sm:$0xff] %v4641_v58  ;;  %5745 = vpow2.f32 %v4347_v44  ;;  %v9888_v44 = vld [vmem:[#allocation19_spill] sm:$0xff] }
 0x9b7   :  { %v4524_v34 = vmul.f32 0.6931472, %v5736_v18  ;;  %v8964_v50 = vsub.f32 %v8758_v51, %v4162_v16  ;;  %5747 = vlog2.f32 %v4408_v22  ;;  %v9887_v51 = vld [vmem:[#allocation17_spill] sm:$0xff] }
 0x9b9   :  { %v5738_v60 = vpop.eup %5737  ;;  %v4639_v54 = vsub.f32 %v9885_v30, %v4524_v34  ;;  %v4353_v24 = vmul.f32 1.442695, %v8964_v50  ;;  %v4404_v46 = vpop.xlane.xlu1 %4403 }
 0x9ba   :  { %v5740_v5 = vpop.eup %5739  ;;  %4469 = vadd.xlane.f32.xlu0 %v5738_v60  ;;  %v4158_v49 = vpop.xlane.xlu0 %4157 }
 0x9bb   :  { %4703 = vst [vmem:[#allocation11 + $0x60] sm:$0xff] %v4639_v54  ;;  %v4530_v61 = vmul.f32 0.6931472, %v5740_v5  ;;  %5749 = vpow2.f32 %v4353_v24  ;;  %v8969_v56 = vsub.f32 %v9886_v8, %v4158_v49  ;;  %v9889_v54 = vld [vmem:[#allocation26_spill] sm:$0xff] }
 0x9bc   :  { %5751 = vlog2.f32 %v4404_v46  ;;  %v5742_v9 = vpop.eup %5741 }
 0x9bd   :  { %v4642_v29 = vsub.f32 %v9887_v51, %v4530_v61  ;;  %v4349_v33 = vmul.f32 1.442695, %v8969_v56  ;;  %v5744_v42 = vpop.eup %5743  ;;  %4479 = vadd.xlane.f32.xlu1 %v5742_v9  ;;  %v4168_v53 = vpop.xlane.xlu1 %4167 }
 0x9be   :  { %v4410_v39 = vpop.xlane.xlu0 %4409  ;;  %v4526_v48 = vmul.f32 0.6931472, %v5744_v42  ;;  %v8974_v36 = vsub.f32 %v8770_v11, %v4168_v53  ;;  %v9890_v11 = vld [vmem:[#allocation20_spill] sm:$0xff] }
 0x9bf   :  { %4706 = vst [vmem:[#allocation11 + $0x78] sm:$0xff] %v4642_v29  ;;  %5753 = vpow2.f32 %v4349_v33  ;;  %v9891_v33 = vld [vmem:[#allocation22_spill] sm:$0xff] }
 0x9c0   :  { %5755 = vlog2.f32 %v4410_v39  ;;  %v5746_v58 = vpop.eup %5745  ;;  %v4640_v18 = vsub.f32 %v9888_v44, %v4526_v48  ;;  %v4359_v22 = vmul.f32 1.442695, %v8974_v36 }
 0x9c1   :  { %v5748_v16 = vpop.eup %5747  ;;  %4475 = vadd.xlane.f32.xlu1 %v5746_v58  ;;  %v4164_v34 = vpop.xlane.xlu1 %4163 }
 0x9c2   :  { %v4406_v60 = vpop.xlane.xlu0 %4405  ;;  %4704 = vst [vmem:[#allocation11 + $0x68] sm:$0xff] %v4640_v18  ;;  %v4536_v30 = vmul.f32 0.6931472, %v5748_v16  ;;  %5757 = vpow2.f32 %v4359_v22  ;;  %v8979_v24 = vsub.f32 %v9889_v54, %v4164_v34  ;;  %v9892_v16 = vld [vmem:[#allocation21_spill] sm:$0xff] }
 0x9c3   :  { %5759 = vlog2.f32 %v4406_v60 }
 0x9c4   :  { %v4645_v46 = vsub.f32 %v9890_v11, %v4536_v30  ;;  %v4355_v49 = vmul.f32 1.442695, %v8979_v24 }
 0x9c5   :  { %v5750_v5 = vpop.eup %5749 }
 0x9c6   :  { %v5752_v61 = vpop.eup %5751  ;;  %4481 = vadd.xlane.f32.xlu0 %v5750_v5  ;;  %v4170_v8 = vpop.xlane.xlu0 %4169  ;;  %4709 = vst [vmem:[#allocation11 + $0x90] sm:$0xff] %v4645_v46  ;;  %5761 = vpow2.f32 %v4355_v49 }
 0x9c7   :  { %v4532_v9 = vmul.f32 0.6931472, %v5752_v61  ;;  %v8984_v51 = vsub.f32 %v8792_v47, %v4170_v8  ;;  %v9893_v61 = vld [vmem:[#allocation23_spill] sm:$0xff] }
 0x9c8   :  { %v4176_v39 = vpop.xlane.xlu1 %4175 }
 0x9c9   :  { %v5754_v29 = vpop.eup %5753  ;;  %v4643_v42 = vsub.f32 %v9891_v33, %v4532_v9  ;;  %v4361_v53 = vmul.f32 1.442695, %v8984_v51  ;;  %v8993_v47 = vsub.f32 %v8807_v59, %v4176_v39 }
 0x9ca   :  { %v5756_v48 = vpop.eup %5755  ;;  %4477 = vadd.xlane.f32.xlu0 %v5754_v29  ;;  %v4166_v58 = vpop.xlane.xlu0 %4165 }
 0x9cb   :  { %4707 = vst [vmem:[#allocation11 + $0x80] sm:$0xff] %v4643_v42  ;;  %v4538_v44 = vmul.f32 0.6931472, %v5756_v48  ;;  %5763 = vpow2.f32 %v4361_v53  ;;  %v8989_v18 = vsub.f32 %v8813_v3, %v4166_v58  ;;  %v4367_v59 = vmul.f32 1.442695, %v8993_v47 }
 0x9cc   :  { %v5758_v22 = vpop.eup %5757  ;;  %v4172_v30 = vpop.xlane.xlu1 %4171 }
 0x9cd   :  { %v4646_v34 = vsub.f32 %v9892_v16, %v4538_v44  ;;  %v4357_v60 = vmul.f32 1.442695, %v8989_v18  ;;  %v5760_v54 = vpop.eup %5759  ;;  %v8997_v5 = vsub.f32 %v8826_v19, %v4172_v30  ;;  %4487 = vadd.xlane.f32.xlu1 %v5758_v22 }
 0x9ce   :  { %v4178_v11 = vpop.xlane.xlu0 %4177  ;;  %v4534_v46 = vmul.f32 0.6931472, %v5760_v54 }
 0x9cf   :  { %4710 = vst [vmem:[#allocation11 + $0x98] sm:$0xff] %v4646_v34  ;;  %5765 = vpow2.f32 %v4357_v60  ;;  %v4363_v3 = vmul.f32 1.442695, %v8997_v5  ;;  %v9003_v9 = vsub.f32 %v8832_v63, %v4178_v11 }
 0x9d0   :  { %v5762_v49 = vpop.eup %5761  ;;  %v4644_v8 = vsub.f32 %v9893_v61, %v4534_v46  ;;  %v4412_v29 = vpop.xlane.xlu1 %4411 }
 0x9d1   :  { %5767 = vpow2.f32 %v4363_v3  ;;  %4483 = vadd.xlane.f32.xlu1 %v5762_v49  ;;  %v4369_v53 = vmul.f32 1.442695, %v9003_v9  ;;  %v9894_v3 = vld [vmem:[#allocation25_spill] sm:$0xff] }
 0x9d2   :  { %v4174_v19 = vpop.xlane.xlu0 %4173  ;;  %4708 = vst [vmem:[#allocation11 + $0x88] sm:$0xff] %v4644_v8  ;;  %5769 = vlog2.f32 %v4412_v29 }
 0x9d3   :  { %v9006_v33 = vsub.f32 %v8842_v31, %v4174_v19  ;;  %5771 = vpow2.f32 %v4367_v59  ;;  %v9895_v19 = vld [vmem:[#allocation27_spill] sm:$0xff] }
 0x9d4   :  { %v4416_v48 = vpop.xlane.xlu1 %4415 }
 0x9d5   :  { %v5764_v42 = vpop.eup %5763  ;;  %v4365_v39 = vmul.f32 1.442695, %v9006_v33  ;;  %5773 = vlog2.f32 %v4416_v48 }
 0x9d6   :  { %4489 = vadd.xlane.f32.xlu0 %v5764_v42  ;;  %v4414_v63 = vpop.xlane.xlu0 %4413 }
 0x9d7   :  { %5775 = vpow2.f32 %v4365_v39 }
 0x9d8   :  { %5777 = vlog2.f32 %v4414_v63  ;;  %v4424_v44 = vpop.xlane.xlu1 %4423 }
 0x9d9   :  { %v5766_v58 = vpop.eup %5765  ;;  %5779 = vpow2.f32 %v4369_v53 }
 0x9da   :  { %5781 = vlog2.f32 %v4424_v44  ;;  %4485 = vadd.xlane.f32.xlu0 %v5766_v58  ;;  %v4418_v31 = vpop.xlane.xlu0 %4417 }
 0x9db   :  { %5783 = vlog2.f32 %v4418_v31  ;;  %v5768_v22 = vpop.eup %5767 }
 0x9dc   :  { %4491 = vadd.xlane.f32.xlu1 %v5768_v22  ;;  %v4420_v16 = vpop.xlane.xlu1 %4419  ;;  %v5770_v34 = vpop.eup %5769  ;;  %v9896_v22 = vld [vmem:[#allocation28_spill] sm:$0xff] }
 0x9dd   :  { %5785 = vlog2.f32 %v4420_v16  ;;  %v5772_v30 = vpop.eup %5771  ;;  %v4540_v54 = vmul.f32 0.6931472, %v5770_v34 }
 0x9de   :  { %v4426_v60 = vpop.xlane.xlu0 %4425 }
 0x9df   :  { %5787 = vlog2.f32 %v4426_v60  ;;  %v5774_v11 = vpop.eup %5773  ;;  %v4647_v49 = vsub.f32 %v9894_v3, %v4540_v54 }
 0x9e0   :  { %v4544_v61 = vmul.f32 0.6931472, %v5774_v11  ;;  %4495 = vadd.xlane.f32.xlu1 %v5772_v30 }
 0x9e1   :  { %v5776_v46 = vpop.eup %5775  ;;  %4711 = vst [vmem:[#allocation11 + $0xa0] sm:$0xff] %v4647_v49 }
 0x9e2   :  { %v5778_v8 = vpop.eup %5777  ;;  %4493 = vadd.xlane.f32.xlu0 %v5776_v46  ;;  %v4422_v59 = vpop.xlane.xlu0 %4421  ;;  %v4649_v42 = vsub.f32 %v9895_v19, %v4544_v61 }
 0x9e3   :  { %v5780_v29 = vpop.eup %5779  ;;  %v4542_v53 = vmul.f32 0.6931472, %v5778_v8  ;;  %5789 = vlog2.f32 %v4422_v59 }
 0x9e4   :  { %v5782_v39 = vpop.eup %5781  ;;  %4713 = vst [vmem:[#allocation11 + $0xb0] sm:$0xff] %v4649_v42 }
 0x9e5   :  { %v5784_v48 = vpop.eup %5783  ;;  %v4648_v63 = vsub.f32 %v8787_v13, %v4542_v53  ;;  %v4552_v58 = vmul.f32 0.6931472, %v5782_v39  ;;  %v4432_v31 = vpop.xlane.xlu1 %4431 }
 0x9e6   :  { %v4546_v44 = vmul.f32 0.6931472, %v5784_v48  ;;  %4497 = vadd.xlane.f32.xlu0 %v5780_v29  ;;  %5791 = vlog2.f32 %v4432_v31 }
 0x9e7   :  { %4712 = vst [vmem:[#allocation11 + $0xa8] sm:$0xff] %v4648_v63  ;;  %v4653_v16 = vsub.f32 %v9896_v22, %v4552_v58  ;;  %v5786_v34 = vpop.eup %5785  ;;  %v4434_v30 = vpop.xlane.xlu0 %4433 }
 0x9e8   :  { %v4650_v60 = vsub.f32 %v8798_v28, %v4546_v44  ;;  %v4548_v11 = vmul.f32 0.6931472, %v5786_v34  ;;  %5793 = vlog2.f32 %v4434_v30 }
 0x9e9   :  { %v5788_v54 = vpop.eup %5787  ;;  %4717 = vst [vmem:[#allocation11 + $0xd0] sm:$0xff] %v4653_v16  ;;  %v4428_v3 = vpop.xlane.xlu1 %4427 }
 0x9ea   :  { %4714 = vst [vmem:[#allocation11 + $0xb8] sm:$0xff] %v4650_v60  ;;  %v4554_v46 = vmul.f32 0.6931472, %v5788_v54  ;;  %v4651_v13 = vsub.f32 %v8822_v4, %v4548_v11  ;;  %5795 = vlog2.f32 %v4428_v3 }
 0x9eb   :  { %v4430_v61 = vpop.xlane.xlu0 %4429 }
 0x9ec   :  { %v4654_v49 = vsub.f32 %v8819_v6, %v4554_v46  ;;  %4715 = vst [vmem:[#allocation11 + $0xc0] sm:$0xff] %v4651_v13  ;;  %5797 = vlog2.f32 %v4430_v61 }
 0x9ed   :  { %v5790_v8 = vpop.eup %5789 }
 0x9ee   :  { %4718 = vst [vmem:[#allocation11 + $0xd8] sm:$0xff] %v4654_v49  ;;  %v4550_v59 = vmul.f32 0.6931472, %v5790_v8 }
 0x9f0   :  { %v4652_v28 = vsub.f32 %v8838_v25, %v4550_v59  ;;  %v5792_v29 = vpop.eup %5791 }
 0x9f1   :  { %v4560_v19 = vmul.f32 0.6931472, %v5792_v29 }
 0x9f2   :  { %4716 = vst [vmem:[#allocation11 + $0xc8] sm:$0xff] %v4652_v28  ;;  %v5794_v42 = vpop.eup %5793 }
 0x9f3   :  { %v4657_v53 = vsub.f32 %v8847_v41, %v4560_v19  ;;  %v4562_v39 = vmul.f32 0.6931472, %v5794_v42 }
 0x9f4   :  { %v5796_v48 = vpop.eup %5795 }
 0x9f5   :  { %4721 = vst [vmem:[#allocation11 + $0xf0] sm:$0xff] %v4657_v53  ;;  %v4658_v4 = vsub.f32 %v8851_v40, %v4562_v39  ;;  %v4556_v6 = vmul.f32 0.6931472, %v5796_v48  ;;  %v4440_v63 = vpop.xlane.xlu1 %4439 }
 0x9f6   :  { %v5798_v58 = vpop.eup %5797  ;;  %5799 = vlog2.f32 %v4440_v63 }
 0x9f7   :  { %4722 = vst [vmem:[#allocation11 + $0xf8] sm:$0xff] %v4658_v4  ;;  %v4655_v44 = vsub.f32 %v8855_v27, %v4556_v6  ;;  %v4558_v31 = vmul.f32 0.6931472, %v5798_v58  ;;  %v4442_v25 = vpop.xlane.xlu0 %4441 }
 0x9f8   :  { %5801 = vlog2.f32 %v4442_v25 }
 0x9f9   :  { %4719 = vst [vmem:[#allocation11 + $0xe0] sm:$0xff] %v4655_v44  ;;  %v4656_v22 = vsub.f32 %v8859_v17, %v4558_v31  ;;  %v4436_v16 = vpop.xlane.xlu1 %4435 }
 0x9fa   :  { %5803 = vlog2.f32 %v4436_v16 }
 0x9fb   :  { %4720 = vst [vmem:[#allocation11 + $0xe8] sm:$0xff] %v4656_v22  ;;  %v4438_v41 = vpop.xlane.xlu0 %4437 }
 0x9fc   :  { %5805 = vlog2.f32 %v4438_v41 }
 0xa00   :  { %v5800_v34 = vpop.eup %5799 }
 0xa01   :  { %v4568_v40 = vmul.f32 0.6931472, %v5800_v34 }
 0xa02   :  { %v5802_v60 = vpop.eup %5801 }
 0xa03   :  { %v4661_v30 = vsub.f32 %v8863_v62, %v4568_v40  ;;  %v4570_v54 = vmul.f32 0.6931472, %v5802_v60 }
 0xa04   :  { %v5804_v11 = vpop.eup %5803 }
 0xa05   :  { %4725 = vst [vmem:[#allocation11 + $0x110] sm:$0xff] %v4661_v30  ;;  %v4662_v27 = vsub.f32 %v8867_v20, %v4570_v54  ;;  %v4564_v46 = vmul.f32 0.6931472, %v5804_v11  ;;  %v4448_v3 = vpop.xlane.xlu1 %4447 }
 0xa06   :  { %v5806_v13 = vpop.eup %5805  ;;  %5807 = vlog2.f32 %v4448_v3 }
 0xa07   :  { %4726 = vst [vmem:[#allocation11 + $0x118] sm:$0xff] %v4662_v27  ;;  %v4659_v17 = vsub.f32 %v8871_v10, %v4564_v46  ;;  %v4566_v49 = vmul.f32 0.6931472, %v5806_v13  ;;  %v4450_v61 = vpop.xlane.xlu0 %4449 }
 0xa08   :  { %5809 = vlog2.f32 %v4450_v61 }
 0xa09   :  { %4723 = vst [vmem:[#allocation11 + $0x100] sm:$0xff] %v4659_v17  ;;  %v4660_v8 = vsub.f32 %v8875_v32, %v4566_v49  ;;  %v4444_v59 = vpop.xlane.xlu1 %4443 }
 0xa0a   :  { %5811 = vlog2.f32 %v4444_v59 }
 0xa0b   :  { %4724 = vst [vmem:[#allocation11 + $0x108] sm:$0xff] %v4660_v8  ;;  %v4446_v62 = vpop.xlane.xlu0 %4445 }
 0xa0c   :  { %5813 = vlog2.f32 %v4446_v62 }
 0xa10   :  { %v5808_v28 = vpop.eup %5807 }
 0xa11   :  { %v4576_v20 = vmul.f32 0.6931472, %v5808_v28 }
 0xa12   :  { %v5810_v29 = vpop.eup %5809 }
 0xa13   :  { %v4665_v19 = vsub.f32 %v8879_v37, %v4576_v20  ;;  %v4578_v42 = vmul.f32 0.6931472, %v5810_v29 }
 0xa14   :  { %v5812_v53 = vpop.eup %5811 }
 0xa15   :  { %4729 = vst [vmem:[#allocation11 + $0x130] sm:$0xff] %v4665_v19  ;;  %v4666_v10 = vsub.f32 %v8883_v21, %v4578_v42  ;;  %v4572_v39 = vmul.f32 0.6931472, %v5812_v53 }
 0xa16   :  { %v5814_v48 = vpop.eup %5813 }
 0xa17   :  { %4730 = vst [vmem:[#allocation11 + $0x138] sm:$0xff] %v4666_v10  ;;  %v4663_v32 = vsub.f32 %v8887_v12, %v4572_v39  ;;  %v4574_v4 = vmul.f32 0.6931472, %v5814_v48 }
 0xa19   :  { %4727 = vst [vmem:[#allocation11 + $0x120] sm:$0xff] %v4663_v32  ;;  %v4664_v6 = vsub.f32 %v8891_v52, %v4574_v4 }
 0xa1a   :  { %v4456_v63 = vpop.xlane.xlu1 %4455 }
 0xa1b   :  { %4728 = vst [vmem:[#allocation11 + $0x128] sm:$0xff] %v4664_v6  ;;  %5815 = vlog2.f32 %v4456_v63 }
 0xa1e   :  { %v4452_v58 = vpop.xlane.xlu1 %4451 }
 0xa1f   :  { %5817 = vlog2.f32 %v4452_v58 }
 0xa23   :  { %v4458_v37 = vpop.xlane.xlu0 %4457 }
 0xa24   :  { %5819 = vlog2.f32 %v4458_v37 }
 0xa25   :  { %v5816_v44 = vpop.eup %5815 }
 0xa26   :  { %v4584_v31 = vmul.f32 0.6931472, %v5816_v44 }
 0xa27   :  { %v4454_v25 = vpop.xlane.xlu0 %4453 }
 0xa28   :  { %5821 = vlog2.f32 %v4454_v25  ;;  %v4669_v21 = vsub.f32 %v8895_v26, %v4584_v31 }
 0xa29   :  { %v5818_v22 = vpop.eup %5817 }
 0xa2a   :  { %4733 = vst [vmem:[#allocation11 + $0x150] sm:$0xff] %v4669_v21  ;;  %v4580_v12 = vmul.f32 0.6931472, %v5818_v22  ;;  %v4464_v16 = vpop.xlane.xlu1 %4463 }
 0xa2b   :  { %5823 = vlog2.f32 %v4464_v16 }
 0xa2c   :  { %v4667_v52 = vsub.f32 %v8899_v45, %v4580_v12 }
 0xa2e   :  { %v5820_v41 = vpop.eup %5819  ;;  %4731 = vst [vmem:[#allocation11 + $0x140] sm:$0xff] %v4667_v52  ;;  %v4460_v40 = vpop.xlane.xlu1 %4459 }
 0xa2f   :  { %v4586_v34 = vmul.f32 0.6931472, %v5820_v41  ;;  %5825 = vlog2.f32 %v4460_v40 }
 0xa31   :  { %v4670_v60 = vsub.f32 %v8904_v7, %v4586_v34 }
 0xa32   :  { %v5822_v30 = vpop.eup %5821 }
 0xa33   :  { %4734 = vst [vmem:[#allocation11 + $0x158] sm:$0xff] %v4670_v60  ;;  %v4582_v54 = vmul.f32 0.6931472, %v5822_v30  ;;  %v4466_v11 = vpop.xlane.xlu0 %4465 }
 0xa34   :  { %5827 = vlog2.f32 %v4466_v11 }
 0xa35   :  { %v4668_v26 = vsub.f32 %v8909_v14, %v4582_v54  ;;  %v5824_v27 = vpop.eup %5823 }
 0xa36   :  { %v4592_v46 = vmul.f32 0.6931472, %v5824_v27 }
 0xa37   :  { %4732 = vst [vmem:[#allocation11 + $0x148] sm:$0xff] %v4668_v26  ;;  %v4462_v3 = vpop.xlane.xlu0 %4461 }
 0xa38   :  { %5829 = vlog2.f32 %v4462_v3  ;;  %v4673_v45 = vsub.f32 %v8914_v35, %v4592_v46 }
 0xa39   :  { %v5826_v13 = vpop.eup %5825 }
 0xa3a   :  { %4737 = vst [vmem:[#allocation11 + $0x170] sm:$0xff] %v4673_v45  ;;  %v4588_v17 = vmul.f32 0.6931472, %v5826_v13  ;;  %v4472_v49 = vpop.xlane.xlu1 %4471 }
 0xa3b   :  { %5831 = vlog2.f32 %v4472_v49 }
 0xa3c   :  { %v4671_v7 = vsub.f32 %v8919_v0, %v4588_v17 }
 0xa3e   :  { %v5828_v61 = vpop.eup %5827  ;;  %4735 = vst [vmem:[#allocation11 + $0x160] sm:$0xff] %v4671_v7  ;;  %v4468_v59 = vpop.xlane.xlu1 %4467 }
 0xa3f   :  { %v4594_v8 = vmul.f32 0.6931472, %v5828_v61  ;;  %5833 = vlog2.f32 %v4468_v59 }
 0xa41   :  { %v4674_v14 = vsub.f32 %v8924_v2, %v4594_v8 }
 0xa42   :  { %v5830_v62 = vpop.eup %5829 }
 0xa43   :  { %4738 = vst [vmem:[#allocation11 + $0x178] sm:$0xff] %v4674_v14  ;;  %v4590_v28 = vmul.f32 0.6931472, %v5830_v62  ;;  %v4474_v20 = vpop.xlane.xlu0 %4473 }
 0xa44   :  { %5835 = vlog2.f32 %v4474_v20 }
 0xa45   :  { %v4672_v35 = vsub.f32 %v8929_v15, %v4590_v28  ;;  %v5832_v29 = vpop.eup %5831 }
 0xa46   :  { %v4600_v19 = vmul.f32 0.6931472, %v5832_v29 }
 0xa47   :  { %4736 = vst [vmem:[#allocation11 + $0x168] sm:$0xff] %v4672_v35  ;;  %v4470_v42 = vpop.xlane.xlu0 %4469 }
 0xa48   :  { %5837 = vlog2.f32 %v4470_v42  ;;  %v4677_v0 = vsub.f32 %v8934_v38, %v4600_v19 }
 0xa49   :  { %v5834_v53 = vpop.eup %5833 }
 0xa4a   :  { %4741 = vst [vmem:[#allocation11 + $0x190] sm:$0xff] %v4677_v0  ;;  %v4596_v10 = vmul.f32 0.6931472, %v5834_v53  ;;  %v4480_v39 = vpop.xlane.xlu1 %4479 }
 0xa4b   :  { %5839 = vlog2.f32 %v4480_v39 }
 0xa4c   :  { %v4675_v2 = vsub.f32 %v8939_v43, %v4596_v10 }
 0xa4e   :  { %v5836_v48 = vpop.eup %5835  ;;  %4739 = vst [vmem:[#allocation11 + $0x180] sm:$0xff] %v4675_v2  ;;  %v4476_v4 = vpop.xlane.xlu1 %4475 }
 0xa4f   :  { %v4602_v32 = vmul.f32 0.6931472, %v5836_v48  ;;  %5841 = vlog2.f32 %v4476_v4 }
 0xa51   :  { %v4678_v15 = vsub.f32 %v8944_v55, %v4602_v32 }
 0xa52   :  { %v5838_v6 = vpop.eup %5837 }
 0xa53   :  { %4742 = vst [vmem:[#allocation11 + $0x198] sm:$0xff] %v4678_v15  ;;  %v4598_v63 = vmul.f32 0.6931472, %v5838_v6  ;;  %v4482_v58 = vpop.xlane.xlu0 %4481 }
 0xa54   :  { %5843 = vlog2.f32 %v4482_v58 }
 0xa55   :  { %v4676_v38 = vsub.f32 %v8949_v23, %v4598_v63  ;;  %v5840_v37 = vpop.eup %5839 }
 0xa56   :  { %v4608_v44 = vmul.f32 0.6931472, %v5840_v37 }
 0xa57   :  { %4740 = vst [vmem:[#allocation11 + $0x188] sm:$0xff] %v4676_v38  ;;  %v4478_v31 = vpop.xlane.xlu0 %4477 }
 0xa58   :  { %5845 = vlog2.f32 %v4478_v31  ;;  %v4681_v43 = vsub.f32 %v8954_v1, %v4608_v44 }
 0xa59   :  { %v5842_v25 = vpop.eup %5841 }
 0xa5a   :  { %4745 = vst [vmem:[#allocation11 + $0x1b0] sm:$0xff] %v4681_v43  ;;  %v4604_v21 = vmul.f32 0.6931472, %v5842_v25  ;;  %v4488_v22 = vpop.xlane.xlu1 %4487 }
 0xa5b   :  { %5847 = vlog2.f32 %v4488_v22 }
 0xa5c   :  { %v4679_v55 = vsub.f32 %v8959_v57, %v4604_v21 }
 0xa5e   :  { %v5844_v12 = vpop.eup %5843  ;;  %4743 = vst [vmem:[#allocation11 + $0x1a0] sm:$0xff] %v4679_v55  ;;  %v4484_v52 = vpop.xlane.xlu1 %4483 }
 0xa5f   :  { %v4610_v16 = vmul.f32 0.6931472, %v5844_v12  ;;  %5849 = vlog2.f32 %v4484_v52 }
 0xa61   :  { %v4682_v23 = vsub.f32 %v8964_v50, %v4610_v16 }
 0xa62   :  { %v5846_v41 = vpop.eup %5845 }
 0xa63   :  { %4746 = vst [vmem:[#allocation11 + $0x1b8] sm:$0xff] %v4682_v23  ;;  %v4606_v34 = vmul.f32 0.6931472, %v5846_v41  ;;  %v4490_v40 = vpop.xlane.xlu0 %4489 }
 0xa64   :  { %5851 = vlog2.f32 %v4490_v40 }
 0xa65   :  { %v4680_v1 = vsub.f32 %v8969_v56, %v4606_v34  ;;  %v5848_v60 = vpop.eup %5847 }
 0xa66   :  { %v4616_v30 = vmul.f32 0.6931472, %v5848_v60 }
 0xa67   :  { %4744 = vst [vmem:[#allocation11 + $0x1a8] sm:$0xff] %v4680_v1  ;;  %v4486_v54 = vpop.xlane.xlu0 %4485 }
 0xa68   :  { %5853 = vlog2.f32 %v4486_v54  ;;  %v4685_v57 = vsub.f32 %v8974_v36, %v4616_v30 }
 0xa69   :  { %v5850_v11 = vpop.eup %5849  ;;  %v4492_v26 = vpop.xlane.xlu1 %4491 }
 0xa6a   :  { %4749 = vst [vmem:[#allocation11 + $0x1d0] sm:$0xff] %v4685_v57  ;;  %v4612_v27 = vmul.f32 0.6931472, %v5850_v11  ;;  %5855 = vlog2.f32 %v4492_v26 }
 0xa6c   :  { %v4683_v50 = vsub.f32 %v8979_v24, %v4612_v27 }
 0xa6d   :  { %v4496_v3 = vpop.xlane.xlu1 %4495 }
 0xa6e   :  { %v5852_v46 = vpop.eup %5851  ;;  %4747 = vst [vmem:[#allocation11 + $0x1c0] sm:$0xff] %v4683_v50  ;;  %5857 = vlog2.f32 %v4496_v3 }
 0xa6f   :  { %v4618_v45 = vmul.f32 0.6931472, %v5852_v46  ;;  %v4494_v56 = vpop.xlane.xlu0 %4493 }
 0xa70   :  { %5859 = vlog2.f32 %v4494_v56 }
 0xa71   :  { %v4686_v13 = vsub.f32 %v8984_v51, %v4618_v45 }
 0xa72   :  { %v5854_v17 = vpop.eup %5853 }
 0xa73   :  { %4750 = vst [vmem:[#allocation11 + $0x1d8] sm:$0xff] %v4686_v13  ;;  %v4614_v49 = vmul.f32 0.6931472, %v5854_v17  ;;  %v4498_v36 = vpop.xlane.xlu0 %4497 }
 0xa74   :  { %5861 = vlog2.f32 %v4498_v36  ;;  %v5856_v7 = vpop.eup %5855 }
 0xa75   :  { %v4684_v61 = vsub.f32 %v8989_v18, %v4614_v49  ;;  %v4620_v8 = vmul.f32 0.6931472, %v5856_v7 }
 0xa77   :  { %4748 = vst [vmem:[#allocation11 + $0x1c8] sm:$0xff] %v4684_v61  ;;  %v4687_v24 = vsub.f32 %v8997_v5, %v4620_v8 }
 0xa78   :  { %v5858_v59 = vpop.eup %5857 }
 0xa79   :  { %4751 = vst [vmem:[#allocation11 + $0x1e0] sm:$0xff] %v4687_v24  ;;  %v4624_v62 = vmul.f32 0.6931472, %v5858_v59 }
 0xa7a   :  { %v5860_v14 = vpop.eup %5859 }
 0xa7b   :  { %v4622_v28 = vmul.f32 0.6931472, %v5860_v14  ;;  %v4689_v20 = vsub.f32 %v8993_v47, %v4624_v62 }
 0xa7d   :  { %v4688_v51 = vsub.f32 %v9006_v33, %v4622_v28  ;;  %4753 = vst [vmem:[#allocation11 + $0x1f0] sm:$0xff] %v4689_v20 }
 0xa7e   :  { %v5862_v35 = vpop.eup %5861 }
 0xa7f   :  { %4752 = vst [vmem:[#allocation11 + $0x1e8] sm:$0xff] %v4688_v51  ;;  %v4626_v29 = vmul.f32 0.6931472, %v5862_v35 }
 0xa81   :  { %v4690_v18 = vsub.f32 %v9003_v9, %v4626_v29 }
 0xa83   :  { %4754 = vst [vmem:[#allocation11 + $0x1f8] sm:$0xff] %v4690_v18 }
 0xa84   :  { %6048 = shalt.err (!%p6045_p2)
}
 0xa85   :  { %s6049_s18 = scalar_lea.hbm %s9080_s11, 8192 }
 0xa86   :  { %p6050_p3 = scmp.ne.s32.totalorder %s9080_s11, %s6049_s18  ;;  %p6053_p4 = scmp.lt.u32.totalorder %s6049_s18, %s9080_s11 }
 0xa88   :  { %p6055_p5 = pnand %p6053_p4, %p6050_p3 }
 0xa8a   :  { %6058 = shalt.err (!%p6055_p5)
}
 0xa8b   :  { %4766 = dma.vmem_to_hbm [thread:$0]  %s4761_s20, 8192, %s9080_s11, [#allocation4], %s6072_s7, %s6072_s7, %s6073_s13  }
 0xa8c   :  { %6065 = dma.done.wait [#allocation4], 8192  }
 0xa8d   :  { %6066 = vsyncadd [#allocation4], 4294959104 }
 0xa8e   :  { %4770 = vsyncpa [#allocation3], 1 }
 0xa8f   :  { %4771 = vsyncpa [#allocation6], 1 }
 0xa90   :  { %4772 = vsyncpa [#allocation9], 1 }
 0xa91   :  { %4773 = vsyncpa [#allocation4], 1 }

</bundles_post_ra>
